<compile_context>
chip_gen: v7x
topology: tpu7x:2x2x1
jax: 0.10.0
libtpu: 0.0.40
codegen_flags: <defaults>
</compile_context>

<pallas_src>
import functools

import numpy as np
import jax
import jax.numpy as jnp
from jax.experimental import pallas as pl
from jax.experimental.pallas import tpu as pltpu


# ----------------------------------------------------------------------------
# Static tap / layout metadata for ConvTranspose2d(k=3, s=2, p=1, out_pad=1)
# ----------------------------------------------------------------------------
# Output plane p=(a,b) holds out[2y+a, 2x+b]; shift s indexes the input sample
# used: 0 -> in[y, x], 1 -> in[y, x+1], 2 -> in[y+1, x], 3 -> in[y+1, x+1].
_TAP_OF = {
    (0, 0): {0: (1, 1)},
    (0, 1): {0: (1, 2), 1: (1, 0)},
    (1, 0): {0: (2, 1), 2: (0, 1)},
    (1, 1): {0: (2, 2), 1: (2, 0), 2: (0, 2), 3: (0, 0)},
}
_SHIFT_OF = {0: (0, 0), 1: (0, 1), 2: (1, 0), 3: (1, 1)}


def _hierarchical_lanes(H0, W0, levels):
    """Lane index of every spatial position for a parity-blocked layout with
    `levels` 2x-upsampling levels stacked on a row-major H0 x W0 base."""
    lane = np.arange(H0 * W0, dtype=np.int64).reshape(H0, W0)
    for _ in range(levels):
        H, W = lane.shape
        new = np.zeros((2 * H, 2 * W), np.int64)
        for a in range(2):
            for b in range(2):
                new[a::2, b::2] = (2 * a + b) * (H * W) + lane
        lane = new
    return lane


def _shift_masks(lane_of):
    """In a parity-blocked layout, a spatial +1 shift maps to a few constant
    lane offsets.  Returns (masks (n_cls, L) f32, meta) where meta[s] is a
    tuple of (lane_offset, mask_row) for s in (x+1, y+1, x+1&y+1)."""
    H, W = lane_of.shape
    L = H * W
    pos = np.zeros((L, 2), np.int64)
    for Y in range(H):
        for X in range(W):
            pos[lane_of[Y, X]] = (Y, X)
    rows, meta = [], []
    for dy, dx in ((0, 1), (1, 0), (1, 1)):
        classes = {}
        for l in range(L):
            Y, X = pos[l][0] + dy, pos[l][1] + dx
            if Y >= H or X >= W:
                continue                       # out of image -> stays zero
            delta = int(lane_of[Y, X]) - l
            classes.setdefault(delta, np.zeros((L,), np.float32))[l] = 1.0
        entries = []
        for delta in sorted(classes):
            entries.append((int(delta), len(rows)))
            rows.append(classes[delta])
        meta.append(tuple(entries))
    return np.stack(rows, axis=0), tuple(meta)


def _build_wall(w, B):
    """Stacked tap matrix (4*Cout*B, 4*Cin*B); rows ordered (parity, cout, n),
    cols ordered (shift, cin, n).  w is torch ConvTranspose2d (Cin,Cout,3,3)."""
    w = np.asarray(w, np.float32)
    cin, cout = w.shape[0], w.shape[1]
    eye = np.eye(B, dtype=np.float32)
    wall = np.zeros((4 * cout * B, 4 * cin * B), np.float32)
    for (a, b), taps in _TAP_OF.items():
        p = 2 * a + b
        for s, (kh, kw) in taps.items():
            wall[p * cout * B:(p + 1) * cout * B,
                 s * cin * B:(s + 1) * cin * B] = np.kron(w[:, :, kh, kw].T, eye)
    return wall


def _build_w1conv(w, H0, W0):
    """Unflatten + first ConvTranspose2d folded into one matrix
    (32*H0*W0, Cout*4*H0*W0); input cols follow torch's Unflatten layout
    (cin, y, x); output cols are (cout, parity, y, x) = (cout, L2 lane)."""
    w = np.asarray(w, np.float32)
    cin, cout = w.shape[0], w.shape[1]
    HW = H0 * W0
    m = np.zeros((cin * HW, cout * 4 * HW), np.float32)
    ri_base = np.arange(cin) * HW
    ci_base = np.arange(cout) * 4 * HW
    for (a, b), taps in _TAP_OF.items():
        p = 2 * a + b
        for s, (kh, kw) in taps.items():
            dy, dx = _SHIFT_OF[s]
            for y in range(H0):
                if y + dy >= H0:
                    continue
                for x in range(W0):
                    if x + dx >= W0:
                        continue
                    l_out = y * W0 + x
                    l_in = (y + dy) * W0 + (x + dx)
                    m[np.ix_(ri_base + l_in, ci_base + p * HW + l_out)] += \
                        w[:, :, kh, kw]
    return m


# ----------------------------------------------------------------------------
# Kernel helpers
# ----------------------------------------------------------------------------
def _bn_relu(v, pool_ref, g_ref, bt_ref, count):
    """Training-mode BatchNorm2d (biased batch stats) + ReLU on a stacked
    (rows, lanes) tile; pool_ref sums the rows of a channel group and
    broadcasts the sum back to every row of that group (exact, HIGHEST)."""
    inv_n = 1.0 / count
    rs = v.sum(axis=1, keepdims=True)
    mean = jnp.dot(pool_ref[...], rs, precision=jax.lax.Precision.HIGHEST,
                   preferred_element_type=jnp.float32) * inv_n
    c = v - mean
    rv = (c * c).sum(axis=1, keepdims=True)
    var = jnp.dot(pool_ref[...], rv, precision=jax.lax.Precision.HIGHEST,
                  preferred_element_type=jnp.float32) * inv_n
    scale = jax.lax.rsqrt(var + 1e-5) * g_ref[...]
    return jnp.maximum(c * scale + bt_ref[...], 0.0)


def _assemble_shift_blocks(sc, off, lanes, rows, mask_ref, meta):
    """Build the fx / fy / fxy row blocks of the stacked conv input F from the
    carried map stored in sc[0:rows, off:off+lanes].  Each shift is a sum of
    a few static lane-offset slices times precomputed 0/1 masks."""
    for s_idx, classes in enumerate(meta):
        acc = None
        for delta, mrow in classes:
            v = sc[0:rows, off + delta: off + delta + lanes] * \
                mask_ref[mrow:mrow + 1, :]
            acc = v if acc is None else acc + v
        sc[(s_idx + 1) * rows:(s_idx + 2) * rows, off:off + lanes] = acc


# ----------------------------------------------------------------------------
# Fused decoder kernel
# ----------------------------------------------------------------------------
def _decoder_kernel(x_ref, w1_ref, b1_ref, w2_ref, b2_ref, w1conv_ref,
                    pool1_ref, g1_ref, bt1_ref,
                    wall2_ref, pool2_ref, g2_ref, bt2_ref, mask2_ref,
                    wall3_ref, cb3_ref, mask3_ref,
                    o_ref, scA, scB,
                    *, B, H0, W0, meta2, meta3):
    f32 = jnp.float32
    L2 = 4 * H0 * W0                    # lanes of the 2H0 x 2W0 carried map
    L3 = 4 * L2                         # lanes of the 4H0 x 4W0 carried map
    rows2 = g1_ref.shape[0]             # Cout1 * B  (= layer-2 Cin * B)
    rows3 = g2_ref.shape[0] // 4        # Cout2 * B  (= layer-3 Cin * B)
    c1 = rows2 // B                     # Cout1
    OFF2, OFF3 = L2, L3                 # lane padding on each side of the map

    # ------------------ decoder_lin: (Linear -> ReLU) x 2 -------------------
    h = jnp.dot(x_ref[...], w1_ref[...], preferred_element_type=f32) + b1_ref[...]
    h = jnp.maximum(h, 0.0)
    h = jnp.dot(h, w2_ref[...], preferred_element_type=f32) + b2_ref[...]
    h = jnp.maximum(h, 0.0)                                   # (B, 32*H0*W0)

    # ---- layer 1: unflatten + ConvTranspose2d folded into ONE matmul -------
    # columns of y1 are (cout, parity, in-plane pos) == (cout, L2 lane)
    y1 = jnp.dot(h, w1conv_ref[...], preferred_element_type=f32)  # (B, c1*L2)

    # ---- transition to the carried layout: rows (cout, n), lanes = L2 ------
    scA[0:rows2, :] = jnp.zeros((rows2, scA.shape[1]), f32)
    for d in range(c1):
        scA[d * B:(d + 1) * B, OFF2:OFF2 + L2] = y1[:, d * L2:(d + 1) * L2]

    # ---- BatchNorm2d(16) + ReLU (training-mode batch stats) ----------------
    m1 = _bn_relu(scA[0:rows2, OFF2:OFF2 + L2], pool1_ref, g1_ref, bt1_ref,
                  B * L2)
    scA[0:rows2, OFF2:OFF2 + L2] = m1

    # ---- layer 2: shift-block assembly + single stacked tap matmul ---------
    _assemble_shift_blocks(scA, OFF2, L2, rows2, mask2_ref, meta2)
    p2 = jnp.dot(wall2_ref[...], scA[:, OFF2:OFF2 + L2],
                 preferred_element_type=f32)                  # (4*Cout2*B, L2)

    # ---- BatchNorm2d(8) + ReLU ----------------------------------------------
    p2 = _bn_relu(p2, pool2_ref, g2_ref, bt2_ref, 4 * B * L2)

    # ---- transition to layer-3 carried layout: rows (cout, n), lanes = L3 --
    scB[0:rows3, :] = jnp.zeros((rows3, scB.shape[1]), f32)
    for q in range(4):
        scB[0:rows3, OFF3 + q * L2:OFF3 + (q + 1) * L2] = \
            p2[q * rows3:(q + 1) * rows3, :]

    # ---- layer 3: shift-block assembly + single stacked tap matmul + bias --
    _assemble_shift_blocks(scB, OFF3, L3, rows3, mask3_ref, meta3)
    p3 = jnp.dot(wall3_ref[...], scB[:, OFF3:OFF3 + L3],
                 preferred_element_type=f32) + cb3_ref[...]   # (4*3*B, L3)

    # ---- fused sigmoid; single aligned lane-dense store ---------------------
    o_ref[...] = pl.reciprocal(1.0 + jnp.exp(-p3), approx=True)


# ----------------------------------------------------------------------------
# Wrapper + one-time parameter preparation
# ----------------------------------------------------------------------------
def prepare_params(params, B, H0, W0):
    """One-time (outside jit) conversion of PyTorch-layout parameters into the
    constant matrices / masks consumed by the fused kernel."""
    def np32(a):
        return np.asarray(a, np.float32)

    def rep_rows(v, planes=1):          # per-channel vec -> (planes*C*B, 1)
        return np.tile(np.repeat(np32(v), B), planes).reshape(-1, 1)

    c1 = params["ct1_w"].shape[1]       # 16
    c2 = params["ct2_w"].shape[1]       # 8
    pool1 = np.kron(np.eye(c1, dtype=np.float32),
                    np.ones((B, B), np.float32))
    pool2 = np.kron(np.ones((4, 4), np.float32),
                    np.kron(np.eye(c2, dtype=np.float32),
                            np.ones((B, B), np.float32)))
    mask2, meta2 = _shift_masks(_hierarchical_lanes(H0, W0, 1))
    mask3, meta3 = _shift_masks(_hierarchical_lanes(H0, W0, 2))

    # NOTE: conv biases of the two BN'd layers are intentionally dropped:
    # training-mode BN subtracts the batch mean, so they have zero effect.
    arrays = {
        "w1": np32(params["w1"]), "b1": np32(params["b1"]).reshape(1, -1),
        "w2": np32(params["w2"]), "b2": np32(params["b2"]).reshape(1, -1),
        "w1conv": _build_w1conv(params["ct1_w"], H0, W0),
        "pool1": pool1,
        "g1": rep_rows(params["bn1_g"]), "bt1": rep_rows(params["bn1_b"]),
        "wall2": _build_wall(params["ct2_w"], B),
        "pool2": pool2,
        "g2": rep_rows(params["bn2_g"], 4), "bt2": rep_rows(params["bn2_b"], 4),
        "mask2": mask2,
        "wall3": _build_wall(params["ct3_w"], B),
        "cb3": rep_rows(params["ct3_b"], 4),
        "mask3": mask3,
    }
    return {k: jnp.asarray(v) for k, v in arrays.items()}, meta2, meta3


def decoder_forward(x, kp, meta2, meta3, *, B, H0, W0):
    L2, L3 = 4 * H0 * W0, 16 * H0 * W0
    rows2 = kp["g1"].shape[0]              # Cout1 * B
    rows3 = kp["g2"].shape[0] // 4         # Cout2 * B
    out_rows = kp["cb3"].shape[0]          # 4 * 3 * B
    c3 = out_rows // (4 * B)
    out2d = pl.pallas_call(
        functools.partial(_decoder_kernel, B=B, H0=H0, W0=W0,
                          meta2=meta2, meta3=meta3),
        out_shape=jax.ShapeDtypeStruct((out_rows, L3), jnp.float32),
        scratch_shapes=[
            pltpu.VMEM((4 * rows2, 3 * L2), jnp.float32),
            pltpu.VMEM((4 * rows3, 3 * L3), jnp.float32),
        ],
    )(x, kp["w1"], kp["b1"], kp["w2"], kp["b2"], kp["w1conv"],
      kp["pool1"], kp["g1"], kp["bt1"],
      kp["wall2"], kp["pool2"], kp["g2"], kp["bt2"], kp["mask2"],
      kp["wall3"], kp["cb3"], kp["mask3"])
    # rows are (a3, b3, cout, n); lanes are (a2, b2, a1, b1, y1, x1);
    # pixel = (8*y1 + 4*a1 + 2*a2 + a3, 8*x1 + 4*b1 + 2*b2 + b3).
    o = out2d.reshape(2, 2, c3, B, 2, 2, 2, 2, H0, W0)
    o = o.transpose(3, 2, 8, 6, 4, 0, 9, 7, 5, 1)
    return o.reshape(B, c3, 8 * H0, 8 * W0)


# ----------------------------------------------------------------------------
# Pure-numpy reference (independent formulation)
# ----------------------------------------------------------------------------
def ref_conv_transpose(x, w, b, stride=2, pad=1, out_pad=1):
    N, Cin, H, W = x.shape
    Cout = w.shape[1]
    Ho = (H - 1) * stride - 2 * pad + 3 + out_pad
    Wo = (W - 1) * stride - 2 * pad + 3 + out_pad
    out = np.zeros((N, Cout, Ho, Wo), np.float64)
    for i in range(H):
        for j in range(W):
            contrib = np.einsum("nc,cdhw->ndhw", x[:, :, i, j], w)
            for kh in range(3):
                oy = i * stride - pad + kh
                if oy < 0 or oy >= Ho:
                    continue
                for kw in range(3):
                    ox = j * stride - pad + kw
                    if ox < 0 or ox >= Wo:
                        continue
                    out[:, :, oy, ox] += contrib[:, :, kh, kw]
    return out + b.reshape(1, Cout, 1, 1)


def ref_bn_relu(x, g, bt):
    mean = x.mean(axis=(0, 2, 3), keepdims=True)
    var = x.var(axis=(0, 2, 3), keepdims=True)   # biased, like torch train BN
    y = (x - mean) / np.sqrt(var + 1e-5)
    y = y * g.reshape(1, -1, 1, 1) + bt.reshape(1, -1, 1, 1)
    return np.maximum(y, 0.0)


def ref_forward(x, p, i_dim):
    H0, W0 = i_dim
    h = np.maximum(x @ p["w1"] + p["b1"], 0.0)
    h = np.maximum(h @ p["w2"] + p["b2"], 0.0)
    B = x.shape[0]
    h = h.reshape(B, 32, H0, W0)
    h = ref_bn_relu(ref_conv_transpose(h, p["ct1_w"], p["ct1_b"]),
                    p["bn1_g"], p["bn1_b"])
    h = ref_bn_relu(ref_conv_transpose(h, p["ct2_w"], p["ct2_b"]),
                    p["bn2_g"], p["bn2_b"])
    h = ref_conv_transpose(h, p["ct3_w"], p["ct3_b"])
    return 1.0 / (1.0 + np.exp(-h))


# ----------------------------------------------------------------------------
if __name__ == "__main__":
    B = 2
    encoded_space_dim = 8
    input_dim = [3, 32, 32]                        # small spatial (i_dim = 4)
    H0, W0 = input_dim[1] // 8, input_dim[2] // 8  # (4, 4)

    keys = jax.random.split(jax.random.PRNGKey(0), 10)

    def u(k, shape, scale):
        return jax.random.uniform(k, shape, jnp.float32, -scale, scale)

    params = {
        "w1": u(keys[0], (encoded_space_dim, 128), 0.2),
        "b1": u(keys[1], (128,), 0.2),
        "w2": u(keys[2], (128, H0 * W0 * 32), 0.08),
        "b2": u(keys[3], (H0 * W0 * 32,), 0.08),
        "ct1_w": u(keys[4], (32, 16, 3, 3), 0.1),   # torch ConvT2d (Cin,Cout,kh,kw)
        "ct1_b": u(keys[5], (16,), 0.1),
        "bn1_g": jnp.ones((16,), jnp.float32),
        "bn1_b": jnp.zeros((16,), jnp.float32),
        "ct2_w": u(keys[6], (16, 8, 3, 3), 0.12),
        "ct2_b": u(keys[7], (8,), 0.12),
        "bn2_g": jnp.ones((8,), jnp.float32),
        "bn2_b": jnp.zeros((8,), jnp.float32),
        "ct3_w": u(keys[8], (8, 3, 3, 3), 0.2),
        "ct3_b": u(keys[9], (3,), 0.2),
    }
    x = jax.random.normal(jax.random.PRNGKey(1), (B, encoded_space_dim),
                          jnp.float32)

    kp, meta2, meta3 = prepare_params(params, B, H0, W0)
    fwd = jax.jit(functools.partial(decoder_forward, meta2=meta2, meta3=meta3,
                                    B=B, H0=H0, W0=W0))
    out = jax.block_until_ready(fwd(x, kp))
    assert out.shape == (B, 3, input_dim[1], input_dim[2]), out.shape

    ref = ref_forward(np.asarray(x, np.float64),
                      {k: np.asarray(v, np.float64) for k, v in params.items()},
                      (H0, W0))
    np.testing.assert_allclose(np.asarray(out, np.float64), ref,
                               rtol=1e-2, atol=1e-2)
    print("KERNEL_OK")
</pallas_src>

<mosaic_0001>
module attributes {stable_mosaic.version = 11 : i64} {
  func.func @_decoder_kernel(%arg0: memref<2x8xf32, #tpu.memory_space<vmem>>, %arg1: memref<8x128xf32, #tpu.memory_space<vmem>>, %arg2: memref<1x128xf32, #tpu.memory_space<vmem>>, %arg3: memref<128x512xf32, #tpu.memory_space<vmem>>, %arg4: memref<1x512xf32, #tpu.memory_space<vmem>>, %arg5: memref<512x1024xf32, #tpu.memory_space<vmem>>, %arg6: memref<32x32xf32, #tpu.memory_space<vmem>>, %arg7: memref<32x1xf32, #tpu.memory_space<vmem>>, %arg8: memref<32x1xf32, #tpu.memory_space<vmem>>, %arg9: memref<64x128xf32, #tpu.memory_space<vmem>>, %arg10: memref<64x64xf32, #tpu.memory_space<vmem>>, %arg11: memref<64x1xf32, #tpu.memory_space<vmem>>, %arg12: memref<64x1xf32, #tpu.memory_space<vmem>>, %arg13: memref<8x64xf32, #tpu.memory_space<vmem>>, %arg14: memref<24x64xf32, #tpu.memory_space<vmem>>, %arg15: memref<24x1xf32, #tpu.memory_space<vmem>>, %arg16: memref<15x256xf32, #tpu.memory_space<vmem>>, %arg17: memref<24x256xf32, #tpu.memory_space<vmem>>, %arg18: memref<128x192xf32, #tpu.memory_space<vmem>>, %arg19: memref<64x768xf32, #tpu.memory_space<vmem>>) attributes {dimension_semantics = [], scalar_prefetch = 0 : i64, scratch_operands = 2 : i64, tpu.core_type = #tpu.core_type<tc>} {
    %c0 = arith.constant 0 : index
    %c0_0 = arith.constant 0 : index
    %0 = vector.load %arg0[%c0, %c0_0] : memref<2x8xf32, #tpu.memory_space<vmem>>, vector<2x8xf32>
    %c0_1 = arith.constant 0 : index
    %c0_2 = arith.constant 0 : index
    %1 = vector.load %arg1[%c0_1, %c0_2] : memref<8x128xf32, #tpu.memory_space<vmem>>, vector<8x128xf32>
    %cst = arith.constant dense<0.000000e+00> : vector<2x128xf32>
    %2 = tpu.matmul %0, %1, %cst {dimension_numbers = #tpu.dot_dimension_numbers<[1], [0], [0], [1], [0, 0, 1, 1], [], []>} : vector<2x8xf32>, vector<8x128xf32>, vector<2x128xf32> -> vector<2x128xf32>
    %c0_3 = arith.constant 0 : index
    %c0_4 = arith.constant 0 : index
    %3 = vector.load %arg2[%c0_3, %c0_4] : memref<1x128xf32, #tpu.memory_space<vmem>>, vector<1x128xf32>
    %4 = vector.broadcast %3 : vector<1x128xf32> to vector<2x128xf32>
    %5 = arith.addf %2, %4 : vector<2x128xf32>
    %cst_5 = arith.constant 0.000000e+00 : f32
    %6 = vector.broadcast %cst_5 : f32 to vector<2x128xf32>
    %7 = arith.maximumf %5, %6 : vector<2x128xf32>
    %c0_6 = arith.constant 0 : index
    %c0_7 = arith.constant 0 : index
    %8 = vector.load %arg3[%c0_6, %c0_7] : memref<128x512xf32, #tpu.memory_space<vmem>>, vector<128x512xf32>
    %cst_8 = arith.constant dense<0.000000e+00> : vector<2x512xf32>
    %9 = tpu.matmul %7, %8, %cst_8 {dimension_numbers = #tpu.dot_dimension_numbers<[1], [0], [0], [1], [0, 0, 1, 1], [], []>} : vector<2x128xf32>, vector<128x512xf32>, vector<2x512xf32> -> vector<2x512xf32>
    %c0_9 = arith.constant 0 : index
    %c0_10 = arith.constant 0 : index
    %10 = vector.load %arg4[%c0_9, %c0_10] : memref<1x512xf32, #tpu.memory_space<vmem>>, vector<1x512xf32>
    %11 = vector.broadcast %10 : vector<1x512xf32> to vector<2x512xf32>
    %12 = arith.addf %9, %11 : vector<2x512xf32>
    %cst_11 = arith.constant 0.000000e+00 : f32
    %13 = vector.broadcast %cst_11 : f32 to vector<2x512xf32>
    %14 = arith.maximumf %12, %13 : vector<2x512xf32>
    %c0_12 = arith.constant 0 : index
    %c0_13 = arith.constant 0 : index
    %15 = vector.load %arg5[%c0_12, %c0_13] : memref<512x1024xf32, #tpu.memory_space<vmem>>, vector<512x1024xf32>
    %cst_14 = arith.constant dense<0.000000e+00> : vector<2x1024xf32>
    %16 = tpu.matmul %14, %15, %cst_14 {dimension_numbers = #tpu.dot_dimension_numbers<[1], [0], [0], [1], [0, 0, 1, 1], [], []>} : vector<2x512xf32>, vector<512x1024xf32>, vector<2x1024xf32> -> vector<2x1024xf32>
    %cst_15 = arith.constant 0.000000e+00 : f32
    %17 = vector.broadcast %cst_15 : f32 to vector<32x192xf32>
    %c0_16 = arith.constant 0 : index
    %c0_17 = arith.constant 0 : index
    %18 = vector.load %arg18[%c0_16, %c0_17] : memref<128x192xf32, #tpu.memory_space<vmem>>, vector<32x192xf32>
    tpu.vector_store %arg18[%c0_16, %c0_17], %17 {strides = array<i32>} : memref<128x192xf32, #tpu.memory_space<vmem>>, vector<32x192xf32>,
    %19 = vector.extract_strided_slice %16 {offsets = [0, 0], sizes = [2, 64], strides = [1, 1]} : vector<2x1024xf32> to vector<2x64xf32>
    %c0_18 = arith.constant 0 : index
    %c64 = arith.constant 64 : index
    %20 = vector.load %arg18[%c0_18, %c64] : memref<128x192xf32, #tpu.memory_space<vmem>>, vector<2x64xf32>
    tpu.vector_store %arg18[%c0_18, %c64], %19 {strides = array<i32>} : memref<128x192xf32, #tpu.memory_space<vmem>>, vector<2x64xf32>,
    %21 = vector.extract_strided_slice %16 {offsets = [0, 64], sizes = [2, 64], strides = [1, 1]} : vector<2x1024xf32> to vector<2x64xf32>
    %c2 = arith.constant 2 : index
    %c64_19 = arith.constant 64 : index
    %22 = vector.load %arg18[%c2, %c64_19] : memref<128x192xf32, #tpu.memory_space<vmem>>, vector<2x64xf32>
    tpu.vector_store %arg18[%c2, %c64_19], %21 {strides = array<i32>} : memref<128x192xf32, #tpu.memory_space<vmem>>, vector<2x64xf32>,
    %23 = vector.extract_strided_slice %16 {offsets = [0, 128], sizes = [2, 64], strides = [1, 1]} : vector<2x1024xf32> to vector<2x64xf32>
    %c4 = arith.constant 4 : index
    %c64_20 = arith.constant 64 : index
    %24 = vector.load %arg18[%c4, %c64_20] : memref<128x192xf32, #tpu.memory_space<vmem>>, vector<2x64xf32>
    tpu.vector_store %arg18[%c4, %c64_20], %23 {strides = array<i32>} : memref<128x192xf32, #tpu.memory_space<vmem>>, vector<2x64xf32>,
    %25 = vector.extract_strided_slice %16 {offsets = [0, 192], sizes = [2, 64], strides = [1, 1]} : vector<2x1024xf32> to vector<2x64xf32>
    %c6 = arith.constant 6 : index
    %c64_21 = arith.constant 64 : index
    %26 = vector.load %arg18[%c6, %c64_21] : memref<128x192xf32, #tpu.memory_space<vmem>>, vector<2x64xf32>
    tpu.vector_store %arg18[%c6, %c64_21], %25 {strides = array<i32>} : memref<128x192xf32, #tpu.memory_space<vmem>>, vector<2x64xf32>,
    %27 = vector.extract_strided_slice %16 {offsets = [0, 256], sizes = [2, 64], strides = [1, 1]} : vector<2x1024xf32> to vector<2x64xf32>
    %c8 = arith.constant 8 : index
    %c64_22 = arith.constant 64 : index
    %28 = vector.load %arg18[%c8, %c64_22] : memref<128x192xf32, #tpu.memory_space<vmem>>, vector<2x64xf32>
    tpu.vector_store %arg18[%c8, %c64_22], %27 {strides = array<i32>} : memref<128x192xf32, #tpu.memory_space<vmem>>, vector<2x64xf32>,
    %29 = vector.extract_strided_slice %16 {offsets = [0, 320], sizes = [2, 64], strides = [1, 1]} : vector<2x1024xf32> to vector<2x64xf32>
    %c10 = arith.constant 10 : index
    %c64_23 = arith.constant 64 : index
    %30 = vector.load %arg18[%c10, %c64_23] : memref<128x192xf32, #tpu.memory_space<vmem>>, vector<2x64xf32>
    tpu.vector_store %arg18[%c10, %c64_23], %29 {strides = array<i32>} : memref<128x192xf32, #tpu.memory_space<vmem>>, vector<2x64xf32>,
    %31 = vector.extract_strided_slice %16 {offsets = [0, 384], sizes = [2, 64], strides = [1, 1]} : vector<2x1024xf32> to vector<2x64xf32>
    %c12 = arith.constant 12 : index
    %c64_24 = arith.constant 64 : index
    %32 = vector.load %arg18[%c12, %c64_24] : memref<128x192xf32, #tpu.memory_space<vmem>>, vector<2x64xf32>
    tpu.vector_store %arg18[%c12, %c64_24], %31 {strides = array<i32>} : memref<128x192xf32, #tpu.memory_space<vmem>>, vector<2x64xf32>,
    %33 = vector.extract_strided_slice %16 {offsets = [0, 448], sizes = [2, 64], strides = [1, 1]} : vector<2x1024xf32> to vector<2x64xf32>
    %c14 = arith.constant 14 : index
    %c64_25 = arith.constant 64 : index
    %34 = vector.load %arg18[%c14, %c64_25] : memref<128x192xf32, #tpu.memory_space<vmem>>, vector<2x64xf32>
    tpu.vector_store %arg18[%c14, %c64_25], %33 {strides = array<i32>} : memref<128x192xf32, #tpu.memory_space<vmem>>, vector<2x64xf32>,
    %35 = vector.extract_strided_slice %16 {offsets = [0, 512], sizes = [2, 64], strides = [1, 1]} : vector<2x1024xf32> to vector<2x64xf32>
    %c16 = arith.constant 16 : index
    %c64_26 = arith.constant 64 : index
    %36 = vector.load %arg18[%c16, %c64_26] : memref<128x192xf32, #tpu.memory_space<vmem>>, vector<2x64xf32>
    tpu.vector_store %arg18[%c16, %c64_26], %35 {strides = array<i32>} : memref<128x192xf32, #tpu.memory_space<vmem>>, vector<2x64xf32>,
    %37 = vector.extract_strided_slice %16 {offsets = [0, 576], sizes = [2, 64], strides = [1, 1]} : vector<2x1024xf32> to vector<2x64xf32>
    %c18 = arith.constant 18 : index
    %c64_27 = arith.constant 64 : index
    %38 = vector.load %arg18[%c18, %c64_27] : memref<128x192xf32, #tpu.memory_space<vmem>>, vector<2x64xf32>
    tpu.vector_store %arg18[%c18, %c64_27], %37 {strides = array<i32>} : memref<128x192xf32, #tpu.memory_space<vmem>>, vector<2x64xf32>,
    %39 = vector.extract_strided_slice %16 {offsets = [0, 640], sizes = [2, 64], strides = [1, 1]} : vector<2x1024xf32> to vector<2x64xf32>
    %c20 = arith.constant 20 : index
    %c64_28 = arith.constant 64 : index
    %40 = vector.load %arg18[%c20, %c64_28] : memref<128x192xf32, #tpu.memory_space<vmem>>, vector<2x64xf32>
    tpu.vector_store %arg18[%c20, %c64_28], %39 {strides = array<i32>} : memref<128x192xf32, #tpu.memory_space<vmem>>, vector<2x64xf32>,
    %41 = vector.extract_strided_slice %16 {offsets = [0, 704], sizes = [2, 64], strides = [1, 1]} : vector<2x1024xf32> to vector<2x64xf32>
    %c22 = arith.constant 22 : index
    %c64_29 = arith.constant 64 : index
    %42 = vector.load %arg18[%c22, %c64_29] : memref<128x192xf32, #tpu.memory_space<vmem>>, vector<2x64xf32>
    tpu.vector_store %arg18[%c22, %c64_29], %41 {strides = array<i32>} : memref<128x192xf32, #tpu.memory_space<vmem>>, vector<2x64xf32>,
    %43 = vector.extract_strided_slice %16 {offsets = [0, 768], sizes = [2, 64], strides = [1, 1]} : vector<2x1024xf32> to vector<2x64xf32>
    %c24 = arith.constant 24 : index
    %c64_30 = arith.constant 64 : index
    %44 = vector.load %arg18[%c24, %c64_30] : memref<128x192xf32, #tpu.memory_space<vmem>>, vector<2x64xf32>
    tpu.vector_store %arg18[%c24, %c64_30], %43 {strides = array<i32>} : memref<128x192xf32, #tpu.memory_space<vmem>>, vector<2x64xf32>,
    %45 = vector.extract_strided_slice %16 {offsets = [0, 832], sizes = [2, 64], strides = [1, 1]} : vector<2x1024xf32> to vector<2x64xf32>
    %c26 = arith.constant 26 : index
    %c64_31 = arith.constant 64 : index
    %46 = vector.load %arg18[%c26, %c64_31] : memref<128x192xf32, #tpu.memory_space<vmem>>, vector<2x64xf32>
    tpu.vector_store %arg18[%c26, %c64_31], %45 {strides = array<i32>} : memref<128x192xf32, #tpu.memory_space<vmem>>, vector<2x64xf32>,
    %47 = vector.extract_strided_slice %16 {offsets = [0, 896], sizes = [2, 64], strides = [1, 1]} : vector<2x1024xf32> to vector<2x64xf32>
    %c28 = arith.constant 28 : index
    %c64_32 = arith.constant 64 : index
    %48 = vector.load %arg18[%c28, %c64_32] : memref<128x192xf32, #tpu.memory_space<vmem>>, vector<2x64xf32>
    tpu.vector_store %arg18[%c28, %c64_32], %47 {strides = array<i32>} : memref<128x192xf32, #tpu.memory_space<vmem>>, vector<2x64xf32>,
    %49 = vector.extract_strided_slice %16 {offsets = [0, 960], sizes = [2, 64], strides = [1, 1]} : vector<2x1024xf32> to vector<2x64xf32>
    %c30 = arith.constant 30 : index
    %c64_33 = arith.constant 64 : index
    %50 = vector.load %arg18[%c30, %c64_33] : memref<128x192xf32, #tpu.memory_space<vmem>>, vector<2x64xf32>
    tpu.vector_store %arg18[%c30, %c64_33], %49 {strides = array<i32>} : memref<128x192xf32, #tpu.memory_space<vmem>>, vector<2x64xf32>,
    %c0_34 = arith.constant 0 : index
    %c64_35 = arith.constant 64 : index
    %51 = vector.load %arg18[%c0_34, %c64_35] : memref<128x192xf32, #tpu.memory_space<vmem>>, vector<32x64xf32>
    %cst_36 = arith.constant dense<0.000000e+00> : vector<32xf32>
    %52 = vector.multi_reduction <add>, %51, %cst_36 [1] : vector<32x64xf32> to vector<32xf32>
    %53 = vector.shape_cast %52 : vector<32xf32> to vector<32x1xf32>
    %c0_37 = arith.constant 0 : index
    %c0_38 = arith.constant 0 : index
    %54 = vector.load %arg6[%c0_37, %c0_38] : memref<32x32xf32, #tpu.memory_space<vmem>>, vector<32x32xf32>
    %cst_39 = arith.constant dense<0.000000e+00> : vector<32x1xf32>
    %55 = tpu.matmul %54, %53, %cst_39 {dimension_numbers = #tpu.dot_dimension_numbers<[1], [0], [0], [1], [0, 0, 1, 1], [], []>, precision = #tpu.contract_precision<fp32>} : vector<32x32xf32>, vector<32x1xf32>, vector<32x1xf32> -> vector<32x1xf32>
    %cst_40 = arith.constant 7.812500e-03 : f32
    %56 = vector.broadcast %cst_40 : f32 to vector<32x1xf32>
    %57 = arith.mulf %55, %56 : vector<32x1xf32>
    %58 = vector.broadcast %57 : vector<32x1xf32> to vector<32x64xf32>
    %59 = arith.subf %51, %58 : vector<32x64xf32>
    %60 = arith.mulf %59, %59 : vector<32x64xf32>
    %cst_41 = arith.constant dense<0.000000e+00> : vector<32xf32>
    %61 = vector.multi_reduction <add>, %60, %cst_41 [1] : vector<32x64xf32> to vector<32xf32>
    %62 = vector.shape_cast %61 : vector<32xf32> to vector<32x1xf32>
    %c0_42 = arith.constant 0 : index
    %c0_43 = arith.constant 0 : index
    %63 = vector.load %arg6[%c0_42, %c0_43] : memref<32x32xf32, #tpu.memory_space<vmem>>, vector<32x32xf32>
    %cst_44 = arith.constant dense<0.000000e+00> : vector<32x1xf32>
    %64 = tpu.matmul %63, %62, %cst_44 {dimension_numbers = #tpu.dot_dimension_numbers<[1], [0], [0], [1], [0, 0, 1, 1], [], []>, precision = #tpu.contract_precision<fp32>} : vector<32x32xf32>, vector<32x1xf32>, vector<32x1xf32> -> vector<32x1xf32>
    %cst_45 = arith.constant 7.812500e-03 : f32
    %65 = vector.broadcast %cst_45 : f32 to vector<32x1xf32>
    %66 = arith.mulf %64, %65 : vector<32x1xf32>
    %cst_46 = arith.constant 9.99999974E-6 : f32
    %67 = vector.broadcast %cst_46 : f32 to vector<32x1xf32>
    %68 = arith.addf %66, %67 : vector<32x1xf32>
    %69 = math.rsqrt %68 : vector<32x1xf32>
    %c0_47 = arith.constant 0 : index
    %c0_48 = arith.constant 0 : index
    %70 = vector.load %arg7[%c0_47, %c0_48] : memref<32x1xf32, #tpu.memory_space<vmem>>, vector<32x1xf32>
    %71 = arith.mulf %69, %70 : vector<32x1xf32>
    %72 = vector.broadcast %71 : vector<32x1xf32> to vector<32x64xf32>
    %73 = arith.mulf %59, %72 : vector<32x64xf32>
    %c0_49 = arith.constant 0 : index
    %c0_50 = arith.constant 0 : index
    %74 = vector.load %arg8[%c0_49, %c0_50] : memref<32x1xf32, #tpu.memory_space<vmem>>, vector<32x1xf32>
    %75 = vector.broadcast %74 : vector<32x1xf32> to vector<32x64xf32>
    %76 = arith.addf %73, %75 : vector<32x64xf32>
    %cst_51 = arith.constant 0.000000e+00 : f32
    %77 = vector.broadcast %cst_51 : f32 to vector<32x64xf32>
    %78 = arith.maximumf %76, %77 : vector<32x64xf32>
    %c0_52 = arith.constant 0 : index
    %c64_53 = arith.constant 64 : index
    %79 = vector.load %arg18[%c0_52, %c64_53] : memref<128x192xf32, #tpu.memory_space<vmem>>, vector<32x64xf32>
    tpu.vector_store %arg18[%c0_52, %c64_53], %78 {strides = array<i32>} : memref<128x192xf32, #tpu.memory_space<vmem>>, vector<32x64xf32>,
    %c0_54 = arith.constant 0 : index
    %c49 = arith.constant 49 : index
    %80 = vector.load %arg18[%c0_54, %c49] : memref<128x192xf32, #tpu.memory_space<vmem>>, vector<32x64xf32>
    %c0_55 = arith.constant 0 : index
    %c0_56 = arith.constant 0 : index
    %81 = vector.load %arg13[%c0_55, %c0_56] : memref<8x64xf32, #tpu.memory_space<vmem>>, vector<1x64xf32>
    %82 = vector.broadcast %81 : vector<1x64xf32> to vector<32x64xf32>
    %83 = arith.mulf %80, %82 : vector<32x64xf32>
    %c0_57 = arith.constant 0 : index
    %c80 = arith.constant 80 : index
    %84 = vector.load %arg18[%c0_57, %c80] : memref<128x192xf32, #tpu.memory_space<vmem>>, vector<32x64xf32>
    %c1 = arith.constant 1 : index
    %c0_58 = arith.constant 0 : index
    %85 = vector.load %arg13[%c1, %c0_58] : memref<8x64xf32, #tpu.memory_space<vmem>>, vector<1x64xf32>
    %86 = vector.broadcast %85 : vector<1x64xf32> to vector<32x64xf32>
    %87 = arith.mulf %84, %86 : vector<32x64xf32>
    %88 = arith.addf %83, %87 : vector<32x64xf32>
    %c32 = arith.constant 32 : index
    %c64_59 = arith.constant 64 : index
    %89 = vector.load %arg18[%c32, %c64_59] : memref<128x192xf32, #tpu.memory_space<vmem>>, vector<32x64xf32>
    tpu.vector_store %arg18[%c32, %c64_59], %88 {strides = array<i32>} : memref<128x192xf32, #tpu.memory_space<vmem>>, vector<32x64xf32>,
    %c0_60 = arith.constant 0 : index
    %c36 = arith.constant 36 : index
    %90 = vector.load %arg18[%c0_60, %c36] : memref<128x192xf32, #tpu.memory_space<vmem>>, vector<32x64xf32>
    %c2_61 = arith.constant 2 : index
    %c0_62 = arith.constant 0 : index
    %91 = vector.load %arg13[%c2_61, %c0_62] : memref<8x64xf32, #tpu.memory_space<vmem>>, vector<1x64xf32>
    %92 = vector.broadcast %91 : vector<1x64xf32> to vector<32x64xf32>
    %93 = arith.mulf %90, %92 : vector<32x64xf32>
    %c0_63 = arith.constant 0 : index
    %c96 = arith.constant 96 : index
    %94 = vector.load %arg18[%c0_63, %c96] : memref<128x192xf32, #tpu.memory_space<vmem>>, vector<32x64xf32>
    %c3 = arith.constant 3 : index
    %c0_64 = arith.constant 0 : index
    %95 = vector.load %arg13[%c3, %c0_64] : memref<8x64xf32, #tpu.memory_space<vmem>>, vector<1x64xf32>
    %96 = vector.broadcast %95 : vector<1x64xf32> to vector<32x64xf32>
    %97 = arith.mulf %94, %96 : vector<32x64xf32>
    %98 = arith.addf %93, %97 : vector<32x64xf32>
    %c64_65 = arith.constant 64 : index
    %c64_66 = arith.constant 64 : index
    %99 = vector.load %arg18[%c64_65, %c64_66] : memref<128x192xf32, #tpu.memory_space<vmem>>, vector<32x64xf32>
    tpu.vector_store %arg18[%c64_65, %c64_66], %98 {strides = array<i32>} : memref<128x192xf32, #tpu.memory_space<vmem>>, vector<32x64xf32>,
    %c0_67 = arith.constant 0 : index
    %c21 = arith.constant 21 : index
    %100 = vector.load %arg18[%c0_67, %c21] : memref<128x192xf32, #tpu.memory_space<vmem>>, vector<32x64xf32>
    %c4_68 = arith.constant 4 : index
    %c0_69 = arith.constant 0 : index
    %101 = vector.load %arg13[%c4_68, %c0_69] : memref<8x64xf32, #tpu.memory_space<vmem>>, vector<1x64xf32>
    %102 = vector.broadcast %101 : vector<1x64xf32> to vector<32x64xf32>
    %103 = arith.mulf %100, %102 : vector<32x64xf32>
    %c0_70 = arith.constant 0 : index
    %c52 = arith.constant 52 : index
    %104 = vector.load %arg18[%c0_70, %c52] : memref<128x192xf32, #tpu.memory_space<vmem>>, vector<32x64xf32>
    %c5 = arith.constant 5 : index
    %c0_71 = arith.constant 0 : index
    %105 = vector.load %arg13[%c5, %c0_71] : memref<8x64xf32, #tpu.memory_space<vmem>>, vector<1x64xf32>
    %106 = vector.broadcast %105 : vector<1x64xf32> to vector<32x64xf32>
    %107 = arith.mulf %104, %106 : vector<32x64xf32>
    %108 = arith.addf %103, %107 : vector<32x64xf32>
    %c0_72 = arith.constant 0 : index
    %c81 = arith.constant 81 : index
    %109 = vector.load %arg18[%c0_72, %c81] : memref<128x192xf32, #tpu.memory_space<vmem>>, vector<32x64xf32>
    %c6_73 = arith.constant 6 : index
    %c0_74 = arith.constant 0 : index
    %110 = vector.load %arg13[%c6_73, %c0_74] : memref<8x64xf32, #tpu.memory_space<vmem>>, vector<1x64xf32>
    %111 = vector.broadcast %110 : vector<1x64xf32> to vector<32x64xf32>
    %112 = arith.mulf %109, %111 : vector<32x64xf32>
    %113 = arith.addf %108, %112 : vector<32x64xf32>
    %c0_75 = arith.constant 0 : index
    %c112 = arith.constant 112 : index
    %114 = vector.load %arg18[%c0_75, %c112] : memref<128x192xf32, #tpu.memory_space<vmem>>, vector<32x64xf32>
    %c7 = arith.constant 7 : index
    %c0_76 = arith.constant 0 : index
    %115 = vector.load %arg13[%c7, %c0_76] : memref<8x64xf32, #tpu.memory_space<vmem>>, vector<1x64xf32>
    %116 = vector.broadcast %115 : vector<1x64xf32> to vector<32x64xf32>
    %117 = arith.mulf %114, %116 : vector<32x64xf32>
    %118 = arith.addf %113, %117 : vector<32x64xf32>
    %c96_77 = arith.constant 96 : index
    %c64_78 = arith.constant 64 : index
    %119 = vector.load %arg18[%c96_77, %c64_78] : memref<128x192xf32, #tpu.memory_space<vmem>>, vector<32x64xf32>
    tpu.vector_store %arg18[%c96_77, %c64_78], %118 {strides = array<i32>} : memref<128x192xf32, #tpu.memory_space<vmem>>, vector<32x64xf32>,
    %c0_79 = arith.constant 0 : index
    %c0_80 = arith.constant 0 : index
    %120 = vector.load %arg9[%c0_79, %c0_80] : memref<64x128xf32, #tpu.memory_space<vmem>>, vector<64x128xf32>
    %c0_81 = arith.constant 0 : index
    %c64_82 = arith.constant 64 : index
    %121 = vector.load %arg18[%c0_81, %c64_82] : memref<128x192xf32, #tpu.memory_space<vmem>>, vector<128x64xf32>
    %cst_83 = arith.constant dense<0.000000e+00> : vector<64x64xf32>
    %122 = tpu.matmul %120, %121, %cst_83 {dimension_numbers = #tpu.dot_dimension_numbers<[1], [0], [0], [1], [0, 0, 1, 1], [], []>} : vector<64x128xf32>, vector<128x64xf32>, vector<64x64xf32> -> vector<64x64xf32>
    %cst_84 = arith.constant dense<0.000000e+00> : vector<64xf32>
    %123 = vector.multi_reduction <add>, %122, %cst_84 [1] : vector<64x64xf32> to vector<64xf32>
    %124 = vector.shape_cast %123 : vector<64xf32> to vector<64x1xf32>
    %c0_85 = arith.constant 0 : index
    %c0_86 = arith.constant 0 : index
    %125 = vector.load %arg10[%c0_85, %c0_86] : memref<64x64xf32, #tpu.memory_space<vmem>>, vector<64x64xf32>
    %cst_87 = arith.constant dense<0.000000e+00> : vector<64x1xf32>
    %126 = tpu.matmul %125, %124, %cst_87 {dimension_numbers = #tpu.dot_dimension_numbers<[1], [0], [0], [1], [0, 0, 1, 1], [], []>, precision = #tpu.contract_precision<fp32>} : vector<64x64xf32>, vector<64x1xf32>, vector<64x1xf32> -> vector<64x1xf32>
    %cst_88 = arith.constant 0.001953125 : f32
    %127 = vector.broadcast %cst_88 : f32 to vector<64x1xf32>
    %128 = arith.mulf %126, %127 : vector<64x1xf32>
    %129 = vector.broadcast %128 : vector<64x1xf32> to vector<64x64xf32>
    %130 = arith.subf %122, %129 : vector<64x64xf32>
    %131 = arith.mulf %130, %130 : vector<64x64xf32>
    %cst_89 = arith.constant dense<0.000000e+00> : vector<64xf32>
    %132 = vector.multi_reduction <add>, %131, %cst_89 [1] : vector<64x64xf32> to vector<64xf32>
    %133 = vector.shape_cast %132 : vector<64xf32> to vector<64x1xf32>
    %c0_90 = arith.constant 0 : index
    %c0_91 = arith.constant 0 : index
    %134 = vector.load %arg10[%c0_90, %c0_91] : memref<64x64xf32, #tpu.memory_space<vmem>>, vector<64x64xf32>
    %cst_92 = arith.constant dense<0.000000e+00> : vector<64x1xf32>
    %135 = tpu.matmul %134, %133, %cst_92 {dimension_numbers = #tpu.dot_dimension_numbers<[1], [0], [0], [1], [0, 0, 1, 1], [], []>, precision = #tpu.contract_precision<fp32>} : vector<64x64xf32>, vector<64x1xf32>, vector<64x1xf32> -> vector<64x1xf32>
    %cst_93 = arith.constant 0.001953125 : f32
    %136 = vector.broadcast %cst_93 : f32 to vector<64x1xf32>
    %137 = arith.mulf %135, %136 : vector<64x1xf32>
    %cst_94 = arith.constant 9.99999974E-6 : f32
    %138 = vector.broadcast %cst_94 : f32 to vector<64x1xf32>
    %139 = arith.addf %137, %138 : vector<64x1xf32>
    %140 = math.rsqrt %139 : vector<64x1xf32>
    %c0_95 = arith.constant 0 : index
    %c0_96 = arith.constant 0 : index
    %141 = vector.load %arg11[%c0_95, %c0_96] : memref<64x1xf32, #tpu.memory_space<vmem>>, vector<64x1xf32>
    %142 = arith.mulf %140, %141 : vector<64x1xf32>
    %143 = vector.broadcast %142 : vector<64x1xf32> to vector<64x64xf32>
    %144 = arith.mulf %130, %143 : vector<64x64xf32>
    %c0_97 = arith.constant 0 : index
    %c0_98 = arith.constant 0 : index
    %145 = vector.load %arg12[%c0_97, %c0_98] : memref<64x1xf32, #tpu.memory_space<vmem>>, vector<64x1xf32>
    %146 = vector.broadcast %145 : vector<64x1xf32> to vector<64x64xf32>
    %147 = arith.addf %144, %146 : vector<64x64xf32>
    %cst_99 = arith.constant 0.000000e+00 : f32
    %148 = vector.broadcast %cst_99 : f32 to vector<64x64xf32>
    %149 = arith.maximumf %147, %148 : vector<64x64xf32>
    %cst_100 = arith.constant 0.000000e+00 : f32
    %150 = vector.broadcast %cst_100 : f32 to vector<16x768xf32>
    %c0_101 = arith.constant 0 : index
    %c0_102 = arith.constant 0 : index
    %151 = vector.load %arg19[%c0_101, %c0_102] : memref<64x768xf32, #tpu.memory_space<vmem>>, vector<16x768xf32>
    tpu.vector_store %arg19[%c0_101, %c0_102], %150 {strides = array<i32>} : memref<64x768xf32, #tpu.memory_space<vmem>>, vector<16x768xf32>,
    %152 = vector.extract_strided_slice %149 {offsets = [0, 0], sizes = [16, 64], strides = [1, 1]} : vector<64x64xf32> to vector<16x64xf32>
    %c0_103 = arith.constant 0 : index
    %c256 = arith.constant 256 : index
    %153 = vector.load %arg19[%c0_103, %c256] : memref<64x768xf32, #tpu.memory_space<vmem>>, vector<16x64xf32>
    tpu.vector_store %arg19[%c0_103, %c256], %152 {strides = array<i32>} : memref<64x768xf32, #tpu.memory_space<vmem>>, vector<16x64xf32>,
    %154 = vector.extract_strided_slice %149 {offsets = [16, 0], sizes = [16, 64], strides = [1, 1]} : vector<64x64xf32> to vector<16x64xf32>
    %c0_104 = arith.constant 0 : index
    %c320 = arith.constant 320 : index
    %155 = vector.load %arg19[%c0_104, %c320] : memref<64x768xf32, #tpu.memory_space<vmem>>, vector<16x64xf32>
    tpu.vector_store %arg19[%c0_104, %c320], %154 {strides = array<i32>} : memref<64x768xf32, #tpu.memory_space<vmem>>, vector<16x64xf32>,
    %156 = vector.extract_strided_slice %149 {offsets = [32, 0], sizes = [16, 64], strides = [1, 1]} : vector<64x64xf32> to vector<16x64xf32>
    %c0_105 = arith.constant 0 : index
    %c384 = arith.constant 384 : index
    %157 = vector.load %arg19[%c0_105, %c384] : memref<64x768xf32, #tpu.memory_space<vmem>>, vector<16x64xf32>
    tpu.vector_store %arg19[%c0_105, %c384], %156 {strides = array<i32>} : memref<64x768xf32, #tpu.memory_space<vmem>>, vector<16x64xf32>,
    %158 = vector.extract_strided_slice %149 {offsets = [48, 0], sizes = [16, 64], strides = [1, 1]} : vector<64x64xf32> to vector<16x64xf32>
    %c0_106 = arith.constant 0 : index
    %c448 = arith.constant 448 : index
    %159 = vector.load %arg19[%c0_106, %c448] : memref<64x768xf32, #tpu.memory_space<vmem>>, vector<16x64xf32>
    tpu.vector_store %arg19[%c0_106, %c448], %158 {strides = array<i32>} : memref<64x768xf32, #tpu.memory_space<vmem>>, vector<16x64xf32>,
    %c0_107 = arith.constant 0 : index
    %c177 = arith.constant 177 : index
    %160 = vector.load %arg19[%c0_107, %c177] : memref<64x768xf32, #tpu.memory_space<vmem>>, vector<16x256xf32>
    %c0_108 = arith.constant 0 : index
    %c0_109 = arith.constant 0 : index
    %161 = vector.load %arg16[%c0_108, %c0_109] : memref<15x256xf32, #tpu.memory_space<vmem>>, vector<1x256xf32>
    %162 = vector.broadcast %161 : vector<1x256xf32> to vector<16x256xf32>
    %163 = arith.mulf %160, %162 : vector<16x256xf32>
    %c0_110 = arith.constant 0 : index
    %c208 = arith.constant 208 : index
    %164 = vector.load %arg19[%c0_110, %c208] : memref<64x768xf32, #tpu.memory_space<vmem>>, vector<16x256xf32>
    %c1_111 = arith.constant 1 : index
    %c0_112 = arith.constant 0 : index
    %165 = vector.load %arg16[%c1_111, %c0_112] : memref<15x256xf32, #tpu.memory_space<vmem>>, vector<1x256xf32>
    %166 = vector.broadcast %165 : vector<1x256xf32> to vector<16x256xf32>
    %167 = arith.mulf %164, %166 : vector<16x256xf32>
    %168 = arith.addf %163, %167 : vector<16x256xf32>
    %c0_113 = arith.constant 0 : index
    %c320_114 = arith.constant 320 : index
    %169 = vector.load %arg19[%c0_113, %c320_114] : memref<64x768xf32, #tpu.memory_space<vmem>>, vector<16x256xf32>
    %c2_115 = arith.constant 2 : index
    %c0_116 = arith.constant 0 : index
    %170 = vector.load %arg16[%c2_115, %c0_116] : memref<15x256xf32, #tpu.memory_space<vmem>>, vector<1x256xf32>
    %171 = vector.broadcast %170 : vector<1x256xf32> to vector<16x256xf32>
    %172 = arith.mulf %169, %171 : vector<16x256xf32>
    %173 = arith.addf %168, %172 : vector<16x256xf32>
    %c16_117 = arith.constant 16 : index
    %c256_118 = arith.constant 256 : index
    %174 = vector.load %arg19[%c16_117, %c256_118] : memref<64x768xf32, #tpu.memory_space<vmem>>, vector<16x256xf32>
    tpu.vector_store %arg19[%c16_117, %c256_118], %173 {strides = array<i32>} : memref<64x768xf32, #tpu.memory_space<vmem>>, vector<16x256xf32>,
    %c0_119 = arith.constant 0 : index
    %c100 = arith.constant 100 : index
    %175 = vector.load %arg19[%c0_119, %c100] : memref<64x768xf32, #tpu.memory_space<vmem>>, vector<16x256xf32>
    %c3_120 = arith.constant 3 : index
    %c0_121 = arith.constant 0 : index
    %176 = vector.load %arg16[%c3_120, %c0_121] : memref<15x256xf32, #tpu.memory_space<vmem>>, vector<1x256xf32>
    %177 = vector.broadcast %176 : vector<1x256xf32> to vector<16x256xf32>
    %178 = arith.mulf %175, %177 : vector<16x256xf32>
    %c0_122 = arith.constant 0 : index
    %c160 = arith.constant 160 : index
    %179 = vector.load %arg19[%c0_122, %c160] : memref<64x768xf32, #tpu.memory_space<vmem>>, vector<16x256xf32>
    %c4_123 = arith.constant 4 : index
    %c0_124 = arith.constant 0 : index
    %180 = vector.load %arg16[%c4_123, %c0_124] : memref<15x256xf32, #tpu.memory_space<vmem>>, vector<1x256xf32>
    %181 = vector.broadcast %180 : vector<1x256xf32> to vector<16x256xf32>
    %182 = arith.mulf %179, %181 : vector<16x256xf32>
    %183 = arith.addf %178, %182 : vector<16x256xf32>
    %c0_125 = arith.constant 0 : index
    %c384_126 = arith.constant 384 : index
    %184 = vector.load %arg19[%c0_125, %c384_126] : memref<64x768xf32, #tpu.memory_space<vmem>>, vector<16x256xf32>
    %c5_127 = arith.constant 5 : index
    %c0_128 = arith.constant 0 : index
    %185 = vector.load %arg16[%c5_127, %c0_128] : memref<15x256xf32, #tpu.memory_space<vmem>>, vector<1x256xf32>
    %186 = vector.broadcast %185 : vector<1x256xf32> to vector<16x256xf32>
    %187 = arith.mulf %184, %186 : vector<16x256xf32>
    %188 = arith.addf %183, %187 : vector<16x256xf32>
    %c32_129 = arith.constant 32 : index
    %c256_130 = arith.constant 256 : index
    %189 = vector.load %arg19[%c32_129, %c256_130] : memref<64x768xf32, #tpu.memory_space<vmem>>, vector<16x256xf32>
    tpu.vector_store %arg19[%c32_129, %c256_130], %188 {strides = array<i32>} : memref<64x768xf32, #tpu.memory_space<vmem>>, vector<16x256xf32>,
    %c0_131 = arith.constant 0 : index
    %c21_132 = arith.constant 21 : index
    %190 = vector.load %arg19[%c0_131, %c21_132] : memref<64x768xf32, #tpu.memory_space<vmem>>, vector<16x256xf32>
    %c6_133 = arith.constant 6 : index
    %c0_134 = arith.constant 0 : index
    %191 = vector.load %arg16[%c6_133, %c0_134] : memref<15x256xf32, #tpu.memory_space<vmem>>, vector<1x256xf32>
    %192 = vector.broadcast %191 : vector<1x256xf32> to vector<16x256xf32>
    %193 = arith.mulf %190, %192 : vector<16x256xf32>
    %c0_135 = arith.constant 0 : index
    %c52_136 = arith.constant 52 : index
    %194 = vector.load %arg19[%c0_135, %c52_136] : memref<64x768xf32, #tpu.memory_space<vmem>>, vector<16x256xf32>
    %c7_137 = arith.constant 7 : index
    %c0_138 = arith.constant 0 : index
    %195 = vector.load %arg16[%c7_137, %c0_138] : memref<15x256xf32, #tpu.memory_space<vmem>>, vector<1x256xf32>
    %196 = vector.broadcast %195 : vector<1x256xf32> to vector<16x256xf32>
    %197 = arith.mulf %194, %196 : vector<16x256xf32>
    %198 = arith.addf %193, %197 : vector<16x256xf32>
    %c0_139 = arith.constant 0 : index
    %c81_140 = arith.constant 81 : index
    %199 = vector.load %arg19[%c0_139, %c81_140] : memref<64x768xf32, #tpu.memory_space<vmem>>, vector<16x256xf32>
    %c8_141 = arith.constant 8 : index
    %c0_142 = arith.constant 0 : index
    %200 = vector.load %arg16[%c8_141, %c0_142] : memref<15x256xf32, #tpu.memory_space<vmem>>, vector<1x256xf32>
    %201 = vector.broadcast %200 : vector<1x256xf32> to vector<16x256xf32>
    %202 = arith.mulf %199, %201 : vector<16x256xf32>
    %203 = arith.addf %198, %202 : vector<16x256xf32>
    %c0_143 = arith.constant 0 : index
    %c112_144 = arith.constant 112 : index
    %204 = vector.load %arg19[%c0_143, %c112_144] : memref<64x768xf32, #tpu.memory_space<vmem>>, vector<16x256xf32>
    %c9 = arith.constant 9 : index
    %c0_145 = arith.constant 0 : index
    %205 = vector.load %arg16[%c9, %c0_145] : memref<15x256xf32, #tpu.memory_space<vmem>>, vector<1x256xf32>
    %206 = vector.broadcast %205 : vector<1x256xf32> to vector<16x256xf32>
    %207 = arith.mulf %204, %206 : vector<16x256xf32>
    %208 = arith.addf %203, %207 : vector<16x256xf32>
    %c0_146 = arith.constant 0 : index
    %c164 = arith.constant 164 : index
    %209 = vector.load %arg19[%c0_146, %c164] : memref<64x768xf32, #tpu.memory_space<vmem>>, vector<16x256xf32>
    %c10_147 = arith.constant 10 : index
    %c0_148 = arith.constant 0 : index
    %210 = vector.load %arg16[%c10_147, %c0_148] : memref<15x256xf32, #tpu.memory_space<vmem>>, vector<1x256xf32>
    %211 = vector.broadcast %210 : vector<1x256xf32> to vector<16x256xf32>
    %212 = arith.mulf %209, %211 : vector<16x256xf32>
    %213 = arith.addf %208, %212 : vector<16x256xf32>
    %c0_149 = arith.constant 0 : index
    %c224 = arith.constant 224 : index
    %214 = vector.load %arg19[%c0_149, %c224] : memref<64x768xf32, #tpu.memory_space<vmem>>, vector<16x256xf32>
    %c11 = arith.constant 11 : index
    %c0_150 = arith.constant 0 : index
    %215 = vector.load %arg16[%c11, %c0_150] : memref<15x256xf32, #tpu.memory_space<vmem>>, vector<1x256xf32>
    %216 = vector.broadcast %215 : vector<1x256xf32> to vector<16x256xf32>
    %217 = arith.mulf %214, %216 : vector<16x256xf32>
    %218 = arith.addf %213, %217 : vector<16x256xf32>
    %c0_151 = arith.constant 0 : index
    %c305 = arith.constant 305 : index
    %219 = vector.load %arg19[%c0_151, %c305] : memref<64x768xf32, #tpu.memory_space<vmem>>, vector<16x256xf32>
    %c12_152 = arith.constant 12 : index
    %c0_153 = arith.constant 0 : index
    %220 = vector.load %arg16[%c12_152, %c0_153] : memref<15x256xf32, #tpu.memory_space<vmem>>, vector<1x256xf32>
    %221 = vector.broadcast %220 : vector<1x256xf32> to vector<16x256xf32>
    %222 = arith.mulf %219, %221 : vector<16x256xf32>
    %223 = arith.addf %218, %222 : vector<16x256xf32>
    %c0_154 = arith.constant 0 : index
    %c336 = arith.constant 336 : index
    %224 = vector.load %arg19[%c0_154, %c336] : memref<64x768xf32, #tpu.memory_space<vmem>>, vector<16x256xf32>
    %c13 = arith.constant 13 : index
    %c0_155 = arith.constant 0 : index
    %225 = vector.load %arg16[%c13, %c0_155] : memref<15x256xf32, #tpu.memory_space<vmem>>, vector<1x256xf32>
    %226 = vector.broadcast %225 : vector<1x256xf32> to vector<16x256xf32>
    %227 = arith.mulf %224, %226 : vector<16x256xf32>
    %228 = arith.addf %223, %227 : vector<16x256xf32>
    %c0_156 = arith.constant 0 : index
    %c448_157 = arith.constant 448 : index
    %229 = vector.load %arg19[%c0_156, %c448_157] : memref<64x768xf32, #tpu.memory_space<vmem>>, vector<16x256xf32>
    %c14_158 = arith.constant 14 : index
    %c0_159 = arith.constant 0 : index
    %230 = vector.load %arg16[%c14_158, %c0_159] : memref<15x256xf32, #tpu.memory_space<vmem>>, vector<1x256xf32>
    %231 = vector.broadcast %230 : vector<1x256xf32> to vector<16x256xf32>
    %232 = arith.mulf %229, %231 : vector<16x256xf32>
    %233 = arith.addf %228, %232 : vector<16x256xf32>
    %c48 = arith.constant 48 : index
    %c256_160 = arith.constant 256 : index
    %234 = vector.load %arg19[%c48, %c256_160] : memref<64x768xf32, #tpu.memory_space<vmem>>, vector<16x256xf32>
    tpu.vector_store %arg19[%c48, %c256_160], %233 {strides = array<i32>} : memref<64x768xf32, #tpu.memory_space<vmem>>, vector<16x256xf32>,
    %c0_161 = arith.constant 0 : index
    %c0_162 = arith.constant 0 : index
    %235 = vector.load %arg14[%c0_161, %c0_162] : memref<24x64xf32, #tpu.memory_space<vmem>>, vector<24x64xf32>
    %c0_163 = arith.constant 0 : index
    %c256_164 = arith.constant 256 : index
    %236 = vector.load %arg19[%c0_163, %c256_164] : memref<64x768xf32, #tpu.memory_space<vmem>>, vector<64x256xf32>
    %cst_165 = arith.constant dense<0.000000e+00> : vector<24x256xf32>
    %237 = tpu.matmul %235, %236, %cst_165 {dimension_numbers = #tpu.dot_dimension_numbers<[1], [0], [0], [1], [0, 0, 1, 1], [], []>} : vector<24x64xf32>, vector<64x256xf32>, vector<24x256xf32> -> vector<24x256xf32>
    %c0_166 = arith.constant 0 : index
    %c0_167 = arith.constant 0 : index
    %238 = vector.load %arg15[%c0_166, %c0_167] : memref<24x1xf32, #tpu.memory_space<vmem>>, vector<24x1xf32>
    %239 = vector.broadcast %238 : vector<24x1xf32> to vector<24x256xf32>
    %240 = arith.addf %237, %239 : vector<24x256xf32>
    %cst_168 = arith.constant 0.000000e+00 : f32
    %241 = vector.broadcast %cst_168 : f32 to vector<24x256xf32>
    %242 = arith.subf %241, %240 : vector<24x256xf32>
    %243 = math.exp %242 : vector<24x256xf32>
    %cst_169 = arith.constant 1.000000e+00 : f32
    %244 = vector.broadcast %cst_169 : f32 to vector<24x256xf32>
    %245 = arith.addf %244, %243 : vector<24x256xf32>
    %246 = tpu.reciprocal %245 {approx = true} : vector<24x256xf32> -> vector<24x256xf32>
    %c0_170 = arith.constant 0 : index
    %c0_171 = arith.constant 0 : index
    %247 = vector.load %arg17[%c0_170, %c0_171] : memref<24x256xf32, #tpu.memory_space<vmem>>, vector<24x256xf32>
    tpu.vector_store %arg17[%c0_170, %c0_171], %246 {strides = array<i32>} : memref<24x256xf32, #tpu.memory_space<vmem>>, vector<24x256xf32>,
    return
  }
}

</mosaic_0001>

<bundles_post_ra>
// kernel: decoder_forward.1
= control target key start
LH: loop header
LB: loop body
LE: loop exit
PB: predicated region body
PF: predicated region fallthrough
CT: control target
= control target key end

     0   :  { %s11076_s0 = inlined_call_operand.hbm [shape: f32[2,8], index: 0, kind: input, shape index: {}]   ;;  %s11077_s1 = inlined_call_operand.hbm [shape: f32[8,128], index: 1, kind: input, shape index: {}]   ;;  %s11078_s2 = inlined_call_operand.hbm [shape: f32[1,128], index: 2, kind: input, shape index: {}]   ;;  %s11079_s3 = inlined_call_operand.hbm [shape: f32[128,512], index: 3, kind: input, shape index: {}]   ;;  %s11080_s4 = inlined_call_operand.hbm [shape: f32[1,512], index: 4, kind: input, shape index: {}]   ;;  %s11081_s5 = inlined_call_operand.hbm [shape: f32[512,1024], index: 5, kind: input, shape index: {}]   ;;  %s11082_s6 = inlined_call_operand.hbm [shape: f32[32,32], index: 6, kind: input, shape index: {}]   ;;  %s11083_s7 = inlined_call_operand.vmem [shape: f32[32,1], index: 7, kind: input, shape index: {}]   ;;  %s11084_s8 = inlined_call_operand.vmem [shape: f32[32,1], index: 8, kind: input, shape index: {}]   ;;  %s11085_s9 = inlined_call_operand.hbm [shape: f32[64,128], index: 9, kind: input, shape index: {}]   ;;  %s11086_s10 = inlined_call_operand.hbm [shape: f32[64,64], index: 10, kind: input, shape index: {}]   ;;  %s11087_s11 = inlined_call_operand.vmem [shape: f32[64,1], index: 11, kind: input, shape index: {}]   ;;  %s11088_s12 = inlined_call_operand.vmem [shape: f32[64,1], index: 12, kind: input, shape index: {}]   ;;  %s11089_s13 = inlined_call_operand.hbm [shape: f32[8,64], index: 13, kind: input, shape index: {}]   ;;  %s11090_s14 = inlined_call_operand.hbm [shape: f32[24,64], index: 14, kind: input, shape index: {}]   ;;  %s11091_s15 = inlined_call_operand.vmem [shape: f32[24,1], index: 15, kind: input, shape index: {}]   ;;  %s11092_s16 = inlined_call_operand.hbm [shape: f32[15,256], index: 16, kind: input, shape index: {}]   ;;  %s11093_s17 = inlined_call_operand.vmem [shape: f32[24,256], index: 17, kind: output, shape index: {}]  }
   0x1   :  { %11116 = sst [smem:[#allocation39_spill]] %s11076_s0 }
   0x2   :  { %11117 = sst [smem:[#allocation40_spill]] %s11077_s1 }
   0x3   :  { %22 = vsyncpa [#allocation5], 0 }
   0x4   :  { %23 = vsyncpa [#allocation7], 0 }
   0x5   :  { %24 = vsyncpa [#allocation10], 0 }
   0x6   :  { %25 = vsyncpa [#allocation13], 0 }
   0x7   :  { %26 = vsyncpa [#allocation16], 0 }
   0x8   :  { %27 = vsyncpa [#allocation19], 0 }
   0x9   :  { %28 = vsyncpa [#allocation22], 0  ;;  %s9089_s24 = smov [#allocation6]   ;;  %s9090_s26 = smov [#allocation9]  }
   0xa   :  { %s45_s25 = sshll.u32 %s9089_s24, 4  ;;  %s64_s27 = sshll.u32 %s9090_s26, 4  ;;  %s46_s25 = int_to_ptr.vmem [resolvable:$true] %s45_s25  ;;  %s9223_s27 = int_to_ptr.vmem [resolvable:$true] %s64_s27 }
   0xb   :  { %s11118_s0 = sld [smem:[#allocation40_spill]] }
  0x11   :  { %s8811_s30 = scalar_lea.hbm %s11118_s0, 128 }
  0x12   :  { %p8812_p0 = scmp.ne.s32.totalorder %s11118_s0, %s8811_s30  ;;  %p8815_p1 = scmp.lt.u32.totalorder %s8811_s30, %s11118_s0 }
  0x14   :  { %p8817_p2 = pnand %p8815_p1, %p8812_p0 }
  0x16   :  { %8820 = shalt.err (!%p8817_p2)
}
  0x17   :  { %s8821_s21 = scalar_lea.vmem %s46_s25, 128  ;;  %p8826_p4 = scmp.lt.s32.totalorder %s46_s25, %s46_s25 }
  0x18   :  { %p8822_p3 = scmp.ne.s32.totalorder %s46_s25, %s8821_s21  ;;  %p8827_p5 = scmp.lt.s32.totalorder %s8821_s21, %s8821_s21 }
  0x1a   :  { %p8828_p6 = por %p8827_p5, %p8826_p4 }
  0x1c   :  { %p8829_p7 = pnand %p8828_p6, %p8822_p3 }
  0x1e   :  { %8832 = shalt.err (!%p8829_p7)
}
  0x1f   :  { %48 = dma.hbm_to_vmem [thread:$0]  %s11118_s0, 128, %s46_s25, [#allocation7]  }
  0x20   :  { %s8833_s28 = scalar_lea.hbm %s11079_s3, 8192 }
  0x21   :  { %p8834_p8 = scmp.ne.s32.totalorder %s11079_s3, %s8833_s28  ;;  %p8837_p9 = scmp.lt.u32.totalorder %s8833_s28, %s11079_s3 }
  0x23   :  { %p8839_p10 = pnand %p8837_p9, %p8834_p8 }
  0x25   :  { %8842 = shalt.err (!%p8839_p10)
}
  0x26   :  { %s8843_s1 = scalar_lea.vmem %s9223_s27, 8192  ;;  %p8848_p12 = scmp.lt.s32.totalorder %s9223_s27, %s9223_s27 }
  0x27   :  { %p8844_p11 = scmp.ne.s32.totalorder %s9223_s27, %s8843_s1  ;;  %p8849_p13 = scmp.lt.s32.totalorder %s8843_s1, %s8843_s1 }
  0x29   :  { %p8850_p0 = por %p8849_p13, %p8848_p12 }
  0x2b   :  { %p8851_p1 = pnand %p8850_p0, %p8844_p11 }
  0x2d   :  { %8854 = shalt.err (!%p8851_p1)
}
  0x2e   :  { %s9091_s25 = smov 512   ;;  %s11096_s0 = smov 32  }
  0x2f   :  { %70 = dma.hbm_to_vmem [thread:$0]  %s11079_s3, 8192, %s9223_s27, [#allocation10], %s9091_s25, %s9091_s25, %s11096_s0  }
  0x30   :  { %s9093_s22 = smov [#allocation12]   ;;  %s8855_s28 = scalar_lea.hbm %s11081_s5, 65536 }
  0x31   :  { %s86_s23 = sshll.u32 %s9093_s22, 4  ;;  %p8856_p2 = scmp.ne.s32.totalorder %s11081_s5, %s8855_s28  ;;  %s87_s23 = int_to_ptr.vmem [resolvable:$true] %s86_s23 }
  0x32   :  { %p8859_p3 = scmp.lt.u32.totalorder %s8855_s28, %s11081_s5 }
  0x34   :  { %p8861_p4 = pnand %p8859_p3, %p8856_p2 }
  0x36   :  { %8864 = shalt.err (!%p8861_p4)
}
  0x37   :  { %s8865_s1 = scalar_lea.vmem %s87_s23, 65536  ;;  %p8870_p6 = scmp.lt.s32.totalorder %s87_s23, %s87_s23 }
  0x38   :  { %p8866_p5 = scmp.ne.s32.totalorder %s87_s23, %s8865_s1  ;;  %p8871_p7 = scmp.lt.s32.totalorder %s8865_s1, %s8865_s1 }
  0x3a   :  { %p8872_p8 = por %p8871_p7, %p8870_p6 }
  0x3c   :  { %p8873_p9 = pnand %p8872_p8, %p8866_p5 }
  0x3e   :  { %8876 = shalt.err (!%p8873_p9)
}
  0x3f   :  { %s9094_s3 = smov 1024   ;;  %s9095_s27 = smov 64  }
  0x40   :  { %92 = dma.hbm_to_vmem [thread:$0]  %s11081_s5, 65536, %s87_s23, [#allocation13], %s9094_s3, %s9094_s3, %s9095_s27  }
  0x41   :  { %s9096_s21 = smov [#allocation15]   ;;  %s9097_s24 = smov [#allocation18]  }
  0x42   :  { %s114_s22 = sshll.u32 %s9096_s21, 4  ;;  %s143_s26 = sshll.u32 %s9097_s24, 4  ;;  %s115_s22 = int_to_ptr.vmem [resolvable:$true] %s114_s22  ;;  %s144_s26 = int_to_ptr.vmem [resolvable:$true] %s143_s26 }
  0x43   :  { %s8877_s18 = scalar_lea.hbm %s11085_s9, 1024 }
  0x44   :  { %p8878_p10 = scmp.ne.s32.totalorder %s11085_s9, %s8877_s18  ;;  %p8881_p11 = scmp.lt.u32.totalorder %s8877_s18, %s11085_s9 }
  0x46   :  { %p8883_p12 = pnand %p8881_p11, %p8878_p10 }
  0x48   :  { %8886 = shalt.err (!%p8883_p12)
}
  0x49   :  { %s8887_s5 = scalar_lea.vmem %s115_s22, 1024  ;;  %p8892_p0 = scmp.lt.s32.totalorder %s115_s22, %s115_s22 }
  0x4a   :  { %p8888_p13 = scmp.ne.s32.totalorder %s115_s22, %s8887_s5  ;;  %p8893_p1 = scmp.lt.s32.totalorder %s8887_s5, %s8887_s5 }
  0x4c   :  { %p8894_p2 = por %p8893_p1, %p8892_p0 }
  0x4e   :  { %p8895_p3 = pnand %p8894_p2, %p8888_p13 }
  0x50   :  { %8898 = shalt.err (!%p8895_p3)
}
  0x51   :  { %s9098_s23 = smov 128   ;;  %s9099_s3 = smov 8  }
  0x52   :  { %120 = dma.hbm_to_vmem [thread:$0]  %s11085_s9, 1024, %s115_s22, [#allocation16], %s9098_s23, %s9098_s23, %s9099_s3  }
  0x53   :  { %s8899_s24 = scalar_lea.hbm %s11089_s13, 128 }
  0x54   :  { %p8900_p4 = scmp.ne.s32.totalorder %s11089_s13, %s8899_s24  ;;  %p8903_p5 = scmp.lt.u32.totalorder %s8899_s24, %s11089_s13 }
  0x56   :  { %p8905_p6 = pnand %p8903_p5, %p8900_p4 }
  0x58   :  { %8908 = shalt.err (!%p8905_p6)
}
  0x59   :  { %s8909_s19 = scalar_lea.vmem %s144_s26, 128  ;;  %p8914_p8 = scmp.lt.s32.totalorder %s144_s26, %s144_s26 }
  0x5a   :  { %p8910_p7 = scmp.ne.s32.totalorder %s144_s26, %s8909_s19  ;;  %p8915_p9 = scmp.lt.s32.totalorder %s8909_s19, %s8909_s19 }
  0x5c   :  { %p8916_p10 = por %p8915_p9, %p8914_p8 }
  0x5e   :  { %p8917_p11 = pnand %p8916_p10, %p8910_p7 }
  0x60   :  { %8920 = shalt.err (!%p8917_p11)
}
  0x61   :  { %146 = dma.hbm_to_vmem [thread:$0]  %s11089_s13, 128, %s144_s26, [#allocation19]  }
  0x62   :  { %s9100_s1 = smov [#allocation4]   ;;  %s9101_s25 = smov [#allocation8]  }
  0x63   :  { %s35_s5 = sshll.u32 %s9100_s1, 4  ;;  %s55_s20 = sshll.u32 %s9101_s25, 4  ;;  %s36_s5 = int_to_ptr.vmem [resolvable:$true] %s35_s5  ;;  %s56_s20 = int_to_ptr.vmem [resolvable:$true] %s55_s20 }
  0x64   :  { %s11119_s24 = sld [smem:[#allocation39_spill]] }
  0x6a   :  { %s8921_s28 = scalar_lea.hbm %s11119_s24, 32 }
  0x6b   :  { %p8922_p12 = scmp.ne.s32.totalorder %s11119_s24, %s8921_s28  ;;  %p8925_p13 = scmp.lt.u32.totalorder %s8921_s28, %s11119_s24 }
  0x6d   :  { %p8927_p0 = pnand %p8925_p13, %p8922_p12 }
  0x6f   :  { %8930 = shalt.err (!%p8927_p0)
}
  0x70   :  { %s8931_s13 = scalar_lea.vmem %s36_s5, 32  ;;  %p8936_p2 = scmp.lt.s32.totalorder %s36_s5, %s36_s5 }
  0x71   :  { %p8932_p1 = scmp.ne.s32.totalorder %s36_s5, %s8931_s13  ;;  %p8937_p3 = scmp.lt.s32.totalorder %s8931_s13, %s8931_s13 }
  0x73   :  { %p8938_p4 = por %p8937_p3, %p8936_p2 }
  0x75   :  { %p8939_p5 = pnand %p8938_p4, %p8932_p1 }
  0x77   :  { %8942 = shalt.err (!%p8939_p5)
}
  0x78   :  { %38 = dma.hbm_to_vmem [thread:$0]  %s11119_s24, 32, %s36_s5, [#allocation5]  }
  0x79   :  { %s8943_s25 = scalar_lea.hbm %s11078_s2, 16 }
  0x7a   :  { %p8944_p6 = scmp.ne.s32.totalorder %s11078_s2, %s8943_s25  ;;  %p8947_p7 = scmp.lt.u32.totalorder %s8943_s25, %s11078_s2 }
  0x7c   :  { %p8949_p8 = pnand %p8947_p7, %p8944_p6 }
  0x7e   :  { %8952 = shalt.err (!%p8949_p8)
}
  0x7f   :  { %s8953_s18 = scalar_lea.vmem %s56_s20, 16  ;;  %s8957_s30 = scalar_lea.vmem %s56_s20, 32 }
  0x80   :  { %p8954_p9 = scmp.ne.s32.totalorder %s56_s20, %s8953_s18  ;;  %p8958_p10 = scmp.lt.s32.totalorder %s56_s20, %s56_s20 }
  0x81   :  { %p8959_p11 = scmp.lt.s32.totalorder %s8957_s30, %s8953_s18 }
  0x83   :  { %p8960_p12 = por %p8959_p11, %p8958_p10 }
  0x85   :  { %p8961_p13 = pnand %p8960_p12, %p8954_p9 }
  0x87   :  { %8964 = shalt.err (!%p8961_p13)
}
  0x88   :  { %58 = dma.hbm_to_vmem [thread:$0]  %s11078_s2, 16, %s56_s20, [#allocation7]  }
  0x89   :  { %s9102_s19 = smov [#allocation11]   ;;  %s9103_s26 = smov [#allocation14]  }
  0x8a   :  { %s77_s13 = sshll.u32 %s9102_s19, 4  ;;  %s98_s9 = sshll.u32 %s9103_s26, 4  ;;  %s78_s13 = int_to_ptr.vmem [resolvable:$true] %s77_s13  ;;  %s99_s9 = int_to_ptr.vmem [resolvable:$true] %s98_s9 }
  0x8b   :  { %s8965_s25 = scalar_lea.hbm %s11080_s4, 64 }
  0x8c   :  { %p8966_p0 = scmp.ne.s32.totalorder %s11080_s4, %s8965_s25  ;;  %p8969_p1 = scmp.lt.u32.totalorder %s8965_s25, %s11080_s4 }
  0x8e   :  { %p8971_p2 = pnand %p8969_p1, %p8966_p0 }
  0x90   :  { %8974 = shalt.err (!%p8971_p2)
}
  0x91   :  { %s8975_s2 = scalar_lea.vmem %s78_s13, 64  ;;  %p8980_p4 = scmp.lt.s32.totalorder %s78_s13, %s78_s13 }
  0x92   :  { %p8976_p3 = scmp.ne.s32.totalorder %s78_s13, %s8975_s2  ;;  %p8981_p5 = scmp.lt.s32.totalorder %s8975_s2, %s8975_s2 }
  0x94   :  { %p8982_p6 = por %p8981_p5, %p8980_p4 }
  0x96   :  { %p8983_p7 = pnand %p8982_p6, %p8976_p3 }
  0x98   :  { %8986 = shalt.err (!%p8983_p7)
}
  0x99   :  { %80 = dma.hbm_to_vmem [thread:$0]  %s11080_s4, 64, %s78_s13, [#allocation10]  }
  0x9a   :  { %s8987_s24 = scalar_lea.hbm %s11082_s6, 512 }
  0x9b   :  { %p8988_p8 = scmp.ne.s32.totalorder %s11082_s6, %s8987_s24  ;;  %p8991_p9 = scmp.lt.u32.totalorder %s8987_s24, %s11082_s6 }
  0x9d   :  { %p8993_p10 = pnand %p8991_p9, %p8988_p8 }
  0x9f   :  { %8996 = shalt.err (!%p8993_p10)
}
  0xa0   :  { %s8997_s25 = scalar_lea.vmem %s99_s9, 512  ;;  %p9002_p12 = scmp.lt.s32.totalorder %s99_s9, %s99_s9 }
  0xa1   :  { %p8998_p11 = scmp.ne.s32.totalorder %s99_s9, %s8997_s25  ;;  %p9003_p13 = scmp.lt.s32.totalorder %s8997_s25, %s8997_s25 }
  0xa3   :  { %p9004_p0 = por %p9003_p13, %p9002_p12 }
  0xa5   :  { %p9005_p1 = pnand %p9004_p0, %p8998_p11 }
  0xa7   :  { %9008 = shalt.err (!%p9005_p1)
}
  0xa8   :  { %104 = dma.hbm_to_vmem [thread:$0]  %s11082_s6, 512, %s99_s9, [#allocation13], %s9098_s23, %s9098_s23, %s9099_s3  }
  0xa9   :  { %s9104_s0 = smov [#allocation17]   ;;  %s9105_s28 = smov [#allocation20]  }
  0xaa   :  { %s126_s21 = sshll.u32 %s9104_s0, 4  ;;  %s152_s29 = sshll.u32 %s9105_s28, 4  ;;  %s127_s21 = int_to_ptr.vmem [resolvable:$true] %s126_s21  ;;  %s153_s29 = int_to_ptr.vmem [resolvable:$true] %s152_s29 }
  0xab   :  { %s9009_s18 = scalar_lea.hbm %s11086_s10, 1024 }
  0xac   :  { %p9010_p2 = scmp.ne.s32.totalorder %s11086_s10, %s9009_s18  ;;  %p9013_p3 = scmp.lt.u32.totalorder %s9009_s18, %s11086_s10 }
  0xae   :  { %p9015_p4 = pnand %p9013_p3, %p9010_p2 }
  0xb0   :  { %9018 = shalt.err (!%p9015_p4)
}
  0xb1   :  { %s9019_s6 = scalar_lea.vmem %s127_s21, 1024  ;;  %p9024_p6 = scmp.lt.s32.totalorder %s127_s21, %s127_s21 }
  0xb2   :  { %p9020_p5 = scmp.ne.s32.totalorder %s127_s21, %s9019_s6  ;;  %p9025_p7 = scmp.lt.s32.totalorder %s9019_s6, %s9019_s6 }
  0xb4   :  { %p9026_p8 = por %p9025_p7, %p9024_p6 }
  0xb6   :  { %p9027_p9 = pnand %p9026_p8, %p9020_p5 }
  0xb8   :  { %9030 = shalt.err (!%p9027_p9)
}
  0xb9   :  { %132 = dma.hbm_to_vmem [thread:$0]  %s11086_s10, 1024, %s127_s21, [#allocation16], %s9098_s23, %s9098_s23, %s9099_s3  }
  0xba   :  { %s9031_s25 = scalar_lea.hbm %s11090_s14, 384 }
  0xbb   :  { %p9032_p10 = scmp.ne.s32.totalorder %s11090_s14, %s9031_s25  ;;  %p9035_p11 = scmp.lt.u32.totalorder %s9031_s25, %s11090_s14 }
  0xbd   :  { %p9037_p12 = pnand %p9035_p11, %p9032_p10 }
  0xbf   :  { %9040 = shalt.err (!%p9037_p12)
}
  0xc0   :  { %s9041_s2 = scalar_lea.vmem %s153_s29, 384  ;;  %p9046_p0 = scmp.lt.s32.totalorder %s153_s29, %s153_s29 }
  0xc1   :  { %p9042_p13 = scmp.ne.s32.totalorder %s153_s29, %s9041_s2  ;;  %p9047_p1 = scmp.lt.s32.totalorder %s9041_s2, %s9041_s2 }
  0xc3   :  { %p9048_p2 = por %p9047_p1, %p9046_p0 }
  0xc5   :  { %p9049_p3 = pnand %p9048_p2, %p9042_p13 }
  0xc7   :  { %9052 = shalt.err (!%p9049_p3)
}
  0xc8   :  { %158 = dma.hbm_to_vmem [thread:$0]  %s11090_s14, 384, %s153_s29, [#allocation19], %s9098_s23, %s9098_s23, %s9099_s3  }
  0xc9   :  { %s9106_s20 = smov [#allocation21]   ;;  %s9053_s24 = scalar_lea.hbm %s11092_s16, 512 }
  0xca   :  { %s166_s18 = sshll.u32 %s9106_s20, 4  ;;  %p9054_p4 = scmp.ne.s32.totalorder %s11092_s16, %s9053_s24  ;;  %s167_s18 = int_to_ptr.vmem [resolvable:$true] %s166_s18 }
  0xcb   :  { %p9057_p5 = scmp.lt.u32.totalorder %s9053_s24, %s11092_s16 }
  0xcd   :  { %p9059_p6 = pnand %p9057_p5, %p9054_p4 }
  0xcf   :  { %9062 = shalt.err (!%p9059_p6)
}
  0xd0   :  { %s9063_s22 = scalar_lea.vmem %s167_s18, 512  ;;  %p9068_p8 = scmp.lt.s32.totalorder %s167_s18, %s167_s18 }
  0xd1   :  { %p9064_p7 = scmp.ne.s32.totalorder %s167_s18, %s9063_s22  ;;  %p9069_p9 = scmp.lt.s32.totalorder %s9063_s22, %s9063_s22 }
  0xd3   :  { %p9070_p10 = por %p9069_p9, %p9068_p8 }
  0xd5   :  { %p9071_p11 = pnand %p9070_p10, %p9064_p7 }
  0xd7   :  { %9074 = shalt.err (!%p9071_p11)
}
  0xd8   :  { %s9107_s14 = smov 256   ;;  %s9108_s23 = smov 16  }
  0xd9   :  { %172 = dma.hbm_to_vmem [thread:$0]  %s11092_s16, 512, %s167_s18, [#allocation22], %s9107_s14, %s9107_s14, %s9108_s23  }
  0xda   :  { %9075 = dma.done.wait [#allocation5], 32  }
  0xdb   :  { %9076 = vsyncadd [#allocation5], 4294967264 }
  0xdc   :  { %9077 = dma.done.wait [#allocation7], 144  }
  0xdd   :  { %9078 = vsyncadd [#allocation7], 4294967152 }
  0xde   :  { %9079 = dma.done.wait [#allocation10], 8256  }
  0xdf   :  { %9080 = vsyncadd [#allocation10], 4294959040 }
  0xe0   :  { %9081 = dma.done.wait [#allocation13], 66048  }
  0xe1   :  { %9082 = vsyncadd [#allocation13], 4294901248 }
  0xe2   :  { %9083 = dma.done.wait [#allocation16], 2048  }
  0xe3   :  { %9084 = vsyncadd [#allocation16], 4294965248 }
  0xe4   :  { %9085 = dma.done.wait [#allocation19], 512  }
  0xe5   :  { %9086 = vsyncadd [#allocation19], 4294966784 }
  0xe6   :  { %9087 = dma.done.wait [#allocation22], 512  }
  0xe7   :  { %9088 = vsyncadd [#allocation22], 4294966784  ;;  %v9109_v0 = vmov 0.0   ;;  %vm9110_vm0 = vmmov 0   ;;  %vm218_vm1 = vcmask 64512   ;;  %v210_v1 = vld [vmem:[#allocation6] sm:$0xff] }
  0xe8   :  { %7081 = vmatprep.subr.mxu0 %v9109_v0  ;;  %1605 = vst [vmem:[#allocation2] sm:$0xff] %v9109_v0  ;;  %1608 = vst [vmem:[#allocation2 + $0x10] sm:$0xff] %v9109_v0  ;;  %7083 = vmatprep.mubr.msk.f32.mxu0 %vm9110_vm0, %v9109_v0  ;;  %v209_v2 = vld [vmem:[#allocation4] sm:$0x3]  ;;  %v294_v3 = vld [vmem:[#allocation9 + $0x8] sm:$0xff]  ;;  %vm1622_vm2 = vcmask 1043970  }
  0xe9   :  { %1610 = vst [vmem:[#allocation2 + $0x20] sm:$0xff] %v9109_v0  ;;  %1612 = vst [vmem:[#allocation2 + $0x30] sm:$0xff] %v9109_v0  ;;  %443 = vmatprep.mubr.f32.mxu1 %v9109_v0  ;;  %7082 = vmatpush3.msra.mxu0 %v210_v1  ;;  %v298_v4 = vld [vmem:[#allocation9 + $0x28] sm:$0xff]  ;;  %v296_v5 = vld [vmem:[#allocation9 + $0x18] sm:$0xff]  ;;  %vm1633_vm3 = vcmask 1048070   ;;  %vm1618_vm4 = vcmask 1041920  }
  0xea   :  { %5640 = vst [vmem:[#allocation3] sm:$0xff] %v9109_v0  ;;  %5642 = vst [vmem:[#allocation3 + $0x10] sm:$0xff] %v9109_v0  ;;  %v300_v6 = vld [vmem:[#allocation9 + $0x38] sm:$0xff]  ;;  %7084 = vmatmul.mubr.msk.f32.vlgmr.msra.gmra.mrb[0].mxu0 %vm218_vm1, %v209_v2  ;;  %v7634_v7 = vpack.c.bf16 %v298_v4, %v294_v3  ;;  %v293_v9 = vld [vmem:[#allocation9] sm:$0xff]  ;;  %vm1629_vm5 = vcmask 1046020   ;;  %vm1606_vm6 = vcmask 523264  }
  0xeb   :  { %5643 = vst [vmem:[#allocation3 + $0x18] sm:$0xff] %v9109_v0  ;;  %5648 = vst [vmem:[#allocation3 + $0x40] sm:$0xff] %v9109_v0  ;;  %v7666_v8 = vpack.c.bf16 %v300_v6, %v296_v5  ;;  %v297_v10 = vld [vmem:[#allocation9 + $0x20] sm:$0xff]  ;;  %v295_v11 = vld [vmem:[#allocation9 + $0x10] sm:$0xff]  ;;  %514 = vmatprep.mubr.f32.mxu0 %v9109_v0  ;;  %vm1722_vm7 = vcmask 261120   ;;  %s9113_s6 = smov 80  }
  0xec   :  { %5649 = vst [vmem:[#allocation3 + $0x48] sm:$0xff] %v9109_v0  ;;  %v7636_v12 = vpack.c.bf16 %v297_v10, %v293_v9  ;;  %v299_v13 = vld [vmem:[#allocation9 + $0x30] sm:$0xff]  ;;  %v302_v14 = vld [vmem:[#allocation9 + $0x48] sm:$0xff]  ;;  %7635 = vmatprep.subr.bf16.mxu1 %v7634_v7  ;;  %v304_v18 = vld [vmem:[#allocation9 + $0x58] sm:$0xff]  ;;  %s9114_s9 = smov 81   ;;  %s9115_s26 = smov 52  }
  0xed   :  { %v306_v15 = vld [vmem:[#allocation9 + $0x68] sm:$0xff]  ;;  %7667 = vmatprep.subr.bf16.mxu0 %v7666_v8  ;;  %v7668_v16 = vpack.c.bf16 %v299_v13, %v295_v11  ;;  %v308_v19 = vld [vmem:[#allocation9 + $0x78] sm:$0xff]  ;;  %v301_v20 = vld [vmem:[#allocation9 + $0x40] sm:$0xff]  ;;  %s9117_s22 = smov 112   ;;  %s9118_s14 = smov 36   ;;  %vm3099_vm8 = vcmask 1048064  }
  0xee   :  { %v7638_v17 = vpack.c.bf16 %v306_v15, %v302_v14  ;;  %7637 = vmatpush1.bf16.msra.mxu1 %v7636_v12  ;;  %v7670_v21 = vpack.c.bf16 %v308_v19, %v304_v18  ;;  %v305_v22 = vld [vmem:[#allocation9 + $0x60] sm:$0xff]  ;;  %v303_v23 = vld [vmem:[#allocation9 + $0x50] sm:$0xff]  ;;  %v310_v27 = vld [vmem:[#allocation9 + $0x88] sm:$0xff]  ;;  %s9119_s23 = smov 97   ;;  %s9120_s3 = smov 68   ;;  %vm3166_vm9 = vcmask 793600  }
  0xef   :  { %v307_v24 = vld [vmem:[#allocation9 + $0x70] sm:$0xff]  ;;  %7669 = vmatpush1.bf16.msra.mxu0 %v7668_v16  ;;  %v7640_v25 = vpack.c.bf16 %v305_v22, %v301_v20  ;;  %v314_v28 = vld [vmem:[#allocation9 + $0xa8] sm:$0xff]  ;;  %v312_v29 = vld [vmem:[#allocation9 + $0x98] sm:$0xff]  ;;  %s9121_s29 = smov 21   ;;  %s9122_s16 = smov 37   ;;  %vm3261_vm10 = vcmask 556032  }
  0xf0   :  { %7639 = vmatprep.subr.bf16.mxu1 %v7638_v17  ;;  %v7672_v26 = vpack.c.bf16 %v307_v24, %v303_v23  ;;  %7671 = vmatprep.subr.bf16.mxu0 %v7670_v21  ;;  %v7642_v30 = vpack.c.bf16 %v314_v28, %v310_v27  ;;  %v316_v31 = vld [vmem:[#allocation9 + $0xb8] sm:$0xff]  ;;  %v309_v32 = vld [vmem:[#allocation9 + $0x80] sm:$0xff]  ;;  %v311_v35 = vld [vmem:[#allocation9 + $0x90] sm:$0xff]  ;;  %s9123_s1 = smov 15   ;;  %s9124_s25 = smov 28   ;;  %vm3442_vm11 = vcmask 302080  }
  0xf1   :  { %v313_v33 = vld [vmem:[#allocation9 + $0xa0] sm:$0xff]  ;;  %v7674_v34 = vpack.c.bf16 %v316_v31, %v312_v29  ;;  %v315_v36 = vld [vmem:[#allocation9 + $0xb0] sm:$0xff]  ;;  %v318_v37 = vld [vmem:[#allocation9 + $0xc8] sm:$0xff]  ;;  %s9125_s4 = smov 43   ;;  %vm6076_vm12 = vcmask 424960   ;;  %vm6136_vm13 = vcmask 662528  }
  0xf2   :  { %7641 = vmatpush1.bf16.msra.mxu1 %v7640_v25  ;;  %v7644_v38 = vpack.c.bf16 %v313_v33, %v309_v32  ;;  %v322_v39 = vld [vmem:[#allocation9 + $0xe8] sm:$0xff]  ;;  %v320_v40 = vld [vmem:[#allocation9 + $0xd8] sm:$0xff]  ;;  %v7676_v42 = vpack.c.bf16 %v315_v36, %v311_v35  ;;  %v317_v44 = vld [vmem:[#allocation9 + $0xc0] sm:$0xff]  ;;  %vm6196_vm14 = vcmask 916480   ;;  %s9128_s19 = smov 53   ;;  %vm5722_vm15 = vcmask 654336  }
  0xf3   :  { %v324_v41 = vld [vmem:[#allocation9 + $0xf8] sm:$0xff]  ;;  %7673 = vmatpush1.bf16.msra.mxu0 %v7672_v26  ;;  %7643 = vmatprep.subr.bf16.mxu1 %v7642_v30  ;;  %v7646_v43 = vpack.c.bf16 %v322_v39, %v318_v37  ;;  %v321_v45 = vld [vmem:[#allocation9 + $0xe0] sm:$0xff]  ;;  %v319_v46 = vld [vmem:[#allocation9 + $0xd0] sm:$0xff]  ;;  %vm6258_vm0 = vcmask 293888   ;;  %vm5696_vm1 = vcmask 400384  }
  0xf4   :  { %7675 = vmatprep.subr.bf16.mxu0 %v7674_v34  ;;  %v7678_v47 = vpack.c.bf16 %v324_v41, %v320_v40  ;;  %v323_v48 = vld [vmem:[#allocation9 + $0xf0] sm:$0xff]  ;;  %v326_v49 = vld [vmem:[#allocation9 + $0x108] sm:$0xff]  ;;  %v328_v51 = vld [vmem:[#allocation9 + $0x118] sm:$0xff]  ;;  %v7648_v53 = vpack.c.bf16 %v321_v45, %v317_v44 }
  0xf5   :  { %v330_v50 = vld [vmem:[#allocation9 + $0x128] sm:$0xff]  ;;  %v332_v52 = vld [vmem:[#allocation9 + $0x138] sm:$0xff]  ;;  %v7680_v54 = vpack.c.bf16 %v323_v48, %v319_v46  ;;  %v325_v56 = vld [vmem:[#allocation9 + $0x100] sm:$0xff] }
  0xf6   :  { %7645 = vmatpush1.bf16.msra.mxu1 %v7644_v38  ;;  %v7650_v55 = vpack.c.bf16 %v330_v50, %v326_v49  ;;  %v329_v57 = vld [vmem:[#allocation9 + $0x120] sm:$0xff]  ;;  %v327_v58 = vld [vmem:[#allocation9 + $0x110] sm:$0xff]  ;;  %v7682_v59 = vpack.c.bf16 %v332_v52, %v328_v51  ;;  %v334_v61 = vld [vmem:[#allocation9 + $0x148] sm:$0xff] }
  0xf7   :  { %7677 = vmatpush1.bf16.msra.mxu0 %v7676_v42  ;;  %7647 = vmatprep.subr.bf16.mxu1 %v7646_v43  ;;  %v331_v60 = vld [vmem:[#allocation9 + $0x130] sm:$0xff]  ;;  %v338_v62 = vld [vmem:[#allocation9 + $0x168] sm:$0xff]  ;;  %v336_v63 = vld [vmem:[#allocation9 + $0x158] sm:$0xff]  ;;  %v7652_v1 = vpack.c.bf16 %v329_v57, %v325_v56 }
  0xf8   :  { %7679 = vmatprep.subr.bf16.mxu0 %v7678_v47  ;;  %v340_v0 = vld [vmem:[#allocation9 + $0x178] sm:$0xff]  ;;  %v7684_v2 = vpack.c.bf16 %v331_v60, %v327_v58  ;;  %v7654_v3 = vpack.c.bf16 %v338_v62, %v334_v61  ;;  %v333_v4 = vld [vmem:[#allocation9 + $0x140] sm:$0xff]  ;;  %v335_v6 = vld [vmem:[#allocation9 + $0x150] sm:$0xff] }
  0xf9   :  { %v337_v5 = vld [vmem:[#allocation9 + $0x160] sm:$0xff]  ;;  %v7686_v7 = vpack.c.bf16 %v340_v0, %v336_v63  ;;  %v339_v8 = vld [vmem:[#allocation9 + $0x170] sm:$0xff]  ;;  %v342_v9 = vld [vmem:[#allocation9 + $0x188] sm:$0xff] }
  0xfa   :  { %7649 = vmatpush1.bf16.msra.mxu1 %v7648_v53  ;;  %v346_v10 = vld [vmem:[#allocation9 + $0x1a8] sm:$0xff]  ;;  %v344_v11 = vld [vmem:[#allocation9 + $0x198] sm:$0xff]  ;;  %v7656_v13 = vpack.c.bf16 %v337_v5, %v333_v4  ;;  %v7688_v14 = vpack.c.bf16 %v339_v8, %v335_v6  ;;  %v341_v16 = vld [vmem:[#allocation9 + $0x180] sm:$0xff] }
  0xfb   :  { %7681 = vmatpush1.bf16.msra.mxu0 %v7680_v54  ;;  %7651 = vmatprep.subr.bf16.mxu1 %v7650_v55  ;;  %v348_v12 = vld [vmem:[#allocation9 + $0x1b8] sm:$0xff]  ;;  %v7658_v15 = vpack.c.bf16 %v346_v10, %v342_v9  ;;  %v345_v17 = vld [vmem:[#allocation9 + $0x1a0] sm:$0xff]  ;;  %v343_v19 = vld [vmem:[#allocation9 + $0x190] sm:$0xff] }
  0xfc   :  { %7683 = vmatprep.subr.bf16.mxu0 %v7682_v59  ;;  %v7690_v18 = vpack.c.bf16 %v348_v12, %v344_v11  ;;  %v347_v20 = vld [vmem:[#allocation9 + $0x1b0] sm:$0xff]  ;;  %v7660_v21 = vpack.c.bf16 %v345_v17, %v341_v16  ;;  %v350_v23 = vld [vmem:[#allocation9 + $0x1c8] sm:$0xff]  ;;  %v352_v25 = vld [vmem:[#allocation9 + $0x1d8] sm:$0xff] }
  0xfd   :  { %v7692_v22 = vpack.c.bf16 %v347_v20, %v343_v19  ;;  %v354_v24 = vld [vmem:[#allocation9 + $0x1e8] sm:$0xff]  ;;  %v356_v27 = vld [vmem:[#allocation9 + $0x1f8] sm:$0xff]  ;;  %v349_v28 = vld [vmem:[#allocation9 + $0x1c0] sm:$0xff] }
  0xfe   :  { %7653 = vmatpush1.bf16.msra.mxu1 %v7652_v1  ;;  %v7662_v26 = vpack.c.bf16 %v354_v24, %v350_v23  ;;  %v353_v29 = vld [vmem:[#allocation9 + $0x1e0] sm:$0xff]  ;;  %v7694_v30 = vpack.c.bf16 %v356_v27, %v352_v25  ;;  %v351_v32 = vld [vmem:[#allocation9 + $0x1d0] sm:$0xff]  ;;  %v6754_v41 = vld [vmem:[#allocation8] ss:$0 sm:$0xff] }
  0xff   :  { %7685 = vmatpush1.bf16.msra.mxu0 %v7684_v2  ;;  %7655 = vmatprep.subr.bf16.mxu1 %v7654_v3  ;;  %v7664_v31 = vpack.c.bf16 %v353_v29, %v349_v28  ;;  %v355_v33 = vld [vmem:[#allocation9 + $0x1f0] sm:$0xff]  ;;  %v528_v37 = vld [vmem:[#allocation12 + $0x18] sm:$0xff]  ;;  %v525_v42 = vld [vmem:[#allocation12] sm:$0xff] }
 0x100   :  { %7687 = vmatprep.subr.bf16.mxu0 %v7686_v7  ;;  %v7696_v34 = vpack.c.bf16 %v355_v33, %v351_v32  ;;  %v526_v35 = vld [vmem:[#allocation12 + $0x8] sm:$0xff]  ;;  %v536_v39 = vld [vmem:[#allocation12 + $0x58] sm:$0xff]  ;;  %v533_v43 = vld [vmem:[#allocation12 + $0x40] sm:$0xff] }
 0x101   :  { %v534_v36 = vld [vmem:[#allocation12 + $0x48] sm:$0xff]  ;;  %v7826_v40 = vpack.c.bf16 %v536_v39, %v528_v37  ;;  %v527_v44 = vld [vmem:[#allocation12 + $0x10] sm:$0xff]  ;;  %v544_v49 = vld [vmem:[#allocation12 + $0x98] sm:$0xff]  ;;  %v7700_v53 = vpack.c.bf16 %v533_v43, %v525_v42 }
 0x102   :  { %7657 = vmatpush1.bf16.msra.mxu1 %v7656_v13  ;;  %v7698_v38 = vpack.c.bf16 %v534_v36, %v526_v35  ;;  %v535_v45 = vld [vmem:[#allocation12 + $0x50] sm:$0xff]  ;;  %v542_v46 = vld [vmem:[#allocation12 + $0x88] sm:$0xff]  ;;  %v552_v50 = vld [vmem:[#allocation12 + $0xd8] sm:$0xff] }
 0x103   :  { %7689 = vmatpush1.bf16.msra.mxu0 %v7688_v14  ;;  %7659 = vmatprep.subr.bf16.mxu1 %v7658_v15  ;;  %v550_v48 = vld [vmem:[#allocation12 + $0xc8] sm:$0xff]  ;;  %v7828_v54 = vpack.c.bf16 %v535_v45, %v527_v44  ;;  %v541_v55 = vld [vmem:[#allocation12 + $0x80] sm:$0xff]  ;;  %v7830_v59 = vpack.c.bf16 %v552_v50, %v544_v49  ;;  %v543_v60 = vld [vmem:[#allocation12 + $0x90] sm:$0xff] }
 0x104   :  { %7691 = vmatprep.subr.bf16.mxu0 %v7690_v18  ;;  %v549_v56 = vld [vmem:[#allocation12 + $0xc0] sm:$0xff]  ;;  %v7702_v58 = vpack.c.bf16 %v550_v48, %v542_v46  ;;  %v551_v61 = vld [vmem:[#allocation12 + $0xd0] sm:$0xff]  ;;  %v558_v62 = vld [vmem:[#allocation12 + $0x108] sm:$0xff] }
 0x105   :  { %v566_v63 = vld [vmem:[#allocation12 + $0x148] sm:$0xff]  ;;  %v560_v0 = vld [vmem:[#allocation12 + $0x118] sm:$0xff]  ;;  %v7704_v2 = vpack.c.bf16 %v549_v56, %v541_v55  ;;  %v7832_v3 = vpack.c.bf16 %v551_v61, %v543_v60  ;;  %v557_v4 = vld [vmem:[#allocation12 + $0x100] sm:$0xff] }
 0x106   :  { %7661 = vmatpush1.bf16.msra.mxu1 %v7660_v21  ;;  %v568_v1 = vld [vmem:[#allocation12 + $0x158] sm:$0xff]  ;;  %v565_v5 = vld [vmem:[#allocation12 + $0x140] sm:$0xff]  ;;  %v7706_v6 = vpack.c.bf16 %v566_v63, %v558_v62  ;;  %v559_v8 = vld [vmem:[#allocation12 + $0x110] sm:$0xff] }
 0x107   :  { %7693 = vmatpush1.bf16.msra.mxu0 %v7692_v22  ;;  %7663 = vmatprep.subr.bf16.mxu1 %v7662_v26  ;;  %v7834_v7 = vpack.c.bf16 %v568_v1, %v560_v0  ;;  %v567_v9 = vld [vmem:[#allocation12 + $0x150] sm:$0xff]  ;;  %v574_v10 = vld [vmem:[#allocation12 + $0x188] sm:$0xff]  ;;  %v576_v12 = vld [vmem:[#allocation12 + $0x198] sm:$0xff]  ;;  %v7708_v14 = vpack.c.bf16 %v565_v5, %v557_v4 }
 0x108   :  { %7695 = vmatprep.subr.bf16.mxu0 %v7694_v30  ;;  %v582_v11 = vld [vmem:[#allocation12 + $0x1c8] sm:$0xff]  ;;  %v584_v13 = vld [vmem:[#allocation12 + $0x1d8] sm:$0xff]  ;;  %v7836_v15 = vpack.c.bf16 %v567_v9, %v559_v8  ;;  %v573_v16 = vld [vmem:[#allocation12 + $0x180] sm:$0xff] }
 0x109   :  { %v581_v17 = vld [vmem:[#allocation12 + $0x1c0] sm:$0xff]  ;;  %v7710_v18 = vpack.c.bf16 %v582_v11, %v574_v10  ;;  %v7838_v19 = vpack.c.bf16 %v584_v13, %v576_v12  ;;  %v575_v20 = vld [vmem:[#allocation12 + $0x190] sm:$0xff]  ;;  %v590_v22 = vld [vmem:[#allocation12 + $0x208] sm:$0xff] }
 0x10a   :  { %7665 = vmatpush1.bf16.msra.mxu1 %v7664_v31  ;;  %v583_v21 = vld [vmem:[#allocation12 + $0x1d0] sm:$0xff]  ;;  %v598_v23 = vld [vmem:[#allocation12 + $0x248] sm:$0xff]  ;;  %v592_v24 = vld [vmem:[#allocation12 + $0x218] sm:$0xff]  ;;  %v7712_v26 = vpack.c.bf16 %v581_v17, %v573_v16 }
 0x10b   :  { %7697 = vmatpush1.bf16.msra.mxu0 %v7696_v34  ;;  %7699 = vmatprep.subr.bf16.mxu1 %v7698_v38  ;;  %v600_v25 = vld [vmem:[#allocation12 + $0x258] sm:$0xff]  ;;  %v7840_v27 = vpack.c.bf16 %v583_v21, %v575_v20  ;;  %v589_v28 = vld [vmem:[#allocation12 + $0x200] sm:$0xff]  ;;  %v7714_v30 = vpack.c.bf16 %v598_v23, %v590_v22  ;;  %v591_v32 = vld [vmem:[#allocation12 + $0x210] sm:$0xff] }
 0x10c   :  { %7827 = vmatprep.subr.bf16.mxu0 %v7826_v40  ;;  %v597_v29 = vld [vmem:[#allocation12 + $0x240] sm:$0xff]  ;;  %v7842_v31 = vpack.c.bf16 %v600_v25, %v592_v24  ;;  %v599_v33 = vld [vmem:[#allocation12 + $0x250] sm:$0xff]  ;;  %v606_v34 = vld [vmem:[#allocation12 + $0x288] sm:$0xff] }
 0x10d   :  { %v614_v35 = vld [vmem:[#allocation12 + $0x2c8] sm:$0xff]  ;;  %v608_v36 = vld [vmem:[#allocation12 + $0x298] sm:$0xff]  ;;  %v7716_v38 = vpack.c.bf16 %v597_v29, %v589_v28  ;;  %v7844_v39 = vpack.c.bf16 %v599_v33, %v591_v32  ;;  %v605_v40 = vld [vmem:[#allocation12 + $0x280] sm:$0xff] }
 0x10e   :  { %v616_v37 = vld [vmem:[#allocation12 + $0x2d8] sm:$0xff]  ;;  %v7718_v42 = vpack.c.bf16 %v614_v35, %v606_v34  ;;  %v607_v44 = vld [vmem:[#allocation12 + $0x290] sm:$0xff]  ;;  %v622_v46 = vld [vmem:[#allocation12 + $0x308] sm:$0xff] }
 0x10f   :  { %v7846_v43 = vpack.c.bf16 %v616_v37, %v608_v36  ;;  %v615_v45 = vld [vmem:[#allocation12 + $0x2d0] sm:$0xff]  ;;  %v624_v48 = vld [vmem:[#allocation12 + $0x318] sm:$0xff]  ;;  %v637_v0 = vld [vmem:[#allocation12 + $0x380] sm:$0xff] }
 0x110   :  { %v632_v49 = vld [vmem:[#allocation12 + $0x358] sm:$0xff]  ;;  %v623_v56 = vld [vmem:[#allocation12 + $0x310] sm:$0xff]  ;;  %v645_v1 = vld [vmem:[#allocation12 + $0x3c0] sm:$0xff] }
 0x111   :  { %v7850_v55 = vpack.c.bf16 %v632_v49, %v624_v48  ;;  %v640_v60 = vld [vmem:[#allocation12 + $0x398] sm:$0xff]  ;;  %v639_v4 = vld [vmem:[#allocation12 + $0x390] sm:$0xff]  ;;  %v7728_v10 = vpack.c.bf16 %v645_v1, %v637_v0  ;;  %v653_v12 = vld [vmem:[#allocation12 + $0x400] sm:$0xff] }
 0x112   :  { %v648_v61 = vld [vmem:[#allocation12 + $0x3d8] sm:$0xff]  ;;  %v647_v5 = vld [vmem:[#allocation12 + $0x3d0] sm:$0xff]  ;;  %v661_v13 = vld [vmem:[#allocation12 + $0x440] sm:$0xff] }
 0x113   :  { %v656_v8 = vld [vmem:[#allocation12 + $0x418] sm:$0xff]  ;;  %v7856_v11 = vpack.c.bf16 %v647_v5, %v639_v4  ;;  %v655_v16 = vld [vmem:[#allocation12 + $0x410] sm:$0xff]  ;;  %v7732_v22 = vpack.c.bf16 %v661_v13, %v653_v12  ;;  %v669_v24 = vld [vmem:[#allocation12 + $0x480] sm:$0xff] }
 0x114   :  { %v664_v9 = vld [vmem:[#allocation12 + $0x458] sm:$0xff]  ;;  %v663_v17 = vld [vmem:[#allocation12 + $0x450] sm:$0xff]  ;;  %v677_v25 = vld [vmem:[#allocation12 + $0x4c0] sm:$0xff] }
 0x115   :  { %v672_v20 = vld [vmem:[#allocation12 + $0x498] sm:$0xff]  ;;  %v7860_v23 = vpack.c.bf16 %v663_v17, %v655_v16  ;;  %v671_v28 = vld [vmem:[#allocation12 + $0x490] sm:$0xff]  ;;  %v7736_v34 = vpack.c.bf16 %v677_v25, %v669_v24  ;;  %v685_v36 = vld [vmem:[#allocation12 + $0x500] sm:$0xff] }
 0x116   :  { %v680_v21 = vld [vmem:[#allocation12 + $0x4d8] sm:$0xff]  ;;  %v679_v29 = vld [vmem:[#allocation12 + $0x4d0] sm:$0xff]  ;;  %v693_v37 = vld [vmem:[#allocation12 + $0x540] sm:$0xff] }
 0x117   :  { %v688_v32 = vld [vmem:[#allocation12 + $0x518] sm:$0xff]  ;;  %v7864_v35 = vpack.c.bf16 %v679_v29, %v671_v28  ;;  %v701_v48 = vld [vmem:[#allocation12 + $0x580] sm:$0xff]  ;;  %v719_v0 = vld [vmem:[#allocation12 + $0x610] sm:$0xff] }
 0x118   :  { %v696_v33 = vld [vmem:[#allocation12 + $0x558] sm:$0xff]  ;;  %v709_v49 = vld [vmem:[#allocation12 + $0x5c0] sm:$0xff]  ;;  %v727_v1 = vld [vmem:[#allocation12 + $0x650] sm:$0xff] }
 0x119   :  { %v736_v4 = vld [vmem:[#allocation12 + $0x698] sm:$0xff]  ;;  %v735_v12 = vld [vmem:[#allocation12 + $0x690] sm:$0xff]  ;;  %v766_v28 = vld [vmem:[#allocation12 + $0x788] sm:$0xff] }
 0x11a   :  { %v744_v5 = vld [vmem:[#allocation12 + $0x6d8] sm:$0xff]  ;;  %v743_v13 = vld [vmem:[#allocation12 + $0x6d0] sm:$0xff]  ;;  %v774_v29 = vld [vmem:[#allocation12 + $0x7c8] sm:$0xff] }
 0x11b   :  { %v752_v16 = vld [vmem:[#allocation12 + $0x718] sm:$0xff]  ;;  %v751_v24 = vld [vmem:[#allocation12 + $0x710] sm:$0xff] }
 0x11c   :  { %v760_v17 = vld [vmem:[#allocation12 + $0x758] sm:$0xff]  ;;  %v759_v25 = vld [vmem:[#allocation12 + $0x750] sm:$0xff] }
 0x1bd   :  { %v288_v47 = vpop.f32.mrb[0].mxu0 }
 0x1be   :  { %v289_v51 = vadd.f32 %v6754_v41, %v288_v47  ;;  %v7085_v52 = vpop.f32.mrb[1].mxu0  ;;  %v613_v41 = vld [vmem:[#allocation12 + $0x2c0] sm:$0xff]  ;;  %v630_v47 = vld [vmem:[#allocation12 + $0x348] sm:$0xff] }
 0x1bf   :  { %v7720_v50 = vpack.c.bf16 %v613_v41, %v605_v40  ;;  %v621_v52 = vld [vmem:[#allocation12 + $0x300] sm:$0xff]  ;;  %v687_v40 = vld [vmem:[#allocation12 + $0x510] sm:$0xff] }
 0x1c0   :  { %v292_v57 = vmax.f32 %v289_v51, 0.0  ;;  %v7848_v51 = vpack.c.bf16 %v615_v45, %v607_v44  ;;  %v695_v41 = vld [vmem:[#allocation12 + $0x550] sm:$0xff]  ;;  %v704_v44 = vld [vmem:[#allocation12 + $0x598] sm:$0xff] }
 0x1c1   :  { %v712_v45 = vld [vmem:[#allocation12 + $0x5d8] sm:$0xff] }
 0x1c2   :  { %444 = vmatmul.mubr.f32.vlgmr.msra.gmra.mrb[0].mxu1 %v292_v57  ;;  %515 = vmatmul.mubr.f32.vlgmr.msra.gmra.mrb[2].mxu0 %v292_v57  ;;  %v631_v57 = vld [vmem:[#allocation12 + $0x350] sm:$0xff] }
 0x1c3   :  { %7701 = vmatpush1.bf16.msra.mxu1 %v7700_v53  ;;  %7829 = vmatpush1.bf16.msra.mxu0 %v7828_v54  ;;  %v629_v53 = vld [vmem:[#allocation12 + $0x340] sm:$0xff]  ;;  %v7722_v54 = vpack.c.bf16 %v630_v47, %v622_v46  ;;  %v7852_v63 = vpack.c.bf16 %v631_v57, %v623_v56  ;;  %v7740_v46 = vpack.c.bf16 %v693_v37, %v685_v36  ;;  %v720_v56 = vld [vmem:[#allocation12 + $0x618] sm:$0xff]  ;;  %v767_v37 = vld [vmem:[#allocation12 + $0x790] sm:$0xff] }
 0x1c4   :  { %7703 = vmatprep.subr.bf16.mxu1 %v7702_v58  ;;  %7831 = vmatprep.subr.bf16.mxu0 %v7830_v59  ;;  %v638_v58 = vld [vmem:[#allocation12 + $0x388] sm:$0xff]  ;;  %v7724_v62 = vpack.c.bf16 %v629_v53, %v621_v52  ;;  %v7868_v47 = vpack.c.bf16 %v695_v41, %v687_v40  ;;  %v703_v52 = vld [vmem:[#allocation12 + $0x590] sm:$0xff]  ;;  %v728_v57 = vld [vmem:[#allocation12 + $0x658] sm:$0xff] }
 0x1c5   :  { %v646_v59 = vld [vmem:[#allocation12 + $0x3c8] sm:$0xff]  ;;  %v711_v53 = vld [vmem:[#allocation12 + $0x5d0] sm:$0xff] }
 0x1c6   :  { %v782_v40 = vld [vmem:[#allocation12 + $0x808] sm:$0xff] }
 0x1c7   :  { %7705 = vmatpush1.bf16.msra.mxu1 %v7704_v2  ;;  %7833 = vmatpush1.bf16.msra.mxu0 %v7832_v3  ;;  %v7726_v2 = vpack.c.bf16 %v646_v59, %v638_v58  ;;  %v7854_v3 = vpack.c.bf16 %v648_v61, %v640_v60  ;;  %v7744_v58 = vpack.c.bf16 %v709_v49, %v701_v48  ;;  %v717_v60 = vld [vmem:[#allocation12 + $0x600] sm:$0xff]  ;;  %v790_v41 = vld [vmem:[#allocation12 + $0x848] sm:$0xff]  ;;  %v9393_v49 = vld [vmem:[#allocation11] sm:$0xf] }
 0x1c8   :  { %7707 = vmatprep.subr.bf16.mxu1 %v7706_v6  ;;  %7835 = vmatprep.subr.bf16.mxu0 %v7834_v7  ;;  %v654_v6 = vld [vmem:[#allocation12 + $0x408] sm:$0xff]  ;;  %v7872_v59 = vpack.c.bf16 %v711_v53, %v703_v52  ;;  %v725_v61 = vld [vmem:[#allocation12 + $0x640] sm:$0xff] }
 0x1c9   :  { %v662_v7 = vld [vmem:[#allocation12 + $0x448] sm:$0xff] }
 0x1cb   :  { %7709 = vmatpush1.bf16.msra.mxu1 %v7708_v14  ;;  %7837 = vmatpush1.bf16.msra.mxu0 %v7836_v15  ;;  %v7730_v14 = vpack.c.bf16 %v662_v7, %v654_v6  ;;  %v7858_v15 = vpack.c.bf16 %v664_v9, %v656_v8  ;;  %v7748_v6 = vpack.c.bf16 %v725_v61, %v717_v60  ;;  %v733_v8 = vld [vmem:[#allocation12 + $0x680] sm:$0xff] }
 0x1cc   :  { %7711 = vmatprep.subr.bf16.mxu1 %v7710_v18  ;;  %7839 = vmatprep.subr.bf16.mxu0 %v7838_v19  ;;  %v670_v18 = vld [vmem:[#allocation12 + $0x488] sm:$0xff]  ;;  %v7876_v7 = vpack.c.bf16 %v727_v1, %v719_v0  ;;  %v741_v9 = vld [vmem:[#allocation12 + $0x6c0] sm:$0xff] }
 0x1cd   :  { %v678_v19 = vld [vmem:[#allocation12 + $0x4c8] sm:$0xff]  ;;  %v789_v61 = vld [vmem:[#allocation12 + $0x840] sm:$0xff] }
 0x1ce   :  { %v798_v1 = vld [vmem:[#allocation12 + $0x888] sm:$0xff] }
 0x1cf   :  { %7713 = vmatpush1.bf16.msra.mxu1 %v7712_v26  ;;  %7841 = vmatpush1.bf16.msra.mxu0 %v7840_v27  ;;  %v7734_v26 = vpack.c.bf16 %v678_v19, %v670_v18  ;;  %v7862_v27 = vpack.c.bf16 %v680_v21, %v672_v20  ;;  %v7752_v18 = vpack.c.bf16 %v741_v9, %v733_v8  ;;  %v749_v20 = vld [vmem:[#allocation12 + $0x700] sm:$0xff] }
 0x1d0   :  { %7715 = vmatprep.subr.bf16.mxu1 %v7714_v30  ;;  %7843 = vmatprep.subr.bf16.mxu0 %v7842_v31  ;;  %v686_v30 = vld [vmem:[#allocation12 + $0x508] sm:$0xff]  ;;  %v7880_v19 = vpack.c.bf16 %v743_v13, %v735_v12  ;;  %v797_v9 = vld [vmem:[#allocation12 + $0x880] sm:$0xff]  ;;  %v799_v12 = vld [vmem:[#allocation12 + $0x890] sm:$0xff] }
 0x1d1   :  { %v694_v31 = vld [vmem:[#allocation12 + $0x548] sm:$0xff]  ;;  %v807_v13 = vld [vmem:[#allocation12 + $0x8d0] sm:$0xff] }
 0x1d3   :  { %7717 = vmatpush1.bf16.msra.mxu1 %v7716_v38  ;;  %7845 = vmatpush1.bf16.msra.mxu0 %v7844_v39  ;;  %v7738_v38 = vpack.c.bf16 %v694_v31, %v686_v30  ;;  %v7866_v39 = vpack.c.bf16 %v696_v33, %v688_v32  ;;  %v768_v30 = vld [vmem:[#allocation12 + $0x798] sm:$0xff]  ;;  %v7758_v31 = vpack.c.bf16 %v774_v29, %v766_v28  ;;  %v765_v33 = vld [vmem:[#allocation12 + $0x780] sm:$0xff]  ;;  %v823_v28 = vld [vmem:[#allocation12 + $0x950] sm:$0xff] }
 0x1d4   :  { %7719 = vmatprep.subr.bf16.mxu1 %v7718_v42  ;;  %7847 = vmatprep.subr.bf16.mxu0 %v7846_v43  ;;  %v702_v42 = vld [vmem:[#allocation12 + $0x588] sm:$0xff]  ;;  %v776_v32 = vld [vmem:[#allocation12 + $0x7d8] sm:$0xff] }
 0x1d5   :  { %v710_v43 = vld [vmem:[#allocation12 + $0x5c8] sm:$0xff] }
 0x1d6   :  { %v830_v29 = vld [vmem:[#allocation12 + $0x988] sm:$0xff] }
 0x1d7   :  { %7721 = vmatpush1.bf16.msra.mxu1 %v7720_v50  ;;  %7849 = vmatpush1.bf16.msra.mxu0 %v7848_v51  ;;  %v7742_v50 = vpack.c.bf16 %v710_v43, %v702_v42  ;;  %v7870_v51 = vpack.c.bf16 %v712_v45, %v704_v44  ;;  %v784_v42 = vld [vmem:[#allocation12 + $0x818] sm:$0xff]  ;;  %v7762_v43 = vpack.c.bf16 %v790_v41, %v782_v40  ;;  %v839_v40 = vld [vmem:[#allocation12 + $0x9d0] sm:$0xff]  ;;  %v846_v41 = vld [vmem:[#allocation12 + $0xa08] sm:$0xff] }
 0x1d8   :  { %7723 = vmatprep.subr.bf16.mxu1 %v7722_v54  ;;  %7851 = vmatprep.subr.bf16.mxu0 %v7850_v55  ;;  %v718_v54 = vld [vmem:[#allocation12 + $0x608] sm:$0xff]  ;;  %v792_v44 = vld [vmem:[#allocation12 + $0x858] sm:$0xff] }
 0x1d9   :  { %v726_v55 = vld [vmem:[#allocation12 + $0x648] sm:$0xff]  ;;  %v7890_v45 = vpack.c.bf16 %v792_v44, %v784_v42  ;;  %v856_v44 = vld [vmem:[#allocation12 + $0xa58] sm:$0xff] }
 0x1da   :  { %v854_v42 = vld [vmem:[#allocation12 + $0xa48] sm:$0xff] }
 0x1db   :  { %7725 = vmatpush1.bf16.msra.mxu1 %v7724_v62  ;;  %7853 = vmatpush1.bf16.msra.mxu0 %v7852_v63  ;;  %v7746_v62 = vpack.c.bf16 %v726_v55, %v718_v54  ;;  %v7874_v63 = vpack.c.bf16 %v728_v57, %v720_v56  ;;  %v781_v57 = vld [vmem:[#allocation12 + $0x800] sm:$0xff] }
 0x1dc   :  { %7727 = vmatprep.subr.bf16.mxu1 %v7726_v2  ;;  %7855 = vmatprep.subr.bf16.mxu0 %v7854_v3  ;;  %v734_v2 = vld [vmem:[#allocation12 + $0x688] sm:$0xff] }
 0x1dd   :  { %v742_v3 = vld [vmem:[#allocation12 + $0x6c8] sm:$0xff] }
 0x1df   :  { %7729 = vmatpush1.bf16.msra.mxu1 %v7728_v10  ;;  %7857 = vmatpush1.bf16.msra.mxu0 %v7856_v11  ;;  %v7750_v10 = vpack.c.bf16 %v742_v3, %v734_v2  ;;  %v7878_v11 = vpack.c.bf16 %v744_v5, %v736_v4  ;;  %v806_v3 = vld [vmem:[#allocation12 + $0x8c8] sm:$0xff]  ;;  %v800_v4 = vld [vmem:[#allocation12 + $0x898] sm:$0xff] }
 0x1e0   :  { %7731 = vmatprep.subr.bf16.mxu1 %v7730_v14  ;;  %7859 = vmatprep.subr.bf16.mxu0 %v7858_v15  ;;  %v750_v14 = vld [vmem:[#allocation12 + $0x708] sm:$0xff]  ;;  %v808_v5 = vld [vmem:[#allocation12 + $0x8d8] sm:$0xff] }
 0x1e1   :  { %v758_v15 = vld [vmem:[#allocation12 + $0x748] sm:$0xff] }
 0x1e2   :  { %v7754_v21 = vpack.c.bf16 %v758_v15, %v750_v14  ;;  %v814_v14 = vld [vmem:[#allocation12 + $0x908] sm:$0xff]  ;;  %v7766_v15 = vpack.c.bf16 %v806_v3, %v798_v1  ;;  %v869_v1 = vld [vmem:[#allocation12 + $0xac0] sm:$0xff] }
 0x1e3   :  { %7733 = vmatpush1.bf16.msra.mxu1 %v7732_v22  ;;  %7861 = vmatpush1.bf16.msra.mxu0 %v7860_v23  ;;  %v7882_v22 = vpack.c.bf16 %v760_v17, %v752_v16  ;;  %v757_v23 = vld [vmem:[#allocation12 + $0x740] sm:$0xff]  ;;  %v7894_v16 = vpack.c.bf16 %v808_v5, %v800_v4  ;;  %v822_v17 = vld [vmem:[#allocation12 + $0x948] sm:$0xff]  ;;  %v863_v4 = vld [vmem:[#allocation12 + $0xa90] sm:$0xff] }
 0x1e4   :  { %7735 = vmatprep.subr.bf16.mxu1 %v7734_v26  ;;  %7863 = vmatprep.subr.bf16.mxu0 %v7862_v27  ;;  %v7756_v26 = vpack.c.bf16 %v757_v23, %v749_v20  ;;  %v7884_v27 = vpack.c.bf16 %v759_v25, %v751_v24  ;;  %v813_v23 = vld [vmem:[#allocation12 + $0x900] sm:$0xff]  ;;  %v7770_v25 = vpack.c.bf16 %v822_v17, %v814_v14  ;;  %v871_v5 = vld [vmem:[#allocation12 + $0xad0] sm:$0xff] }
 0x1e5   :  { %v821_v24 = vld [vmem:[#allocation12 + $0x940] sm:$0xff] }
 0x1e6   :  { %v877_v14 = vld [vmem:[#allocation12 + $0xb00] sm:$0xff] }
 0x1e7   :  { %7737 = vmatpush1.bf16.msra.mxu1 %v7736_v34  ;;  %7865 = vmatpush1.bf16.msra.mxu0 %v7864_v35  ;;  %v773_v34 = vld [vmem:[#allocation12 + $0x7c0] sm:$0xff]  ;;  %v7886_v35 = vpack.c.bf16 %v776_v32, %v768_v30  ;;  %v838_v30 = vld [vmem:[#allocation12 + $0x9c8] sm:$0xff]  ;;  %v840_v32 = vld [vmem:[#allocation12 + $0x9d8] sm:$0xff] }
 0x1e8   :  { %7739 = vmatprep.subr.bf16.mxu1 %v7738_v38  ;;  %7867 = vmatprep.subr.bf16.mxu0 %v7866_v39  ;;  %v7760_v36 = vpack.c.bf16 %v773_v34, %v765_v33  ;;  %v775_v38 = vld [vmem:[#allocation12 + $0x7d0] sm:$0xff]  ;;  %v7772_v33 = vpack.c.bf16 %v821_v24, %v813_v23  ;;  %v896_v23 = vld [vmem:[#allocation12 + $0xb98] sm:$0xff] }
 0x1e9   :  { %v7888_v39 = vpack.c.bf16 %v775_v38, %v767_v37  ;;  %v7774_v37 = vpack.c.bf16 %v838_v30, %v830_v29  ;;  %v904_v24 = vld [vmem:[#allocation12 + $0xbd8] sm:$0xff] }
 0x1ea   :  { %v7918_v30 = vpack.c.bf16 %v904_v24, %v896_v23  ;;  %v959_v23 = vld [vmem:[#allocation12 + $0xd90] sm:$0xff] }
 0x1eb   :  { %7741 = vmatpush1.bf16.msra.mxu1 %v7740_v46  ;;  %7869 = vmatpush1.bf16.msra.mxu0 %v7868_v47  ;;  %v359_v46 = vlaneseq  ;;  %v967_v24 = vld [vmem:[#allocation12 + $0xdd0] sm:$0xff] }
 0x1ec   :  { %7743 = vmatprep.subr.bf16.mxu1 %v7742_v50  ;;  %7871 = vmatprep.subr.bf16.mxu0 %v7870_v51 }
 0x1ed   :  { %v9388_v47 = vshrl.u32 %v359_v46, 7 }
 0x1ef   :  { %7745 = vmatpush1.bf16.msra.mxu1 %v7744_v58  ;;  %7873 = vmatpush1.bf16.msra.mxu0 %v7872_v59  ;;  %v9391_v48 = vsub.s32 0, %v9388_v47  ;;  %v9396_v50 = vsub.s32 1, %v9388_v47  ;;  %v373_v51 = vsub.s32 3, %v9388_v47 }
 0x1f0   :  { %7747 = vmatprep.subr.bf16.mxu1 %v7746_v62  ;;  %7875 = vmatprep.subr.bf16.mxu0 %v7874_v63  ;;  %v783_v62 = vld [vmem:[#allocation12 + $0x810] sm:$0xff] }
 0x1f1   :  { %v362_v52 = vrot.slane %v9393_v49, %v9391_v48  ;;  %v366_v53 = vrot.slane %v9393_v49, %v9396_v50  ;;  %v374_v54 = vrot.slane %v9393_v49, %v373_v51  ;;  %v791_v63 = vld [vmem:[#allocation12 + $0x850] sm:$0xff]  ;;  %v845_v51 = vld [vmem:[#allocation12 + $0xa00] sm:$0xff] }
 0x1f2   :  { %v7892_v8 = vpack.c.bf16 %v791_v63, %v783_v62 }
 0x1f3   :  { %7749 = vmatpush1.bf16.msra.mxu1 %v7748_v6  ;;  %7877 = vmatpush1.bf16.msra.mxu0 %v7876_v7  ;;  %v7764_v7 = vpack.c.bf16 %v789_v61, %v781_v57  ;;  %v855_v57 = vld [vmem:[#allocation12 + $0xa50] sm:$0xff]  ;;  %v872_v61 = vld [vmem:[#allocation12 + $0xad8] sm:$0xff] }
 0x1f4   :  { %7751 = vmatprep.subr.bf16.mxu1 %v7750_v10  ;;  %7879 = vmatprep.subr.bf16.mxu0 %v7878_v11  ;;  %v805_v10 = vld [vmem:[#allocation12 + $0x8c0] sm:$0xff] }
 0x1f7   :  { %7753 = vmatpush1.bf16.msra.mxu1 %v7752_v18  ;;  %7881 = vmatpush1.bf16.msra.mxu0 %v7880_v19  ;;  %v816_v18 = vld [vmem:[#allocation12 + $0x918] sm:$0xff] }
 0x1f8   :  { %7755 = vmatprep.subr.bf16.mxu1 %v7754_v21  ;;  %7883 = vmatprep.subr.bf16.mxu0 %v7882_v22  ;;  %v824_v19 = vld [vmem:[#allocation12 + $0x958] sm:$0xff]  ;;  %v7768_v21 = vpack.c.bf16 %v805_v10, %v797_v9  ;;  %v7896_v22 = vpack.c.bf16 %v807_v13, %v799_v12  ;;  %v7912_v13 = vpack.c.bf16 %v871_v5, %v863_v4  ;;  %v941_v4 = vld [vmem:[#allocation12 + $0xd00] sm:$0xff] }
 0x1f9   :  { %v880_v9 = vld [vmem:[#allocation12 + $0xb18] sm:$0xff]  ;;  %v949_v5 = vld [vmem:[#allocation12 + $0xd40] sm:$0xff] }
 0x1fa   :  { %v888_v10 = vld [vmem:[#allocation12 + $0xb58] sm:$0xff] }
 0x1fb   :  { %7757 = vmatpush1.bf16.msra.mxu1 %v7756_v26  ;;  %7885 = vmatpush1.bf16.msra.mxu0 %v7884_v27  ;;  %v7898_v26 = vpack.c.bf16 %v824_v19, %v816_v18  ;;  %v815_v27 = vld [vmem:[#allocation12 + $0x910] sm:$0xff]  ;;  %v7914_v17 = vpack.c.bf16 %v888_v10, %v880_v9 }
 0x1fc   :  { %7759 = vmatprep.subr.bf16.mxu1 %v7758_v31  ;;  %7887 = vmatprep.subr.bf16.mxu0 %v7886_v35  ;;  %v832_v31 = vld [vmem:[#allocation12 + $0x998] sm:$0xff]  ;;  %v7900_v34 = vpack.c.bf16 %v823_v28, %v815_v27  ;;  %v829_v35 = vld [vmem:[#allocation12 + $0x980] sm:$0xff]  ;;  %v879_v18 = vld [vmem:[#allocation12 + $0xb10] sm:$0xff] }
 0x1fd   :  { %v7902_v38 = vpack.c.bf16 %v840_v32, %v832_v31  ;;  %v887_v19 = vld [vmem:[#allocation12 + $0xb50] sm:$0xff]  ;;  %v893_v27 = vld [vmem:[#allocation12 + $0xb80] sm:$0xff] }
 0x1fe   :  { %v901_v28 = vld [vmem:[#allocation12 + $0xbc0] sm:$0xff]  ;;  %v895_v31 = vld [vmem:[#allocation12 + $0xb90] sm:$0xff] }
 0x1ff   :  { %7761 = vmatpush1.bf16.msra.mxu1 %v7760_v36  ;;  %7889 = vmatpush1.bf16.msra.mxu0 %v7888_v39  ;;  %v837_v36 = vld [vmem:[#allocation12 + $0x9c0] sm:$0xff]  ;;  %v831_v39 = vld [vmem:[#allocation12 + $0x990] sm:$0xff] }
 0x200   :  { %7763 = vmatprep.subr.bf16.mxu1 %v7762_v43  ;;  %7891 = vmatprep.subr.bf16.mxu0 %v7890_v45  ;;  %v848_v43 = vld [vmem:[#allocation12 + $0xa18] sm:$0xff]  ;;  %v7776_v45 = vpack.c.bf16 %v837_v36, %v829_v35  ;;  %v7904_v46 = vpack.c.bf16 %v839_v40, %v831_v39  ;;  %v903_v32 = vld [vmem:[#allocation12 + $0xbd0] sm:$0xff]  ;;  %v909_v39 = vld [vmem:[#allocation12 + $0xc00] sm:$0xff] }
 0x201   :  { %v912_v35 = vld [vmem:[#allocation12 + $0xc18] sm:$0xff]  ;;  %v917_v40 = vld [vmem:[#allocation12 + $0xc40] sm:$0xff]  ;;  %v943_v9 = vld [vmem:[#allocation12 + $0xd10] sm:$0xff] }
 0x202   :  { %v920_v36 = vld [vmem:[#allocation12 + $0xc58] sm:$0xff]  ;;  %v951_v10 = vld [vmem:[#allocation12 + $0xd50] sm:$0xff] }
 0x295   :  { %v445_v55 = vpop.f32.mrb[0].mxu1  ;;  %v9404_v56 = vpop.f32.mrb[2].mxu0 }
 0x296   :  { %v446_v58 = vadd.f32 %v445_v55, %v362_v52  ;;  %v447_v59 = vpop.f32.mrb[1].mxu1  ;;  %v518_v60 = vpop.f32.mrb[3].mxu0  ;;  %v853_v52 = vld [vmem:[#allocation12 + $0xa40] sm:$0xff]  ;;  %v847_v55 = vld [vmem:[#allocation12 + $0xa10] sm:$0xff] }
 0x297   :  { %v448_v0 = vadd.f32 %v447_v59, %v366_v53  ;;  %v519_v2 = vadd.f32 %v518_v60, %v374_v54  ;;  %v7778_v53 = vpack.c.bf16 %v854_v42, %v846_v41  ;;  %v7906_v54 = vpack.c.bf16 %v856_v44, %v848_v43  ;;  %v870_v59 = vld [vmem:[#allocation12 + $0xac8] sm:$0xff]  ;;  %v864_v60 = vld [vmem:[#allocation12 + $0xa98] sm:$0xff]  ;;  %v911_v43 = vld [vmem:[#allocation12 + $0xc10] sm:$0xff] }
 0x298   :  { %v9408_v11 = vmax.f32 %v446_v58, 0.0  ;;  %v862_v58 = vld [vmem:[#allocation12 + $0xa88] sm:$0xff]  ;;  %v7780_v62 = vpack.c.bf16 %v853_v52, %v845_v51  ;;  %v7908_v63 = vpack.c.bf16 %v855_v57, %v847_v55  ;;  %v7910_v3 = vpack.c.bf16 %v872_v61, %v864_v60  ;;  %v919_v44 = vld [vmem:[#allocation12 + $0xc50] sm:$0xff]  ;;  %v928_v51 = vld [vmem:[#allocation12 + $0xc98] sm:$0xff] }
 0x299   :  { %v9406_v6 = vmax.f32 %v448_v0, 0.0  ;;  %v9412_v20 = vmax.f32 %v519_v2, 0.0  ;;  %v861_v0 = vld [vmem:[#allocation12 + $0xa80] sm:$0xff]  ;;  %v7782_v2 = vpack.c.bf16 %v870_v59, %v862_v58  ;;  %v7922_v42 = vpack.c.bf16 %v920_v36, %v912_v35  ;;  %v936_v52 = vld [vmem:[#allocation12 + $0xcd8] sm:$0xff]  ;;  %v927_v60 = vld [vmem:[#allocation12 + $0xc90] sm:$0xff] }
 0x29a   :  { %v7784_v12 = vpack.c.bf16 %v869_v1, %v861_v0  ;;  %v925_v55 = vld [vmem:[#allocation12 + $0xc80] sm:$0xff]  ;;  %v7926_v59 = vpack.c.bf16 %v936_v52, %v928_v51  ;;  %v935_v61 = vld [vmem:[#allocation12 + $0xcd0] sm:$0xff]  ;;  %v944_v0 = vld [vmem:[#allocation12 + $0xd18] sm:$0xff] }
 0x29b   :  { %1101 = vmatprep.mubr.f32.mxu1 %v9406_v6  ;;  %1243 = vmatprep.mubr.f32.mxu0 %v9406_v6  ;;  %v933_v57 = vld [vmem:[#allocation12 + $0xcc0] sm:$0xff]  ;;  %v952_v1 = vld [vmem:[#allocation12 + $0xd58] sm:$0xff]  ;;  %v975_v35 = vld [vmem:[#allocation12 + $0xe10] sm:$0xff] }
 0x29c   :  { %1102 = vmatmul.mubr.f32.vlgmr.msra.gmra.mrb[2].mxu1 %v9408_v11  ;;  %1244 = vmatmul.mubr.f32.vlgmr.msra.gmra.mrb[4].mxu0 %v9408_v11  ;;  %v983_v36 = vld [vmem:[#allocation12 + $0xe50] sm:$0xff] }
 0x29d   :  { %7765 = vmatpush1.bf16.msra.mxu1 %v7764_v7  ;;  %7893 = vmatpush1.bf16.msra.mxu0 %v7892_v8  ;;  %v878_v7 = vld [vmem:[#allocation12 + $0xb08] sm:$0xff]  ;;  %v991_v51 = vld [vmem:[#allocation12 + $0xe90] sm:$0xff] }
 0x29e   :  { %1172 = vmatprep.mubr.f32.mxu1 %v9412_v20  ;;  %1314 = vmatprep.mubr.f32.mxu0 %v9412_v20  ;;  %v886_v8 = vld [vmem:[#allocation12 + $0xb48] sm:$0xff]  ;;  %v999_v52 = vld [vmem:[#allocation12 + $0xed0] sm:$0xff] }
 0x29f   :  { %7767 = vmatprep.subr.bf16.mxu1 %v7766_v15  ;;  %7895 = vmatprep.subr.bf16.mxu0 %v7894_v16  ;;  %v885_v15 = vld [vmem:[#allocation12 + $0xb40] sm:$0xff]  ;;  %v7786_v16 = vpack.c.bf16 %v886_v8, %v878_v7  ;;  %v7930_v8 = vpack.c.bf16 %v952_v1, %v944_v0  ;;  %v1007_v1 = vld [vmem:[#allocation12 + $0xf10] sm:$0xff] }
 0x2a1   :  { %7769 = vmatpush1.bf16.msra.mxu1 %v7768_v21  ;;  %7897 = vmatpush1.bf16.msra.mxu0 %v7896_v22  ;;  %v894_v21 = vld [vmem:[#allocation12 + $0xb88] sm:$0xff] }
 0x2a2   :  { %7771 = vmatprep.subr.bf16.mxu1 %v7770_v25  ;;  %7899 = vmatprep.subr.bf16.mxu0 %v7898_v26  ;;  %v902_v22 = vld [vmem:[#allocation12 + $0xbc8] sm:$0xff]  ;;  %v7788_v25 = vpack.c.bf16 %v885_v15, %v877_v14  ;;  %v7916_v26 = vpack.c.bf16 %v887_v19, %v879_v18  ;;  %v960_v14 = vld [vmem:[#allocation12 + $0xd98] sm:$0xff]  ;;  %v957_v18 = vld [vmem:[#allocation12 + $0xd80] sm:$0xff] }
 0x2a3   :  { %v7790_v29 = vpack.c.bf16 %v902_v22, %v894_v21  ;;  %v968_v15 = vld [vmem:[#allocation12 + $0xdd8] sm:$0xff]  ;;  %v965_v19 = vld [vmem:[#allocation12 + $0xdc0] sm:$0xff] }
 0x2a4   :  { %v7934_v22 = vpack.c.bf16 %v968_v15, %v960_v14  ;;  %v1023_v15 = vld [vmem:[#allocation12 + $0xf90] sm:$0xff] }
 0x2a5   :  { %7773 = vmatpush1.bf16.msra.mxu1 %v7772_v33  ;;  %7901 = vmatpush1.bf16.msra.mxu0 %v7900_v34  ;;  %v910_v33 = vld [vmem:[#allocation12 + $0xc08] sm:$0xff] }
 0x2a6   :  { %7775 = vmatprep.subr.bf16.mxu1 %v7774_v37  ;;  %7903 = vmatprep.subr.bf16.mxu0 %v7902_v38  ;;  %v918_v34 = vld [vmem:[#allocation12 + $0xc48] sm:$0xff]  ;;  %v7792_v37 = vpack.c.bf16 %v901_v28, %v893_v27  ;;  %v7920_v38 = vpack.c.bf16 %v903_v32, %v895_v31  ;;  %v976_v27 = vld [vmem:[#allocation12 + $0xe18] sm:$0xff]  ;;  %v973_v31 = vld [vmem:[#allocation12 + $0xe00] sm:$0xff] }
 0x2a7   :  { %v7794_v41 = vpack.c.bf16 %v918_v34, %v910_v33  ;;  %v984_v28 = vld [vmem:[#allocation12 + $0xe58] sm:$0xff]  ;;  %v981_v32 = vld [vmem:[#allocation12 + $0xe40] sm:$0xff] }
 0x2a8   :  { %v7938_v34 = vpack.c.bf16 %v984_v28, %v976_v27  ;;  %v537_v27 = vld [vmem:[#allocation12 + $0x60] sm:$0xff]  ;;  %v531_v28 = vld [vmem:[#allocation12 + $0x30] sm:$0xff] }
 0x2a9   :  { %7777 = vmatpush1.bf16.msra.mxu1 %v7776_v45  ;;  %7905 = vmatpush1.bf16.msra.mxu0 %v7904_v46  ;;  %v926_v45 = vld [vmem:[#allocation12 + $0xc88] sm:$0xff] }
 0x2aa   :  { %7779 = vmatprep.subr.bf16.mxu1 %v7778_v53  ;;  %7907 = vmatprep.subr.bf16.mxu0 %v7906_v54  ;;  %v934_v46 = vld [vmem:[#allocation12 + $0xcc8] sm:$0xff]  ;;  %v7796_v53 = vpack.c.bf16 %v917_v40, %v909_v39  ;;  %v7924_v54 = vpack.c.bf16 %v919_v44, %v911_v43  ;;  %v992_v39 = vld [vmem:[#allocation12 + $0xe98] sm:$0xff]  ;;  %v989_v43 = vld [vmem:[#allocation12 + $0xe80] sm:$0xff] }
 0x2ab   :  { %v7798_v58 = vpack.c.bf16 %v934_v46, %v926_v45  ;;  %v1000_v40 = vld [vmem:[#allocation12 + $0xed8] sm:$0xff]  ;;  %v997_v44 = vld [vmem:[#allocation12 + $0xec0] sm:$0xff] }
 0x2ac   :  { %v7942_v46 = vpack.c.bf16 %v1000_v40, %v992_v39 }
 0x2ad   :  { %7781 = vmatpush1.bf16.msra.mxu1 %v7780_v62  ;;  %7909 = vmatpush1.bf16.msra.mxu0 %v7908_v63  ;;  %v942_v62 = vld [vmem:[#allocation12 + $0xd08] sm:$0xff] }
 0x2ae   :  { %7783 = vmatprep.subr.bf16.mxu1 %v7782_v2  ;;  %7911 = vmatprep.subr.bf16.mxu0 %v7910_v3  ;;  %v950_v63 = vld [vmem:[#allocation12 + $0xd48] sm:$0xff]  ;;  %v7800_v2 = vpack.c.bf16 %v933_v57, %v925_v55  ;;  %v7928_v3 = vpack.c.bf16 %v935_v61, %v927_v60  ;;  %v1008_v55 = vld [vmem:[#allocation12 + $0xf18] sm:$0xff]  ;;  %v1005_v60 = vld [vmem:[#allocation12 + $0xf00] sm:$0xff] }
 0x2af   :  { %v7802_v7 = vpack.c.bf16 %v950_v63, %v942_v62  ;;  %v1016_v57 = vld [vmem:[#allocation12 + $0xf58] sm:$0xff]  ;;  %v1013_v61 = vld [vmem:[#allocation12 + $0xf40] sm:$0xff]  ;;  %v369_v62 = vsub.s32 2, %v9388_v47 }
 0x2b0   :  { %v7946_v0 = vpack.c.bf16 %v1016_v57, %v1008_v55  ;;  %v563_v55 = vld [vmem:[#allocation12 + $0x130] sm:$0xff] }
 0x2b1   :  { %7785 = vmatpush1.bf16.msra.mxu1 %v7784_v12  ;;  %7913 = vmatpush1.bf16.msra.mxu0 %v7912_v13  ;;  %v958_v12 = vld [vmem:[#allocation12 + $0xd88] sm:$0xff] }
 0x2b2   :  { %7787 = vmatprep.subr.bf16.mxu1 %v7786_v16  ;;  %7915 = vmatprep.subr.bf16.mxu0 %v7914_v17  ;;  %v966_v13 = vld [vmem:[#allocation12 + $0xdc8] sm:$0xff]  ;;  %v7804_v16 = vpack.c.bf16 %v949_v5, %v941_v4  ;;  %v7932_v17 = vpack.c.bf16 %v951_v10, %v943_v9  ;;  %v1024_v5 = vld [vmem:[#allocation12 + $0xf98] sm:$0xff]  ;;  %v1021_v10 = vld [vmem:[#allocation12 + $0xf80] sm:$0xff] }
 0x2b3   :  { %v7806_v21 = vpack.c.bf16 %v966_v13, %v958_v12  ;;  %v1030_v4 = vld [vmem:[#allocation12 + $0xfc8] sm:$0xff]  ;;  %v1029_v12 = vld [vmem:[#allocation12 + $0xfc0] sm:$0xff]  ;;  %v370_v13 = vrot.slane %v9393_v49, %v369_v62  ;;  %v588_v62 = vld [vmem:[#allocation12 + $0x1f8] sm:$0xff] }
 0x2b5   :  { %7789 = vmatpush1.bf16.msra.mxu1 %v7788_v25  ;;  %7917 = vmatpush1.bf16.msra.mxu0 %v7916_v26  ;;  %v974_v25 = vld [vmem:[#allocation12 + $0xe08] sm:$0xff] }
 0x2b6   :  { %7791 = vmatprep.subr.bf16.mxu1 %v7790_v29  ;;  %7919 = vmatprep.subr.bf16.mxu0 %v7918_v30  ;;  %v982_v26 = vld [vmem:[#allocation12 + $0xe48] sm:$0xff]  ;;  %v7808_v29 = vpack.c.bf16 %v965_v19, %v957_v18  ;;  %v7936_v30 = vpack.c.bf16 %v967_v24, %v959_v23  ;;  %v532_v19 = vld [vmem:[#allocation12 + $0x38] sm:$0xff]  ;;  %v517_v24 = vadd.f32 %v9404_v56, %v370_v13 }
 0x2b7   :  { %v7810_v33 = vpack.c.bf16 %v982_v26, %v974_v25  ;;  %v538_v18 = vld [vmem:[#allocation12 + $0x68] sm:$0xff]  ;;  %v529_v26 = vld [vmem:[#allocation12 + $0x20] sm:$0xff] }
 0x2b9   :  { %7793 = vmatpush1.bf16.msra.mxu1 %v7792_v37  ;;  %7921 = vmatpush1.bf16.msra.mxu0 %v7920_v38  ;;  %v990_v37 = vld [vmem:[#allocation12 + $0xe88] sm:$0xff] }
 0x2ba   :  { %7795 = vmatprep.subr.bf16.mxu1 %v7794_v41  ;;  %7923 = vmatprep.subr.bf16.mxu0 %v7922_v42  ;;  %v998_v38 = vld [vmem:[#allocation12 + $0xec8] sm:$0xff]  ;;  %v7812_v41 = vpack.c.bf16 %v981_v32, %v973_v31  ;;  %v7940_v42 = vpack.c.bf16 %v983_v36, %v975_v35  ;;  %v548_v32 = vld [vmem:[#allocation12 + $0xb8] sm:$0xff]  ;;  %v9421_v35 = vmax.f32 %v517_v24, 0.0  ;;  %v545_v36 = vld [vmem:[#allocation12 + $0xa0] sm:$0xff] }
 0x2bb   :  { %v7814_v45 = vpack.c.bf16 %v998_v38, %v990_v37  ;;  %v554_v31 = vld [vmem:[#allocation12 + $0xe8] sm:$0xff]  ;;  %v553_v37 = vld [vmem:[#allocation12 + $0xe0] sm:$0xff]  ;;  %v547_v38 = vld [vmem:[#allocation12 + $0xb0] sm:$0xff] }
 0x2bd   :  { %7797 = vmatpush1.bf16.msra.mxu1 %v7796_v53  ;;  %7925 = vmatpush1.bf16.msra.mxu0 %v7924_v54  ;;  %v1006_v53 = vld [vmem:[#allocation12 + $0xf08] sm:$0xff] }
 0x2be   :  { %7799 = vmatprep.subr.bf16.mxu1 %v7798_v58  ;;  %7927 = vmatprep.subr.bf16.mxu0 %v7926_v59  ;;  %v1014_v54 = vld [vmem:[#allocation12 + $0xf48] sm:$0xff]  ;;  %v7816_v58 = vpack.c.bf16 %v997_v44, %v989_v43  ;;  %v7944_v59 = vpack.c.bf16 %v999_v52, %v991_v51  ;;  %v564_v44 = vld [vmem:[#allocation12 + $0x138] sm:$0xff] }
 0x2bf   :  { %v7818_v63 = vpack.c.bf16 %v1014_v54, %v1006_v53  ;;  %v570_v43 = vld [vmem:[#allocation12 + $0x168] sm:$0xff]  ;;  %v561_v53 = vld [vmem:[#allocation12 + $0x120] sm:$0xff] }
 0x2c0   :  { %v569_v54 = vld [vmem:[#allocation12 + $0x160] sm:$0xff] }
 0x2c1   :  { %7801 = vmatpush1.bf16.msra.mxu1 %v7800_v2  ;;  %7929 = vmatpush1.bf16.msra.mxu0 %v7928_v3  ;;  %v1015_v2 = vld [vmem:[#allocation12 + $0xf50] sm:$0xff]  ;;  %v1022_v3 = vld [vmem:[#allocation12 + $0xf88] sm:$0xff] }
 0x2c2   :  { %7803 = vmatprep.subr.bf16.mxu1 %v7802_v7  ;;  %7931 = vmatprep.subr.bf16.mxu0 %v7930_v8  ;;  %v1032_v7 = vld [vmem:[#allocation12 + $0xfd8] sm:$0xff]  ;;  %v7820_v8 = vpack.c.bf16 %v1013_v61, %v1005_v60  ;;  %v7948_v9 = vpack.c.bf16 %v1015_v2, %v1007_v1  ;;  %v7822_v47 = vpack.c.bf16 %v1030_v4, %v1022_v3  ;;  %v586_v60 = vld [vmem:[#allocation12 + $0x1e8] sm:$0xff]  ;;  %v585_v2 = vld [vmem:[#allocation12 + $0x1e0] sm:$0xff] }
 0x2c3   :  { %v7950_v14 = vpack.c.bf16 %v1032_v7, %v1024_v5  ;;  %v580_v61 = vld [vmem:[#allocation12 + $0x1b8] sm:$0xff]  ;;  %v579_v3 = vld [vmem:[#allocation12 + $0x1b0] sm:$0xff]  ;;  %v594_v7 = vld [vmem:[#allocation12 + $0x228] sm:$0xff] }
 0x2c4   :  { %v8094_v4 = vpack.c.bf16 %v588_v62, %v580_v61  ;;  %v587_v5 = vld [vmem:[#allocation12 + $0x1f0] sm:$0xff]  ;;  %v666_v61 = vld [vmem:[#allocation12 + $0x468] sm:$0xff]  ;;  %v660_v62 = vld [vmem:[#allocation12 + $0x438] sm:$0xff] }
 0x2c5   :  { %7805 = vmatpush1.bf16.msra.mxu1 %v7804_v16  ;;  %7933 = vmatpush1.bf16.msra.mxu0 %v7932_v17  ;;  %v1031_v16 = vld [vmem:[#allocation12 + $0xfd0] sm:$0xff]  ;;  %v530_v17 = vld [vmem:[#allocation12 + $0x28] sm:$0xff]  ;;  %v8096_v13 = vpack.c.bf16 %v587_v5, %v579_v3  ;;  %v665_v3 = vld [vmem:[#allocation12 + $0x460] sm:$0xff] }
 0x2c6   :  { %7807 = vmatprep.subr.bf16.mxu1 %v7806_v21  ;;  %7935 = vmatprep.subr.bf16.mxu0 %v7934_v22  ;;  %v540_v21 = vld [vmem:[#allocation12 + $0x78] sm:$0xff]  ;;  %v7824_v22 = vpack.c.bf16 %v1029_v12, %v1021_v10  ;;  %v7952_v23 = vpack.c.bf16 %v1031_v16, %v1023_v15  ;;  %v7954_v25 = vpack.c.bf16 %v538_v18, %v530_v17  ;;  %v601_v15 = vld [vmem:[#allocation12 + $0x260] sm:$0xff]  ;;  %v595_v16 = vld [vmem:[#allocation12 + $0x230] sm:$0xff] }
 0x2c7   :  { %v8082_v49 = vpack.c.bf16 %v540_v21, %v532_v19  ;;  %v604_v10 = vld [vmem:[#allocation12 + $0x278] sm:$0xff]  ;;  %v603_v18 = vld [vmem:[#allocation12 + $0x270] sm:$0xff]  ;;  %v610_v19 = vld [vmem:[#allocation12 + $0x2a8] sm:$0xff] }
 0x2c8   :  { %v618_v21 = vld [vmem:[#allocation12 + $0x2e8] sm:$0xff] }
 0x2c9   :  { %7809 = vmatpush1.bf16.msra.mxu1 %v7808_v29  ;;  %7937 = vmatpush1.bf16.msra.mxu0 %v7936_v30  ;;  %v539_v29 = vld [vmem:[#allocation12 + $0x70] sm:$0xff]  ;;  %v546_v30 = vld [vmem:[#allocation12 + $0xa8] sm:$0xff] }
 0x2ca   :  { %7811 = vmatprep.subr.bf16.mxu1 %v7810_v33  ;;  %7939 = vmatprep.subr.bf16.mxu0 %v7938_v34  ;;  %v556_v33 = vld [vmem:[#allocation12 + $0xf8] sm:$0xff]  ;;  %v7956_v34 = vpack.c.bf16 %v537_v27, %v529_v26  ;;  %v8084_v56 = vpack.c.bf16 %v539_v29, %v531_v28  ;;  %v7958_v39 = vpack.c.bf16 %v554_v31, %v546_v30  ;;  %v609_v26 = vld [vmem:[#allocation12 + $0x2a0] sm:$0xff]  ;;  %v611_v28 = vld [vmem:[#allocation12 + $0x2b0] sm:$0xff] }
 0x2cb   :  { %v8086_v40 = vpack.c.bf16 %v556_v33, %v548_v32  ;;  %v617_v27 = vld [vmem:[#allocation12 + $0x2e0] sm:$0xff]  ;;  %v619_v30 = vld [vmem:[#allocation12 + $0x2f0] sm:$0xff]  ;;  %v626_v31 = vld [vmem:[#allocation12 + $0x328] sm:$0xff] }
 0x2cc   :  { %v634_v32 = vld [vmem:[#allocation12 + $0x368] sm:$0xff]  ;;  %v628_v33 = vld [vmem:[#allocation12 + $0x338] sm:$0xff] }
 0x2cd   :  { %7813 = vmatpush1.bf16.msra.mxu1 %v7812_v41  ;;  %7941 = vmatpush1.bf16.msra.mxu0 %v7940_v42  ;;  %v555_v41 = vld [vmem:[#allocation12 + $0xf0] sm:$0xff]  ;;  %v562_v42 = vld [vmem:[#allocation12 + $0x128] sm:$0xff] }
 0x2ce   :  { %7815 = vmatprep.subr.bf16.mxu1 %v7814_v45  ;;  %7943 = vmatprep.subr.bf16.mxu0 %v7942_v46  ;;  %v572_v45 = vld [vmem:[#allocation12 + $0x178] sm:$0xff]  ;;  %v7960_v46 = vpack.c.bf16 %v553_v37, %v545_v36  ;;  %v8088_v51 = vpack.c.bf16 %v555_v41, %v547_v38  ;;  %v7962_v52 = vpack.c.bf16 %v570_v43, %v562_v42  ;;  %v625_v38 = vld [vmem:[#allocation12 + $0x320] sm:$0xff]  ;;  %v635_v42 = vld [vmem:[#allocation12 + $0x370] sm:$0xff] }
 0x2cf   :  { %v8090_v57 = vpack.c.bf16 %v572_v45, %v564_v44  ;;  %v8104_v36 = vpack.c.bf16 %v619_v30, %v611_v28  ;;  %v7978_v37 = vpack.c.bf16 %v634_v32, %v626_v31  ;;  %v642_v43 = vld [vmem:[#allocation12 + $0x3a8] sm:$0xff]  ;;  %v644_v45 = vld [vmem:[#allocation12 + $0x3b8] sm:$0xff]  ;;  %v697_v28 = vld [vmem:[#allocation12 + $0x560] sm:$0xff] }
 0x2d0   :  { %v650_v44 = vld [vmem:[#allocation12 + $0x3e8] sm:$0xff]  ;;  %v699_v31 = vld [vmem:[#allocation12 + $0x570] sm:$0xff] }
 0x2d1   :  { %7817 = vmatpush1.bf16.msra.mxu1 %v7816_v58  ;;  %7945 = vmatpush1.bf16.msra.mxu0 %v7944_v59  ;;  %v571_v58 = vld [vmem:[#allocation12 + $0x170] sm:$0xff]  ;;  %v578_v59 = vld [vmem:[#allocation12 + $0x1a8] sm:$0xff] }
 0x2d2   :  { %7819 = vmatprep.subr.bf16.mxu1 %v7818_v63  ;;  %7947 = vmatprep.subr.bf16.mxu0 %v7946_v0  ;;  %v7964_v63 = vpack.c.bf16 %v569_v54, %v561_v53  ;;  %v8092_v0 = vpack.c.bf16 %v571_v58, %v563_v55  ;;  %v7966_v1 = vpack.c.bf16 %v586_v60, %v578_v59  ;;  %v641_v54 = vld [vmem:[#allocation12 + $0x3a0] sm:$0xff]  ;;  %v651_v59 = vld [vmem:[#allocation12 + $0x3f0] sm:$0xff]  ;;  %v658_v60 = vld [vmem:[#allocation12 + $0x428] sm:$0xff] }
 0x2d3   :  { %v7982_v53 = vpack.c.bf16 %v650_v44, %v642_v43  ;;  %v649_v55 = vld [vmem:[#allocation12 + $0x3e0] sm:$0xff]  ;;  %v706_v32 = vld [vmem:[#allocation12 + $0x5a8] sm:$0xff]  ;;  %v715_v43 = vld [vmem:[#allocation12 + $0x5f0] sm:$0xff] }
 0x2d4   :  { %v722_v44 = vld [vmem:[#allocation12 + $0x628] sm:$0xff] }
 0x2d5   :  { %7821 = vmatpush1.bf16.msra.mxu1 %v7820_v8  ;;  %7949 = vmatpush1.bf16.msra.mxu0 %v7948_v9  ;;  %v602_v8 = vld [vmem:[#allocation12 + $0x268] sm:$0xff]  ;;  %v596_v9 = vld [vmem:[#allocation12 + $0x238] sm:$0xff] }
 0x2d6   :  { %7823 = vmatprep.subr.bf16.mxu1 %v7822_v47  ;;  %7951 = vmatprep.subr.bf16.mxu0 %v7950_v14  ;;  %v7970_v47 = vpack.c.bf16 %v602_v8, %v594_v7  ;;  %v593_v14 = vld [vmem:[#allocation12 + $0x220] sm:$0xff]  ;;  %v8098_v17 = vpack.c.bf16 %v604_v10, %v596_v9  ;;  %v667_v7 = vld [vmem:[#allocation12 + $0x470] sm:$0xff]  ;;  %v674_v8 = vld [vmem:[#allocation12 + $0x4a8] sm:$0xff] }
 0x2d7   :  { %v7972_v24 = vpack.c.bf16 %v601_v15, %v593_v14  ;;  %v682_v9 = vld [vmem:[#allocation12 + $0x4e8] sm:$0xff]  ;;  %v676_v10 = vld [vmem:[#allocation12 + $0x4b8] sm:$0xff]  ;;  %v673_v15 = vld [vmem:[#allocation12 + $0x4a0] sm:$0xff] }
 0x2d8   :  { %v7990_v14 = vpack.c.bf16 %v682_v9, %v674_v8  ;;  %v747_v8 = vld [vmem:[#allocation12 + $0x6f0] sm:$0xff]  ;;  %v754_v9 = vld [vmem:[#allocation12 + $0x728] sm:$0xff] }
 0x2d9   :  { %7825 = vmatpush1.bf16.msra.mxu1 %v7824_v22  ;;  %7953 = vmatpush1.bf16.msra.mxu0 %v7952_v23  ;;  %v612_v22 = vld [vmem:[#allocation12 + $0x2b8] sm:$0xff] }
 0x2da   :  { %7955 = vmatprep.subr.bf16.mxu1 %v7954_v25  ;;  %8083 = vmatprep.subr.bf16.mxu0 %v8082_v49  ;;  %v620_v23 = vld [vmem:[#allocation12 + $0x2f8] sm:$0xff]  ;;  %v8100_v25 = vpack.c.bf16 %v603_v18, %v595_v16  ;;  %v7974_v49 = vpack.c.bf16 %v618_v21, %v610_v19  ;;  %v681_v16 = vld [vmem:[#allocation12 + $0x4e0] sm:$0xff]  ;;  %v683_v19 = vld [vmem:[#allocation12 + $0x4f0] sm:$0xff] }
 0x2db   :  { %v8102_v29 = vpack.c.bf16 %v620_v23, %v612_v22  ;;  %v690_v21 = vld [vmem:[#allocation12 + $0x528] sm:$0xff]  ;;  %v692_v23 = vld [vmem:[#allocation12 + $0x538] sm:$0xff] }
 0x2dc   :  { %1173 = vmatmul.mubr.f32.vlgmr.msra.gmra.mrb[2].mxu1 %v9421_v35  ;;  %1315 = vmatmul.mubr.f32.vlgmr.msra.gmra.mrb[4].mxu0 %v9421_v35  ;;  %v698_v22 = vld [vmem:[#allocation12 + $0x568] sm:$0xff] }
 0x2dd   :  { %7957 = vmatpush1.bf16.msra.mxu1 %v7956_v34  ;;  %1385 = vmatprep.mubr.f32.mxu1 %v9406_v6  ;;  %v636_v34 = vld [vmem:[#allocation12 + $0x378] sm:$0xff] }
 0x2de   :  { %8085 = vmatpush1.bf16.msra.mxu0 %v8084_v56  ;;  %1527 = vmatprep.mubr.f32.mxu0 %v9406_v6  ;;  %v577_v6 = vld [vmem:[#allocation12 + $0x1a0] sm:$0xff]  ;;  %v7976_v56 = vpack.c.bf16 %v617_v27, %v609_v26  ;;  %v8106_v41 = vpack.c.bf16 %v636_v34, %v628_v33  ;;  %v7994_v26 = vpack.c.bf16 %v698_v22, %v690_v21  ;;  %v714_v33 = vld [vmem:[#allocation12 + $0x5e8] sm:$0xff]  ;;  %v708_v34 = vld [vmem:[#allocation12 + $0x5b8] sm:$0xff] }
 0x2df   :  { %7959 = vmatprep.subr.bf16.mxu1 %v7958_v39  ;;  %8087 = vmatprep.subr.bf16.mxu0 %v8086_v40  ;;  %v7968_v12 = vpack.c.bf16 %v585_v2, %v577_v6  ;;  %v633_v39 = vld [vmem:[#allocation12 + $0x360] sm:$0xff]  ;;  %v627_v40 = vld [vmem:[#allocation12 + $0x330] sm:$0xff]  ;;  %v7986_v6 = vpack.c.bf16 %v666_v61, %v658_v60  ;;  %v738_v61 = vld [vmem:[#allocation12 + $0x6a8] sm:$0xff] }
 0x2e0   :  { %v657_v2 = vld [vmem:[#allocation12 + $0x420] sm:$0xff]  ;;  %v731_v60 = vld [vmem:[#allocation12 + $0x670] sm:$0xff]  ;;  %v770_v22 = vld [vmem:[#allocation12 + $0x7a8] sm:$0xff] }
 0x2e1   :  { %7961 = vmatpush1.bf16.msra.mxu1 %v7960_v46  ;;  %v652_v46 = vld [vmem:[#allocation12 + $0x3f8] sm:$0xff]  ;;  %v689_v27 = vld [vmem:[#allocation12 + $0x520] sm:$0xff]  ;;  %v763_v21 = vld [vmem:[#allocation12 + $0x770] sm:$0xff] }
 0x2e2   :  { %8089 = vmatpush1.bf16.msra.mxu0 %v8088_v51  ;;  %7963 = vmatprep.subr.bf16.mxu1 %v7962_v52  ;;  %v7980_v51 = vpack.c.bf16 %v633_v39, %v625_v38  ;;  %v8108_v52 = vpack.c.bf16 %v635_v42, %v627_v40  ;;  %v8110_v58 = vpack.c.bf16 %v652_v46, %v644_v45  ;;  %v705_v39 = vld [vmem:[#allocation12 + $0x5a0] sm:$0xff]  ;;  %v730_v45 = vld [vmem:[#allocation12 + $0x668] sm:$0xff]  ;;  %v724_v46 = vld [vmem:[#allocation12 + $0x638] sm:$0xff] }
 0x2e3   :  { %8091 = vmatprep.subr.bf16.mxu0 %v8090_v57  ;;  %v643_v57 = vld [vmem:[#allocation12 + $0x3b0] sm:$0xff]  ;;  %v7998_v38 = vpack.c.bf16 %v714_v33, %v706_v32  ;;  %v713_v40 = vld [vmem:[#allocation12 + $0x5e0] sm:$0xff]  ;;  %v786_v33 = vld [vmem:[#allocation12 + $0x828] sm:$0xff] }
 0x2e4   :  { %v779_v32 = vld [vmem:[#allocation12 + $0x7f0] sm:$0xff] }
 0x2e5   :  { %7965 = vmatpush1.bf16.msra.mxu1 %v7964_v63  ;;  %v668_v63 = vld [vmem:[#allocation12 + $0x478] sm:$0xff] }
 0x2e6   :  { %8093 = vmatpush1.bf16.msra.mxu0 %v8092_v0  ;;  %7967 = vmatprep.subr.bf16.mxu1 %v7966_v1  ;;  %v7984_v0 = vpack.c.bf16 %v649_v55, %v641_v54  ;;  %v8112_v1 = vpack.c.bf16 %v651_v59, %v643_v57  ;;  %v8114_v5 = vpack.c.bf16 %v668_v63, %v660_v62  ;;  %v721_v55 = vld [vmem:[#allocation12 + $0x620] sm:$0xff]  ;;  %v746_v62 = vld [vmem:[#allocation12 + $0x6e8] sm:$0xff]  ;;  %v740_v63 = vld [vmem:[#allocation12 + $0x6b8] sm:$0xff] }
 0x2e7   :  { %8095 = vmatprep.subr.bf16.mxu0 %v8094_v4  ;;  %v659_v4 = vld [vmem:[#allocation12 + $0x430] sm:$0xff]  ;;  %v8002_v54 = vpack.c.bf16 %v730_v45, %v722_v44  ;;  %v729_v57 = vld [vmem:[#allocation12 + $0x660] sm:$0xff]  ;;  %v802_v45 = vld [vmem:[#allocation12 + $0x8a8] sm:$0xff] }
 0x2e8   :  { %v795_v44 = vld [vmem:[#allocation12 + $0x870] sm:$0xff] }
 0x2e9   :  { %7969 = vmatpush1.bf16.msra.mxu1 %v7968_v12  ;;  %v684_v12 = vld [vmem:[#allocation12 + $0x4f8] sm:$0xff] }
 0x2ea   :  { %8097 = vmatpush1.bf16.msra.mxu0 %v8096_v13  ;;  %7971 = vmatprep.subr.bf16.mxu1 %v7970_v47  ;;  %v7988_v13 = vpack.c.bf16 %v665_v3, %v657_v2  ;;  %v8116_v47 = vpack.c.bf16 %v667_v7, %v659_v4  ;;  %v8118_v18 = vpack.c.bf16 %v684_v12, %v676_v10  ;;  %v737_v3 = vld [vmem:[#allocation12 + $0x6a0] sm:$0xff]  ;;  %v762_v10 = vld [vmem:[#allocation12 + $0x768] sm:$0xff]  ;;  %v756_v12 = vld [vmem:[#allocation12 + $0x738] sm:$0xff] }
 0x2eb   :  { %8099 = vmatprep.subr.bf16.mxu0 %v8098_v17  ;;  %v675_v17 = vld [vmem:[#allocation12 + $0x4b0] sm:$0xff]  ;;  %v8006_v2 = vpack.c.bf16 %v746_v62, %v738_v61  ;;  %v745_v4 = vld [vmem:[#allocation12 + $0x6e0] sm:$0xff]  ;;  %v818_v61 = vld [vmem:[#allocation12 + $0x928] sm:$0xff] }
 0x2ec   :  { %v826_v62 = vld [vmem:[#allocation12 + $0x968] sm:$0xff] }
 0x2ed   :  { %7973 = vmatpush1.bf16.msra.mxu1 %v7972_v24  ;;  %v700_v24 = vld [vmem:[#allocation12 + $0x578] sm:$0xff] }
 0x2ee   :  { %8101 = vmatpush1.bf16.msra.mxu0 %v8100_v25  ;;  %7975 = vmatprep.subr.bf16.mxu1 %v7974_v49  ;;  %v7992_v25 = vpack.c.bf16 %v681_v16, %v673_v15  ;;  %v8120_v49 = vpack.c.bf16 %v683_v19, %v675_v17  ;;  %v8122_v30 = vpack.c.bf16 %v700_v24, %v692_v23  ;;  %v753_v16 = vld [vmem:[#allocation12 + $0x720] sm:$0xff]  ;;  %v778_v23 = vld [vmem:[#allocation12 + $0x7e8] sm:$0xff]  ;;  %v772_v24 = vld [vmem:[#allocation12 + $0x7b8] sm:$0xff] }
 0x2ef   :  { %8103 = vmatprep.subr.bf16.mxu0 %v8102_v29  ;;  %v691_v29 = vld [vmem:[#allocation12 + $0x530] sm:$0xff]  ;;  %v8010_v15 = vpack.c.bf16 %v762_v10, %v754_v9  ;;  %v761_v17 = vld [vmem:[#allocation12 + $0x760] sm:$0xff]  ;;  %v834_v10 = vld [vmem:[#allocation12 + $0x9a8] sm:$0xff] }
 0x2f0   :  { %v827_v9 = vld [vmem:[#allocation12 + $0x970] sm:$0xff] }
 0x2f1   :  { %7977 = vmatpush1.bf16.msra.mxu1 %v7976_v56  ;;  %v716_v56 = vld [vmem:[#allocation12 + $0x5f8] sm:$0xff] }
 0x2f2   :  { %8105 = vmatpush1.bf16.msra.mxu0 %v8104_v36  ;;  %7979 = vmatprep.subr.bf16.mxu1 %v7978_v37  ;;  %v7996_v36 = vpack.c.bf16 %v697_v28, %v689_v27  ;;  %v8124_v37 = vpack.c.bf16 %v699_v31, %v691_v29  ;;  %v8126_v42 = vpack.c.bf16 %v716_v56, %v708_v34  ;;  %v769_v28 = vld [vmem:[#allocation12 + $0x7a0] sm:$0xff]  ;;  %v794_v34 = vld [vmem:[#allocation12 + $0x868] sm:$0xff]  ;;  %v788_v56 = vld [vmem:[#allocation12 + $0x838] sm:$0xff] }
 0x2f3   :  { %8107 = vmatprep.subr.bf16.mxu0 %v8106_v41  ;;  %v707_v41 = vld [vmem:[#allocation12 + $0x5b0] sm:$0xff]  ;;  %v8014_v27 = vpack.c.bf16 %v778_v23, %v770_v22  ;;  %v777_v29 = vld [vmem:[#allocation12 + $0x7e0] sm:$0xff]  ;;  %v858_v22 = vld [vmem:[#allocation12 + $0xa68] sm:$0xff] }
 0x2f4   :  { %v852_v23 = vld [vmem:[#allocation12 + $0xa38] sm:$0xff] }
 0x2f5   :  { %7981 = vmatpush1.bf16.msra.mxu1 %v7980_v51  ;;  %v732_v51 = vld [vmem:[#allocation12 + $0x678] sm:$0xff] }
 0x2f6   :  { %8109 = vmatpush1.bf16.msra.mxu0 %v8108_v52  ;;  %7983 = vmatprep.subr.bf16.mxu1 %v7982_v53  ;;  %v8000_v52 = vpack.c.bf16 %v713_v40, %v705_v39  ;;  %v8128_v53 = vpack.c.bf16 %v715_v43, %v707_v41  ;;  %v8130_v59 = vpack.c.bf16 %v732_v51, %v724_v46  ;;  %v785_v40 = vld [vmem:[#allocation12 + $0x820] sm:$0xff]  ;;  %v787_v43 = vld [vmem:[#allocation12 + $0x830] sm:$0xff]  ;;  %v810_v46 = vld [vmem:[#allocation12 + $0x8e8] sm:$0xff] }
 0x2f7   :  { %8111 = vmatprep.subr.bf16.mxu0 %v8110_v58  ;;  %v723_v58 = vld [vmem:[#allocation12 + $0x630] sm:$0xff]  ;;  %v8018_v39 = vpack.c.bf16 %v794_v34, %v786_v33  ;;  %v793_v41 = vld [vmem:[#allocation12 + $0x860] sm:$0xff]  ;;  %v874_v33 = vld [vmem:[#allocation12 + $0xae8] sm:$0xff] }
 0x2f8   :  { %v8020_v51 = vpack.c.bf16 %v793_v41, %v785_v40  ;;  %v868_v34 = vld [vmem:[#allocation12 + $0xab8] sm:$0xff]  ;;  %v873_v40 = vld [vmem:[#allocation12 + $0xae0] sm:$0xff]  ;;  %v867_v41 = vld [vmem:[#allocation12 + $0xab0] sm:$0xff] }
 0x2f9   :  { %7985 = vmatpush1.bf16.msra.mxu1 %v7984_v0  ;;  %v748_v0 = vld [vmem:[#allocation12 + $0x6f8] sm:$0xff] }
 0x2fa   :  { %8113 = vmatpush1.bf16.msra.mxu0 %v8112_v1  ;;  %7987 = vmatprep.subr.bf16.mxu1 %v7986_v6  ;;  %v8004_v1 = vpack.c.bf16 %v729_v57, %v721_v55  ;;  %v8132_v6 = vpack.c.bf16 %v731_v60, %v723_v58  ;;  %v8134_v7 = vpack.c.bf16 %v748_v0, %v740_v63  ;;  %v801_v55 = vld [vmem:[#allocation12 + $0x8a0] sm:$0xff]  ;;  %v803_v58 = vld [vmem:[#allocation12 + $0x8b0] sm:$0xff]  ;;  %v820_v0 = vld [vmem:[#allocation12 + $0x938] sm:$0xff] }
 0x2fb   :  { %8115 = vmatprep.subr.bf16.mxu0 %v8114_v5  ;;  %v739_v5 = vld [vmem:[#allocation12 + $0x6b0] sm:$0xff]  ;;  %v809_v57 = vld [vmem:[#allocation12 + $0x8e0] sm:$0xff] }
 0x2fc   :  { %v811_v60 = vld [vmem:[#allocation12 + $0x8f0] sm:$0xff] }
 0x2fd   :  { %7989 = vmatpush1.bf16.msra.mxu1 %v7988_v13  ;;  %v764_v13 = vld [vmem:[#allocation12 + $0x778] sm:$0xff] }
 0x2fe   :  { %8117 = vmatpush1.bf16.msra.mxu0 %v8116_v47  ;;  %7991 = vmatprep.subr.bf16.mxu1 %v7990_v14  ;;  %v8008_v47 = vpack.c.bf16 %v745_v4, %v737_v3  ;;  %v8136_v14 = vpack.c.bf16 %v747_v8, %v739_v5  ;;  %v8138_v19 = vpack.c.bf16 %v764_v13, %v756_v12  ;;  %v817_v4 = vld [vmem:[#allocation12 + $0x920] sm:$0xff]  ;;  %v842_v12 = vld [vmem:[#allocation12 + $0x9e8] sm:$0xff]  ;;  %v836_v13 = vld [vmem:[#allocation12 + $0x9b8] sm:$0xff] }
 0x2ff   :  { %8119 = vmatprep.subr.bf16.mxu0 %v8118_v18  ;;  %v755_v18 = vld [vmem:[#allocation12 + $0x730] sm:$0xff]  ;;  %v8026_v3 = vpack.c.bf16 %v826_v62, %v818_v61  ;;  %v825_v5 = vld [vmem:[#allocation12 + $0x960] sm:$0xff]  ;;  %v898_v61 = vld [vmem:[#allocation12 + $0xba8] sm:$0xff] }
 0x300   :  { %v906_v62 = vld [vmem:[#allocation12 + $0xbe8] sm:$0xff] }
 0x301   :  { %7993 = vmatpush1.bf16.msra.mxu1 %v7992_v25  ;;  %v780_v25 = vld [vmem:[#allocation12 + $0x7f8] sm:$0xff] }
 0x302   :  { %8121 = vmatpush1.bf16.msra.mxu0 %v8120_v49  ;;  %7995 = vmatprep.subr.bf16.mxu1 %v7994_v26  ;;  %v8012_v49 = vpack.c.bf16 %v761_v17, %v753_v16  ;;  %v8140_v26 = vpack.c.bf16 %v763_v21, %v755_v18  ;;  %v8142_v31 = vpack.c.bf16 %v780_v25, %v772_v24  ;;  %v833_v16 = vld [vmem:[#allocation12 + $0x9a0] sm:$0xff]  ;;  %v835_v18 = vld [vmem:[#allocation12 + $0x9b0] sm:$0xff]  ;;  %v850_v21 = vld [vmem:[#allocation12 + $0xa28] sm:$0xff] }
 0x303   :  { %8123 = vmatprep.subr.bf16.mxu0 %v8122_v30  ;;  %v771_v30 = vld [vmem:[#allocation12 + $0x7b0] sm:$0xff]  ;;  %v841_v17 = vld [vmem:[#allocation12 + $0x9e0] sm:$0xff]  ;;  %v860_v24 = vld [vmem:[#allocation12 + $0xa78] sm:$0xff] }
 0x304   :  { %v8032_v25 = vpack.c.bf16 %v841_v17, %v833_v16  ;;  %v921_v16 = vld [vmem:[#allocation12 + $0xc60] sm:$0xff]  ;;  %v915_v17 = vld [vmem:[#allocation12 + $0xc30] sm:$0xff] }
 0x305   :  { %7997 = vmatpush1.bf16.msra.mxu1 %v7996_v36  ;;  %v796_v36 = vld [vmem:[#allocation12 + $0x878] sm:$0xff] }
 0x306   :  { %8125 = vmatpush1.bf16.msra.mxu0 %v8124_v37  ;;  %7999 = vmatprep.subr.bf16.mxu1 %v7998_v38  ;;  %v8016_v37 = vpack.c.bf16 %v777_v29, %v769_v28  ;;  %v8144_v38 = vpack.c.bf16 %v779_v32, %v771_v30  ;;  %v857_v28 = vld [vmem:[#allocation12 + $0xa60] sm:$0xff]  ;;  %v851_v29 = vld [vmem:[#allocation12 + $0xa30] sm:$0xff]  ;;  %v8162_v30 = vpack.c.bf16 %v860_v24, %v852_v23  ;;  %v866_v32 = vld [vmem:[#allocation12 + $0xaa8] sm:$0xff] }
 0x307   :  { %8127 = vmatprep.subr.bf16.mxu0 %v8126_v42  ;;  %v8146_v42 = vpack.c.bf16 %v796_v36, %v788_v56  ;;  %v876_v56 = vld [vmem:[#allocation12 + $0xaf8] sm:$0xff] }
 0x308   :  { %v940_v23 = vld [vmem:[#allocation12 + $0xcf8] sm:$0xff] }
 0x309   :  { %8001 = vmatpush1.bf16.msra.mxu1 %v8000_v52  ;;  %v804_v52 = vld [vmem:[#allocation12 + $0x8b8] sm:$0xff] }
 0x30a   :  { %8129 = vmatpush1.bf16.msra.mxu0 %v8128_v53  ;;  %8003 = vmatprep.subr.bf16.mxu1 %v8002_v54  ;;  %v812_v53 = vld [vmem:[#allocation12 + $0x8f8] sm:$0xff]  ;;  %v8148_v54 = vpack.c.bf16 %v795_v44, %v787_v43  ;;  %v875_v43 = vld [vmem:[#allocation12 + $0xaf0] sm:$0xff]  ;;  %v882_v44 = vld [vmem:[#allocation12 + $0xb28] sm:$0xff] }
 0x30b   :  { %8131 = vmatprep.subr.bf16.mxu0 %v8130_v59  ;;  %v8022_v59 = vpack.c.bf16 %v810_v46, %v802_v45  ;;  %v8150_v63 = vpack.c.bf16 %v812_v53, %v804_v52  ;;  %v890_v45 = vld [vmem:[#allocation12 + $0xb68] sm:$0xff]  ;;  %v884_v46 = vld [vmem:[#allocation12 + $0xb38] sm:$0xff]  ;;  %v8168_v53 = vpack.c.bf16 %v875_v43, %v867_v41 }
 0x30c   :  { %v962_v43 = vld [vmem:[#allocation12 + $0xda8] sm:$0xff] }
 0x30d   :  { %8005 = vmatpush1.bf16.msra.mxu1 %v8004_v1  ;;  %v828_v1 = vld [vmem:[#allocation12 + $0x978] sm:$0xff] }
 0x30e   :  { %8133 = vmatpush1.bf16.msra.mxu0 %v8132_v6  ;;  %8007 = vmatprep.subr.bf16.mxu1 %v8006_v2  ;;  %v8024_v6 = vpack.c.bf16 %v809_v57, %v801_v55  ;;  %v8152_v2 = vpack.c.bf16 %v811_v60, %v803_v58  ;;  %v8154_v8 = vpack.c.bf16 %v828_v1, %v820_v0  ;;  %v881_v55 = vld [vmem:[#allocation12 + $0xb20] sm:$0xff]  ;;  %v883_v58 = vld [vmem:[#allocation12 + $0xb30] sm:$0xff]  ;;  %v908_v0 = vld [vmem:[#allocation12 + $0xbf8] sm:$0xff] }
 0x30f   :  { %8135 = vmatprep.subr.bf16.mxu0 %v8134_v7  ;;  %v819_v7 = vld [vmem:[#allocation12 + $0x930] sm:$0xff]  ;;  %v889_v57 = vld [vmem:[#allocation12 + $0xb60] sm:$0xff] }
 0x310   :  { %v891_v60 = vld [vmem:[#allocation12 + $0xb70] sm:$0xff]  ;;  %v8044_v1 = vpack.c.bf16 %v889_v57, %v881_v55  ;;  %v969_v55 = vld [vmem:[#allocation12 + $0xde0] sm:$0xff] }
 0x311   :  { %8009 = vmatpush1.bf16.msra.mxu1 %v8008_v47  ;;  %v8028_v47 = vpack.c.bf16 %v825_v5, %v817_v4  ;;  %v905_v4 = vld [vmem:[#allocation12 + $0xbe0] sm:$0xff]  ;;  %v899_v5 = vld [vmem:[#allocation12 + $0xbb0] sm:$0xff] }
 0x312   :  { %8137 = vmatpush1.bf16.msra.mxu0 %v8136_v14  ;;  %8011 = vmatprep.subr.bf16.mxu1 %v8010_v15  ;;  %v8156_v14 = vpack.c.bf16 %v827_v9, %v819_v7  ;;  %v8030_v15 = vpack.c.bf16 %v842_v12, %v834_v10  ;;  %v914_v9 = vld [vmem:[#allocation12 + $0xc28] sm:$0xff]  ;;  %v916_v12 = vld [vmem:[#allocation12 + $0xc38] sm:$0xff]  ;;  %v963_v57 = vld [vmem:[#allocation12 + $0xdb0] sm:$0xff] }
 0x313   :  { %8139 = vmatprep.subr.bf16.mxu0 %v8138_v19  ;;  %v922_v10 = vld [vmem:[#allocation12 + $0xc68] sm:$0xff] }
 0x315   :  { %8013 = vmatpush1.bf16.msra.mxu1 %v8012_v49 }
 0x316   :  { %8141 = vmatpush1.bf16.msra.mxu0 %v8140_v26  ;;  %8015 = vmatprep.subr.bf16.mxu1 %v8014_v27  ;;  %v8034_v26 = vpack.c.bf16 %v858_v22, %v850_v21  ;;  %v849_v27 = vld [vmem:[#allocation12 + $0xa20] sm:$0xff]  ;;  %v938_v21 = vld [vmem:[#allocation12 + $0xce8] sm:$0xff]  ;;  %v932_v22 = vld [vmem:[#allocation12 + $0xcb8] sm:$0xff] }
 0x317   :  { %8143 = vmatprep.subr.bf16.mxu0 %v8142_v31  ;;  %v859_v31 = vld [vmem:[#allocation12 + $0xa70] sm:$0xff]  ;;  %v8036_v36 = vpack.c.bf16 %v857_v28, %v849_v27  ;;  %v937_v27 = vld [vmem:[#allocation12 + $0xce0] sm:$0xff] }
 0x318   :  { %v931_v28 = vld [vmem:[#allocation12 + $0xcb0] sm:$0xff] }
 0x319   :  { %8017 = vmatpush1.bf16.msra.mxu1 %v8016_v37  ;;  %v8164_v37 = vpack.c.bf16 %v859_v31, %v851_v29  ;;  %v8182_v29 = vpack.c.bf16 %v940_v23, %v932_v22  ;;  %v946_v31 = vld [vmem:[#allocation12 + $0xd28] sm:$0xff]  ;;  %v1020_v22 = vld [vmem:[#allocation12 + $0xf78] sm:$0xff] }
 0x31a   :  { %8145 = vmatpush1.bf16.msra.mxu0 %v8144_v38  ;;  %8019 = vmatprep.subr.bf16.mxu1 %v8018_v39  ;;  %v8038_v38 = vpack.c.bf16 %v874_v33, %v866_v32  ;;  %v865_v39 = vld [vmem:[#allocation12 + $0xaa0] sm:$0xff]  ;;  %v954_v32 = vld [vmem:[#allocation12 + $0xd68] sm:$0xff]  ;;  %v948_v33 = vld [vmem:[#allocation12 + $0xd38] sm:$0xff] }
 0x31b   :  { %8147 = vmatprep.subr.bf16.mxu0 %v8146_v42  ;;  %v8166_v42 = vpack.c.bf16 %v876_v56, %v868_v34  ;;  %v8040_v52 = vpack.c.bf16 %v873_v40, %v865_v39  ;;  %v956_v34 = vld [vmem:[#allocation12 + $0xd78] sm:$0xff]  ;;  %v953_v39 = vld [vmem:[#allocation12 + $0xd60] sm:$0xff]  ;;  %v947_v40 = vld [vmem:[#allocation12 + $0xd30] sm:$0xff] }
 0x31c   :  { %1386 = vmatmul.mubr.f32.vlgmr.msra.gmra.mrb[4].mxu1 %v9408_v11  ;;  %v8186_v41 = vpack.c.bf16 %v956_v34, %v948_v33  ;;  %v1036_v33 = vld [vmem:[#allocation12 + $0xff8] sm:$0xff] }
 0x31d   :  { %1528 = vmatmul.mubr.f32.vlgmr.msra.gmra.mrb[6].mxu0 %v9408_v11  ;;  %8021 = vmatpush1.bf16.msra.mxu1 %v8020_v51  ;;  %v844_v11 = vld [vmem:[#allocation12 + $0x9f8] sm:$0xff] }
 0x31e   :  { %1456 = vmatprep.mubr.f32.mxu1 %v9412_v20  ;;  %8149 = vmatpush1.bf16.msra.mxu0 %v8148_v54  ;;  %v8158_v19 = vpack.c.bf16 %v844_v11, %v836_v13  ;;  %v892_v51 = vld [vmem:[#allocation12 + $0xb78] sm:$0xff]  ;;  %v8042_v54 = vpack.c.bf16 %v890_v45, %v882_v44  ;;  %v970_v44 = vld [vmem:[#allocation12 + $0xde8] sm:$0xff] }
 0x31f   :  { %1598 = vmatprep.mubr.f32.mxu0 %v9412_v20  ;;  %8023 = vmatprep.subr.bf16.mxu1 %v8022_v59  ;;  %v843_v20 = vld [vmem:[#allocation12 + $0x9f0] sm:$0xff]  ;;  %v8170_v59 = vpack.c.bf16 %v892_v51, %v884_v46  ;;  %v924_v13 = vld [vmem:[#allocation12 + $0xc78] sm:$0xff] }
 0x320   :  { %8151 = vmatprep.subr.bf16.mxu0 %v8150_v63  ;;  %v8160_v49 = vpack.c.bf16 %v843_v20, %v835_v18  ;;  %v900_v63 = vld [vmem:[#allocation12 + $0xbb8] sm:$0xff]  ;;  %v8178_v18 = vpack.c.bf16 %v924_v13, %v916_v12  ;;  %v930_v20 = vld [vmem:[#allocation12 + $0xca8] sm:$0xff] }
 0x321   :  { %8025 = vmatpush1.bf16.msra.mxu1 %v8024_v6  ;;  %v8172_v6 = vpack.c.bf16 %v891_v60, %v883_v58  ;;  %v8174_v7 = vpack.c.bf16 %v908_v0, %v900_v63  ;;  %v964_v45 = vld [vmem:[#allocation12 + $0xdb8] sm:$0xff]  ;;  %v978_v60 = vld [vmem:[#allocation12 + $0xe28] sm:$0xff] }
 0x322   :  { %8153 = vmatpush1.bf16.msra.mxu0 %v8152_v2  ;;  %8027 = vmatprep.subr.bf16.mxu1 %v8026_v3  ;;  %v8046_v2 = vpack.c.bf16 %v906_v62, %v898_v61  ;;  %v897_v3 = vld [vmem:[#allocation12 + $0xba0] sm:$0xff]  ;;  %v972_v46 = vld [vmem:[#allocation12 + $0xdf8] sm:$0xff]  ;;  %v986_v61 = vld [vmem:[#allocation12 + $0xe68] sm:$0xff] }
 0x323   :  { %8155 = vmatprep.subr.bf16.mxu0 %v8154_v8  ;;  %v907_v8 = vld [vmem:[#allocation12 + $0xbf0] sm:$0xff]  ;;  %v8048_v11 = vpack.c.bf16 %v905_v4, %v897_v3  ;;  %v8190_v58 = vpack.c.bf16 %v972_v46, %v964_v45  ;;  %v980_v62 = vld [vmem:[#allocation12 + $0xe38] sm:$0xff]  ;;  %v985_v3 = vld [vmem:[#allocation12 + $0xe60] sm:$0xff] }
 0x324   :  { %v988_v63 = vld [vmem:[#allocation12 + $0xe78] sm:$0xff]  ;;  %v979_v4 = vld [vmem:[#allocation12 + $0xe30] sm:$0xff] }
 0x325   :  { %8029 = vmatpush1.bf16.msra.mxu1 %v8028_v47  ;;  %v8176_v47 = vpack.c.bf16 %v907_v8, %v899_v5  ;;  %v8194_v5 = vpack.c.bf16 %v988_v63, %v980_v62  ;;  %v994_v8 = vld [vmem:[#allocation12 + $0xea8] sm:$0xff]  ;;  %v1004_v12 = vld [vmem:[#allocation12 + $0xef8] sm:$0xff]  ;;  %v8808_v62 = vld [vmem:[#allocation2 + $0x20] sm:$0xff] }
 0x326   :  { %8157 = vmatpush1.bf16.msra.mxu0 %v8156_v14  ;;  %8031 = vmatprep.subr.bf16.mxu1 %v8030_v15  ;;  %v8050_v14 = vpack.c.bf16 %v922_v10, %v914_v9  ;;  %v913_v15 = vld [vmem:[#allocation12 + $0xc20] sm:$0xff]  ;;  %v1002_v9 = vld [vmem:[#allocation12 + $0xee8] sm:$0xff]  ;;  %v996_v10 = vld [vmem:[#allocation12 + $0xeb8] sm:$0xff]  ;;  %1607 = vst.msk [vmem:[#allocation2 + $0x8] sm:$0xff] %vm1606_vm6, %v8808_v62 }
 0x327   :  { %8159 = vmatprep.subr.bf16.mxu0 %v8158_v19  ;;  %v923_v19 = vld [vmem:[#allocation12 + $0xc70] sm:$0xff]  ;;  %v8052_v24 = vpack.c.bf16 %v921_v16, %v913_v15  ;;  %v1001_v15 = vld [vmem:[#allocation12 + $0xee0] sm:$0xff]  ;;  %1609 = vst.msk [vmem:[#allocation2 + $0x18] sm:$0xff] %vm1606_vm6, %v8808_v62  ;;  %1611 = vst.msk [vmem:[#allocation2 + $0x28] sm:$0xff] %vm1606_vm6, %v8808_v62 }
 0x328   :  { %v995_v16 = vld [vmem:[#allocation12 + $0xeb0] sm:$0xff]  ;;  %1613 = vst.msk [vmem:[#allocation2 + $0x38] sm:$0xff] %vm1606_vm6, %v8808_v62 }
 0x329   :  { %8033 = vmatpush1.bf16.msra.mxu1 %v8032_v25  ;;  %v8180_v25 = vpack.c.bf16 %v923_v19, %v915_v17  ;;  %v8198_v17 = vpack.c.bf16 %v1004_v12, %v996_v10  ;;  %v1010_v19 = vld [vmem:[#allocation12 + $0xf28] sm:$0xff] }
 0x32a   :  { %8161 = vmatpush1.bf16.msra.mxu0 %v8160_v49  ;;  %8035 = vmatprep.subr.bf16.mxu1 %v8034_v26  ;;  %v8054_v49 = vpack.c.bf16 %v938_v21, %v930_v20  ;;  %v929_v26 = vld [vmem:[#allocation12 + $0xca0] sm:$0xff]  ;;  %v1018_v20 = vld [vmem:[#allocation12 + $0xf68] sm:$0xff]  ;;  %v1012_v21 = vld [vmem:[#allocation12 + $0xf38] sm:$0xff] }
 0x32b   :  { %8163 = vmatprep.subr.bf16.mxu0 %v8162_v30  ;;  %v939_v30 = vld [vmem:[#allocation12 + $0xcf0] sm:$0xff]  ;;  %v8056_v56 = vpack.c.bf16 %v937_v27, %v929_v26  ;;  %v1017_v26 = vld [vmem:[#allocation12 + $0xf60] sm:$0xff] }
 0x32c   :  { %v1011_v27 = vld [vmem:[#allocation12 + $0xf30] sm:$0xff] }
 0x32d   :  { %8037 = vmatpush1.bf16.msra.mxu1 %v8036_v36  ;;  %v8184_v36 = vpack.c.bf16 %v939_v30, %v931_v28  ;;  %v8202_v28 = vpack.c.bf16 %v1020_v22, %v1012_v21  ;;  %v1026_v30 = vld [vmem:[#allocation12 + $0xfa8] sm:$0xff] }
 0x32e   :  { %8165 = vmatpush1.bf16.msra.mxu0 %v8164_v37  ;;  %8039 = vmatprep.subr.bf16.mxu1 %v8038_v38  ;;  %v8058_v37 = vpack.c.bf16 %v954_v32, %v946_v31  ;;  %v945_v38 = vld [vmem:[#allocation12 + $0xd20] sm:$0xff]  ;;  %v1034_v31 = vld [vmem:[#allocation12 + $0xfe8] sm:$0xff]  ;;  %v1028_v32 = vld [vmem:[#allocation12 + $0xfb8] sm:$0xff] }
 0x32f   :  { %8167 = vmatprep.subr.bf16.mxu0 %v8166_v42  ;;  %v955_v42 = vld [vmem:[#allocation12 + $0xd70] sm:$0xff]  ;;  %v8060_v51 = vpack.c.bf16 %v953_v39, %v945_v38  ;;  %v1033_v38 = vld [vmem:[#allocation12 + $0xfe0] sm:$0xff]  ;;  %v8206_v39 = vpack.c.bf16 %v1036_v33, %v1028_v32 }
 0x331   :  { %8041 = vmatpush1.bf16.msra.mxu1 %v8040_v52  ;;  %v8188_v52 = vpack.c.bf16 %v955_v42, %v947_v40  ;;  %v1027_v40 = vld [vmem:[#allocation12 + $0xfb0] sm:$0xff] }
 0x332   :  { %8169 = vmatpush1.bf16.msra.mxu0 %v8168_v53  ;;  %8043 = vmatprep.subr.bf16.mxu1 %v8042_v54  ;;  %v8062_v53 = vpack.c.bf16 %v970_v44, %v962_v43  ;;  %v961_v54 = vld [vmem:[#allocation12 + $0xda0] sm:$0xff] }
 0x333   :  { %8171 = vmatprep.subr.bf16.mxu0 %v8170_v59  ;;  %v971_v59 = vld [vmem:[#allocation12 + $0xdf0] sm:$0xff]  ;;  %v8064_v0 = vpack.c.bf16 %v969_v55, %v961_v54 }
 0x335   :  { %8045 = vmatpush1.bf16.msra.mxu1 %v8044_v1  ;;  %v8192_v1 = vpack.c.bf16 %v971_v59, %v963_v57 }
 0x336   :  { %8173 = vmatpush1.bf16.msra.mxu0 %v8172_v6  ;;  %8047 = vmatprep.subr.bf16.mxu1 %v8046_v2  ;;  %v8066_v6 = vpack.c.bf16 %v986_v61, %v978_v60  ;;  %v977_v2 = vld [vmem:[#allocation12 + $0xe20] sm:$0xff] }
 0x337   :  { %8175 = vmatprep.subr.bf16.mxu0 %v8174_v7  ;;  %v987_v7 = vld [vmem:[#allocation12 + $0xe70] sm:$0xff]  ;;  %v8068_v13 = vpack.c.bf16 %v985_v3, %v977_v2 }
 0x339   :  { %8049 = vmatpush1.bf16.msra.mxu1 %v8048_v11  ;;  %v8196_v11 = vpack.c.bf16 %v987_v7, %v979_v4 }
 0x33a   :  { %8177 = vmatpush1.bf16.msra.mxu0 %v8176_v47  ;;  %8051 = vmatprep.subr.bf16.mxu1 %v8050_v14  ;;  %v8070_v47 = vpack.c.bf16 %v1002_v9, %v994_v8  ;;  %v993_v14 = vld [vmem:[#allocation12 + $0xea0] sm:$0xff] }
 0x33b   :  { %8179 = vmatprep.subr.bf16.mxu0 %v8178_v18  ;;  %v1003_v18 = vld [vmem:[#allocation12 + $0xef0] sm:$0xff]  ;;  %v8072_v23 = vpack.c.bf16 %v1001_v15, %v993_v14 }
 0x33d   :  { %8053 = vmatpush1.bf16.msra.mxu1 %v8052_v24  ;;  %v8200_v24 = vpack.c.bf16 %v1003_v18, %v995_v16 }
 0x33e   :  { %8181 = vmatpush1.bf16.msra.mxu0 %v8180_v25  ;;  %8055 = vmatprep.subr.bf16.mxu1 %v8054_v49  ;;  %v8074_v25 = vpack.c.bf16 %v1018_v20, %v1010_v19  ;;  %v1009_v49 = vld [vmem:[#allocation12 + $0xf20] sm:$0xff] }
 0x33f   :  { %8183 = vmatprep.subr.bf16.mxu0 %v8182_v29  ;;  %v1019_v29 = vld [vmem:[#allocation12 + $0xf70] sm:$0xff]  ;;  %v8076_v34 = vpack.c.bf16 %v1017_v26, %v1009_v49 }
 0x341   :  { %8057 = vmatpush1.bf16.msra.mxu1 %v8056_v56  ;;  %v8204_v56 = vpack.c.bf16 %v1019_v29, %v1011_v27 }
 0x342   :  { %8185 = vmatpush1.bf16.msra.mxu0 %v8184_v36  ;;  %8059 = vmatprep.subr.bf16.mxu1 %v8058_v37  ;;  %v8078_v36 = vpack.c.bf16 %v1034_v31, %v1026_v30  ;;  %v1025_v37 = vld [vmem:[#allocation12 + $0xfa0] sm:$0xff] }
 0x343   :  { %8187 = vmatprep.subr.bf16.mxu0 %v8186_v41  ;;  %v1035_v41 = vld [vmem:[#allocation12 + $0xff0] sm:$0xff]  ;;  %v8080_v42 = vpack.c.bf16 %v1033_v38, %v1025_v37 }
 0x344   :  { %v8208_v43 = vpack.c.bf16 %v1035_v41, %v1027_v40 }
 0x345   :  { %8061 = vmatpush1.bf16.msra.mxu1 %v8060_v51 }
 0x346   :  { %8189 = vmatpush1.bf16.msra.mxu0 %v8188_v52  ;;  %8063 = vmatprep.subr.bf16.mxu1 %v8062_v53 }
 0x347   :  { %8191 = vmatprep.subr.bf16.mxu0 %v8190_v58 }
 0x349   :  { %8065 = vmatpush1.bf16.msra.mxu1 %v8064_v0 }
 0x34a   :  { %8193 = vmatpush1.bf16.msra.mxu0 %v8192_v1  ;;  %8067 = vmatprep.subr.bf16.mxu1 %v8066_v6 }
 0x34b   :  { %8195 = vmatprep.subr.bf16.mxu0 %v8194_v5 }
 0x34d   :  { %8069 = vmatpush1.bf16.msra.mxu1 %v8068_v13 }
 0x34e   :  { %8197 = vmatpush1.bf16.msra.mxu0 %v8196_v11  ;;  %8071 = vmatprep.subr.bf16.mxu1 %v8070_v47 }
 0x34f   :  { %8199 = vmatprep.subr.bf16.mxu0 %v8198_v17 }
 0x351   :  { %8073 = vmatpush1.bf16.msra.mxu1 %v8072_v23 }
 0x352   :  { %8201 = vmatpush1.bf16.msra.mxu0 %v8200_v24  ;;  %8075 = vmatprep.subr.bf16.mxu1 %v8074_v25  ;;  %v1718_v24 = vld [vmem:[#allocation14] sm:$0xff] }
 0x353   :  { %8203 = vmatprep.subr.bf16.mxu0 %v8202_v28  ;;  %v1724_v25 = vsel %vm1722_vm7, %v1718_v24, 0 }
 0x354   :  { %v9482_v49 = vand.u32 4294901760, %v1724_v25 }
 0x355   :  { %8077 = vmatpush1.bf16.msra.mxu1 %v8076_v34 }
 0x356   :  { %8205 = vmatpush1.bf16.msra.mxu0 %v8204_v56  ;;  %8079 = vmatprep.subr.bf16.mxu1 %v8078_v36  ;;  %v9486_v28 = vsub.f32 %v1724_v25, %v9482_v49 }
 0x357   :  { %8207 = vmatprep.subr.bf16.mxu0 %v8206_v39 }
 0x358   :  { %v9489_v29 = vand.u32 4294901760, %v9486_v28 }
 0x359   :  { %8081 = vmatpush1.bf16.msra.mxu1 %v8080_v42 }
 0x35a   :  { %8209 = vmatpush1.bf16.msra.mxu0 %v8208_v43  ;;  %v1807_v31 = vsub.f32 %v9486_v28, %v9489_v29 }
 0x35c   :  { %1457 = vmatmul.mubr.f32.vlgmr.msra.gmra.mrb[4].mxu1 %v9421_v35  ;;  %v1808_v32 = vand.u32 4294901760, %v1807_v31 }
 0x35d   :  { %1599 = vmatmul.mubr.f32.vlgmr.msra.gmra.mrb[6].mxu0 %v9421_v35  ;;  %7108 = vmatprep.mubr.f32.mxu1 %v9482_v49 }
 0x35e   :  { %7094 = vmatprep.mubr.f32.mxu0 %v1808_v32 }
 0x3af   :  { %v1174_v44 = vpop.f32.mrb[2].mxu1  ;;  %v1316_v45 = vpop.f32.mrb[4].mxu0 }
 0x3b0   :  { %v1620_v46 = vrot.slane %v1174_v44, 6  ;;  %v1640_v51 = vrot.slane %v1316_v45, 6  ;;  %1636 = vrot.lane.b32.xlu1 %v1316_v45, %s9095_s27  ;;  %v1318_v52 = vpop.f32.mrb[5].mxu0  ;;  %1615 = vrot.lane.b32.xlu0 %v1174_v44, %s9095_s27  ;;  %v1176_v53 = vpop.f32.mrb[3].mxu1 }
 0x3b1   :  { %v1649_v54 = vrot.slane %v1318_v52, 2  ;;  %v1631_v55 = vrot.slane %v1176_v53, 2  ;;  %v1644_v57 = vrot.slane %v1318_v52, 4  ;;  %v1625_v58 = vrot.slane %v1176_v53, 4 }
 0x3b2   :  { %1642 = vst.msk [vmem:[#allocation2 + $0x10] sm:$0xc] %vm1622_vm2, %v1640_v51  ;;  %1623 = vst.msk [vmem:[#allocation2] sm:$0xc] %vm1622_vm2, %v1620_v46  ;;  %v1719_v46 = vld [vmem:[#allocation14 + $0x8] sm:$0xff]  ;;  %v1720_v51 = vld [vmem:[#allocation14 + $0x10] sm:$0xff] }
 0x3b3   :  { %1651 = vst.msk [vmem:[#allocation2 + $0x10] sm:$0xc0] %vm1633_vm3, %v1649_v54  ;;  %1634 = vst.msk [vmem:[#allocation2] sm:$0xc0] %vm1633_vm3, %v1631_v55  ;;  %v1727_v52 = vsel %vm1722_vm7, %v1719_v46, 0  ;;  %v1730_v53 = vsel %vm1722_vm7, %v1720_v51, 0 }
 0x3b4   :  { %1645 = vrot.lane.b32.xlu1 %v1644_v57, %s9095_s27  ;;  %1626 = vrot.lane.b32.xlu0 %v1625_v58, %s9095_s27  ;;  %v1721_v54 = vld [vmem:[#allocation14 + $0x18] sm:$0xff]  ;;  %v9501_v55 = vand.u32 4294901760, %v1727_v52  ;;  %v9503_v58 = vand.u32 4294901760, %v1730_v53 }
 0x422   :  { %v1637_v35 = vpop.permute.xlu1 %1636  ;;  %v1616_v59 = vpop.permute.xlu0 %1615 }
 0x423   :  { %1639 = vst.msk [vmem:[#allocation2 + $0x10] sm:$0x3] %vm1618_vm4, %v1637_v35  ;;  %1619 = vst.msk [vmem:[#allocation2] sm:$0x3] %vm1618_vm4, %v1616_v59  ;;  %v1733_v35 = vsel %vm1722_vm7, %v1721_v54, 0 }
 0x426   :  { %v1646_v60 = vpop.permute.xlu1 %1645  ;;  %v1627_v61 = vpop.permute.xlu0 %1626 }
 0x427   :  { %1648 = vst.msk [vmem:[#allocation2 + $0x10] sm:$0x30] %vm1629_vm5, %v1646_v60  ;;  %1630 = vst.msk [vmem:[#allocation2] sm:$0x30] %vm1629_vm5, %v1627_v61  ;;  %v9507_v60 = vsub.f32 %v1727_v52, %v9501_v55  ;;  %v9510_v61 = vsub.f32 %v1730_v53, %v9503_v58 }
 0x42e   :  { %v9457_v9 = vld [vmem:[#allocation2] sm:$0xff]  ;;  %v9461_v10 = vld [vmem:[#allocation2 + $0x10] sm:$0xff] }
 0x42f   :  { %v1458_v63 = vpop.f32.mrb[4].mxu1 }
 0x430   :  { %v1657_v0 = vrot.slane %v1458_v63, 6  ;;  %v1600_v1 = vpop.f32.mrb[6].mxu0  ;;  %1653 = vrot.lane.b32.xlu0 %v1458_v63, %s9095_s27  ;;  %v1460_v6 = vpop.f32.mrb[5].mxu1  ;;  %v9512_v63 = vand.u32 4294901760, %v1733_v35 }
 0x431   :  { %v1674_v2 = vrot.slane %v1600_v1, 6  ;;  %v1602_v3 = vpop.f32.mrb[7].mxu0  ;;  %v1666_v4 = vrot.slane %v1460_v6, 2  ;;  %v1661_v5 = vrot.slane %v1460_v6, 4  ;;  %v9518_v6 = vand.u32 4294901760, %v9510_v61 }
 0x432   :  { %1659 = vst.msk [vmem:[#allocation2 + $0x20] sm:$0xc] %vm1622_vm2, %v1657_v0  ;;  %v1683_v7 = vrot.slane %v1602_v3, 2  ;;  %v1678_v8 = vrot.slane %v1602_v3, 4  ;;  %v9515_v0 = vand.u32 4294901760, %v9507_v60 }
 0x433   :  { %1676 = vst.msk [vmem:[#allocation2 + $0x30] sm:$0xc] %vm1622_vm2, %v1674_v2  ;;  %1662 = vrot.lane.b32.xlu1 %v1661_v5, %s9095_s27  ;;  %vm6318_vm2 = vcmask 785408  }
 0x434   :  { %1668 = vst.msk [vmem:[#allocation2 + $0x20] sm:$0xc0] %vm1633_vm3, %v1666_v4  ;;  %1685 = vst.msk [vmem:[#allocation2 + $0x30] sm:$0xc0] %vm1633_vm3, %v1683_v7  ;;  %1670 = vrot.lane.b32.xlu0 %v1600_v1, %s9095_s27  ;;  %v9521_v4 = vsub.f32 %v1733_v35, %v9512_v63  ;;  %v1817_v5 = vsub.f32 %v9507_v60, %v9515_v0  ;;  %v1827_v7 = vsub.f32 %v9510_v61, %v9518_v6  ;;  %vm6050_vm3 = vcmask 171008  }
 0x437   :  { %1679 = vrot.lane.b32.xlu1 %v1678_v8, %s9095_s27 }
 0x438   :  { %1694 = vrot.lane.b32.xlu0 %v9457_v9, %s9095_s27 }
 0x43b   :  { %1696 = vrot.lane.b32.xlu1 %v9461_v10, %s9095_s27 }
 0x4a2   :  { %v1654_v12 = vpop.permute.xlu0 %1653 }
 0x4a3   :  { %1656 = vst.msk [vmem:[#allocation2 + $0x20] sm:$0x3] %vm1618_vm4, %v1654_v12 }
 0x4a5   :  { %v1663_v13 = vpop.permute.xlu1 %1662 }
 0x4a6   :  { %1665 = vst.msk [vmem:[#allocation2 + $0x20] sm:$0x30] %vm1629_vm5, %v1663_v13  ;;  %v1671_v11 = vpop.permute.xlu0 %1670  ;;  %v9528_v13 = vand.u32 4294901760, %v9521_v4 }
 0x4a7   :  { %1673 = vst.msk [vmem:[#allocation2 + $0x30] sm:$0x3] %vm1618_vm4, %v1671_v11  ;;  %vm5812_vm4 = vcmask 924672  }
 0x4a9   :  { %v1680_v47 = vpop.permute.xlu1 %1679 }
 0x4aa   :  { %1682 = vst.msk [vmem:[#allocation2 + $0x30] sm:$0x30] %vm1629_vm5, %v1680_v47  ;;  %v1695_v16 = vpop.permute.xlu0 %1694  ;;  %vm5881_vm5 = vcmask 818176  }
 0x4ab   :  { %v1706_v17 = vsel %vm1606_vm6, %v1695_v16, 0.0  ;;  %v9530_v16 = vand.u32 4294901760, %v1817_v5 }
 0x4ad   :  { %v9469_v14 = vld [vmem:[#allocation2 + $0x20] sm:$0xff]  ;;  %v1697_v18 = vpop.permute.xlu1 %1696 }
 0x4ae   :  { %1698 = vrot.lane.b32.xlu0 %v9469_v14, %s9095_s27  ;;  %v1709_v19 = vsel %vm1606_vm6, %v1697_v18, 0.0  ;;  %v9534_v18 = vand.u32 4294901760, %v1827_v7 }
 0x4b1   :  { %v9473_v15 = vld [vmem:[#allocation2 + $0x30] sm:$0xff] }
 0x4b2   :  { %1700 = vrot.lane.b32.xlu1 %v9473_v15, %s9095_s27 }
 0x4cd   :  { %1707 = vadd.xlane.f32.xlu0 %v1706_v17  ;;  %v1837_v17 = vsub.f32 %v9521_v4, %v9528_v13 }
 0x4d6   :  { %1710 = vadd.xlane.f32.xlu1 %v1709_v19 }
 0x520   :  { %v1699_v20 = vpop.permute.xlu0 %1698 }
 0x521   :  { %v1712_v21 = vsel %vm1606_vm6, %v1699_v20, 0.0 }
 0x522   :  { %1713 = vadd.xlane.f32.xlu0 %v1712_v21 }
 0x524   :  { %v1701_v22 = vpop.permute.xlu1 %1700 }
 0x525   :  { %v1715_v23 = vsel %vm1606_vm6, %v1701_v22, 0.0  ;;  %v9537_v22 = vand.u32 4294901760, %v1837_v17 }
 0x526   :  { %1716 = vadd.xlane.f32.xlu0 %v1715_v23 }
 0x55a   :  { %v1708_v26 = vpop.xlane.xlu0 %1707 }
 0x55b   :  { %v1736_v27 = vand.u32 4294901760, %v1708_v26 }
 0x55d   :  { %v1846_v30 = vsub.f32 %v1708_v26, %v1736_v27  ;;  %v9111_v26 = vmov 0  }
 0x55e   :  { %8718 = vset.pattern.permute.xlu0 %v9111_v26  ;;  %8719 = vset.pattern.permute.xlu1 %v9111_v26 }
 0x55f   :  { %v1847_v34 = vand.u32 4294901760, %v1846_v30 }
 0x561   :  { %v1848_v39 = vsub.f32 %v1846_v30, %v1847_v34 }
 0x563   :  { %v1711_v33 = vpop.xlane.xlu1 %1710  ;;  %v1849_v43 = vand.u32 4294901760, %v1848_v39 }
 0x564   :  { %v1739_v56 = vand.u32 4294901760, %v1711_v33 }
 0x566   :  { %v9493_v36 = vpack.c.bf16 %v1739_v56, %v1736_v27  ;;  %v1853_v37 = vsub.f32 %v1711_v33, %v1739_v56 }
 0x568   :  { %v1854_v38 = vand.u32 4294901760, %v1853_v37  ;;  %8211 = vmatprep.subr.bf16.mxu0 %v9493_v36  ;;  %v8226_v40 = vpack.c.bf16 %v1853_v37, %v1846_v30 }
 0x569   :  { %8213 = vmatpush3.bf16.msra.mxu0 %v9493_v36 }
 0x56a   :  { %v1855_v41 = vsub.f32 %v1853_v37, %v1854_v38  ;;  %v9497_v42 = vpack.c.bf16 %v1854_v38, %v1847_v34 }
 0x56c   :  { %v1856_v44 = vand.u32 4294901760, %v1855_v41 }
 0x56e   :  { %v8218_v45 = vpack.c.bf16 %v1856_v44, %v1849_v43 }
 0x570   :  { %8219 = vmatprep.subr.bf16.mxu1 %v8218_v45 }
 0x571   :  { %8221 = vmatpush3.bf16.msra.mxu1 %v8218_v45 }
 0x5af   :  { %v1714_v57 = vpop.xlane.xlu0 %1713 }
 0x5b0   :  { %v1742_v59 = vand.u32 4294901760, %v1714_v57 }
 0x5b2   :  { %v1860_v62 = vsub.f32 %v1714_v57, %v1742_v59 }
 0x5b3   :  { %v1717_v1 = vpop.xlane.xlu0 %1716 }
 0x5b4   :  { %v1861_v2 = vand.u32 4294901760, %v1860_v62  ;;  %v1745_v3 = vand.u32 4294901760, %v1717_v1 }
 0x5b6   :  { %v8214_v8 = vpack.c.bf16 %v1745_v3, %v1742_v59  ;;  %v1867_v12 = vsub.f32 %v1717_v1, %v1745_v3  ;;  %v1862_v47 = vsub.f32 %v1860_v62, %v1861_v2 }
 0x5b8   :  { %v1868_v11 = vand.u32 4294901760, %v1867_v12  ;;  %8215 = vmatprep.subr.bf16.mxu0 %v8214_v8  ;;  %v1863_v20 = vand.u32 4294901760, %v1862_v47  ;;  %v8230_v24 = vpack.c.bf16 %v1867_v12, %v1860_v62 }
 0x5b9   :  { %8217 = vmatpush3.bf16.msra.mxu0 %v8214_v8 }
 0x5ba   :  { %v1869_v19 = vsub.f32 %v1867_v12, %v1868_v11  ;;  %v8246_v25 = vpack.c.bf16 %v1868_v11, %v1861_v2  ;;  %v3067_v12 = vld [vmem:[%s11084_s8] sm:$0xff]  ;;  %v3068_v11 = vld [vmem:[%s11084_s8 + $0x8] sm:$0xff] }
 0x5bc   :  { %v1870_v21 = vand.u32 4294901760, %v1869_v19  ;;  %7095 = vmatmul.mubr.f32.vlgmr.msra.gmra.mrb[8].mxu0 %v9530_v16 }
 0x5bd   :  { %7097 = vmatprep.mubr.f32.mxu0 %v9534_v18 }
 0x5be   :  { %v8222_v23 = vpack.c.bf16 %v1870_v21, %v1863_v20 }
 0x5c0   :  { %8223 = vmatprep.subr.bf16.mxu1 %v8222_v23  ;;  %7098 = vmatmul.mubr.f32.gmra.mrb[10].mxu0 %v9537_v22 }
 0x5c1   :  { %8225 = vmatpush3.bf16.msra.mxu1 %v8222_v23  ;;  %7178 = vmatprep.mubr.f32.mxu0 %v1808_v32 }
 0x5c2   :  { %8227 = vmatprep.subr.bf16.mxu1 %v8226_v40 }
 0x5c4   :  { %7109 = vmatmul.mubr.f32.vlgmr.msra.gmra.mrb[6].mxu1 %v9501_v55 }
 0x5c5   :  { %8229 = vmatpush3.bf16.msra.mxu1 %v8226_v40  ;;  %7111 = vmatprep.mubr.f32.mxu1 %v9503_v58 }
 0x5c6   :  { %8231 = vmatprep.subr.bf16.mxu1 %v8230_v24 }
 0x5c8   :  { %7112 = vmatmul.mubr.f32.gmra.mrb[8].mxu1 %v9512_v63 }
 0x5c9   :  { %8233 = vmatpush3.bf16.msra.mxu1 %v8230_v24  ;;  %7122 = vmatprep.mubr.f32.mxu1 %v9486_v28 }
 0x5ca   :  { %8235 = vmatprep.subr.bf16.mxu1 %v9493_v36 }
 0x5cc   :  { %7123 = vmatmul.mubr.f32.vlgmr.msra.gmra.mrb[6].mxu1 %v9507_v60 }
 0x5cd   :  { %8237 = vmatpush3.bf16.msra.mxu1 %v9493_v36  ;;  %7125 = vmatprep.mubr.f32.mxu1 %v9510_v61 }
 0x5ce   :  { %8239 = vmatprep.subr.bf16.mxu1 %v8214_v8 }
 0x5d0   :  { %7126 = vmatmul.mubr.f32.gmra.mrb[8].mxu1 %v9521_v4 }
 0x5d1   :  { %8241 = vmatpush3.bf16.msra.mxu1 %v8214_v8  ;;  %7136 = vmatprep.mubr.f32.mxu1 %v9489_v29 }
 0x5d2   :  { %8243 = vmatprep.subr.bf16.mxu1 %v9497_v42 }
 0x5d4   :  { %7137 = vmatmul.mubr.f32.vlgmr.msra.gmra.mrb[6].mxu1 %v9515_v0 }
 0x5d5   :  { %8245 = vmatpush3.bf16.msra.mxu1 %v9497_v42  ;;  %7139 = vmatprep.mubr.f32.mxu1 %v9518_v6 }
 0x5d6   :  { %8247 = vmatprep.subr.bf16.mxu1 %v8246_v25 }
 0x5d8   :  { %7140 = vmatmul.mubr.f32.gmra.mrb[8].mxu1 %v9528_v13 }
 0x5d9   :  { %8249 = vmatpush3.bf16.msra.mxu1 %v8246_v25  ;;  %7150 = vmatprep.mubr.f32.mxu1 %v9482_v49 }
 0x5da   :  { %8251 = vmatprep.subr.bf16.mxu1 %v9493_v36 }
 0x5dc   :  { %7151 = vmatmul.mubr.f32.vlgmr.msra.gmra.mrb[6].mxu1 %v9501_v55 }
 0x5dd   :  { %8253 = vmatpush3.bf16.msra.mxu1 %v9493_v36  ;;  %7153 = vmatprep.mubr.f32.mxu1 %v9503_v58 }
 0x5de   :  { %8255 = vmatprep.subr.bf16.mxu1 %v8214_v8 }
 0x5e0   :  { %7154 = vmatmul.mubr.f32.gmra.mrb[8].mxu1 %v9512_v63 }
 0x5e1   :  { %8257 = vmatpush3.bf16.msra.mxu1 %v8214_v8  ;;  %7164 = vmatprep.mubr.f32.mxu1 %v9482_v49 }
 0x5e4   :  { %7165 = vmatmul.mubr.f32.vlgmr.msra.gmra.mrb[6].mxu1 %v9501_v55 }
 0x5e5   :  { %7167 = vmatprep.mubr.f32.mxu1 %v9503_v58 }
 0x5e8   :  { %7168 = vmatmul.mubr.f32.gmra.mrb[8].mxu1 %v9512_v63 }
 0x68f   :  { %v7096_v27 = vpop.f32.mrb[8].mxu0 }
 0x690   :  { %v1810_v30 = vpop.f32.mrb[9].mxu0 }
 0x693   :  { %v7099_v31 = vpop.f32.mrb[10].mxu0 }
 0x694   :  { %v1830_v32 = vpop.f32.mrb[11].mxu0 }
 0x6b7   :  { %v7166_v33 = vpop.f32.mrb[6].mxu1 }
 0x6b8   :  { %v8546_v34 = vadd.f32 %v7166_v33, %v7096_v27  ;;  %v2327_v56 = vpop.f32.mrb[7].mxu1 }
 0x6b9   :  { %v8547_v36 = vadd.f32 %v2327_v56, %v1810_v30 }
 0x6ba   :  { %v2350_v37 = vmul.f32 0.0078125, %v8546_v34 }
 0x6bb   :  { %v2349_v38 = vmul.f32 0.0078125, %v8547_v36  ;;  %v7169_v39 = vpop.f32.mrb[8].mxu1 }
 0x6bc   :  { %v8548_v40 = vadd.f32 %v7169_v39, %v7099_v31  ;;  %v2339_v41 = vpop.f32.mrb[9].mxu1  ;;  %2360 = vperm.xlu0 %8718, %v2350_v37  }
 0x6bd   :  { %v8549_v42 = vadd.f32 %v2339_v41, %v1830_v32  ;;  %2355 = vperm.xlu1 %8719, %v2349_v38  }
 0x6be   :  { %v2352_v44 = vmul.f32 0.0078125, %v8548_v40 }
 0x6bf   :  { %v2351_v43 = vmul.f32 0.0078125, %v8549_v42 }
 0x6c1   :  { %2365 = vperm.xlu1 %8719, %v2351_v43  }
 0x6c5   :  { %2370 = vperm.xlu1 %8719, %v2352_v44  }
 0x73b   :  { %v2361_v45 = vpop.permute.xlu0 %2360 }
 0x73c   :  { %v9567_v46 = vsub.f32 %v9461_v10, %v2361_v45  ;;  %v2356_v51 = vpop.permute.xlu1 %2355 }
 0x73d   :  { %v9570_v52 = vsub.f32 %v9457_v9, %v2356_v51 }
 0x73e   :  { %v2378_v53 = vmul.f32 %v9567_v46, %v9567_v46 }
 0x73f   :  { %v2377_v35 = vmul.f32 %v9570_v52, %v9570_v52 }
 0x740   :  { %2387 = vrot.lane.b32.xlu1 %v2378_v53, %s9095_s27  ;;  %v2366_v54 = vpop.permute.xlu1 %2365 }
 0x741   :  { %v9576_v57 = vsub.f32 %v9469_v14, %v2366_v54 }
 0x743   :  { %v2379_v9 = vmul.f32 %v9576_v57, %v9576_v57 }
 0x744   :  { %2385 = vrot.lane.b32.xlu1 %v2377_v35, %s9095_s27  ;;  %v2371_v10 = vpop.permute.xlu1 %2370 }
 0x745   :  { %v9582_v59 = vsub.f32 %v9473_v15, %v2371_v10 }
 0x747   :  { %v2380_v62 = vmul.f32 %v9582_v59, %v9582_v59 }
 0x748   :  { %2389 = vrot.lane.b32.xlu1 %v2379_v9, %s9095_s27 }
 0x74c   :  { %2391 = vrot.lane.b32.xlu1 %v2380_v62, %s9095_s27 }
 0x7b2   :  { %v2388_v14 = vpop.permute.xlu1 %2387 }
 0x7b3   :  { %v2400_v1 = vsel %vm1606_vm6, %v2388_v14, 0.0 }
 0x7b4   :  { %2401 = vadd.xlane.f32.xlu0 %v2400_v1 }
 0x7b6   :  { %v2386_v2 = vpop.permute.xlu1 %2385 }
 0x7b7   :  { %v2397_v3 = vsel %vm1606_vm6, %v2386_v2, 0.0  ;;  %v3038_v2 = vld [vmem:[%s11083_s7 + $0x18] sm:$0xff] }
 0x7b8   :  { %2398 = vadd.xlane.f32.xlu1 %v2397_v3  ;;  %v3037_v3 = vld [vmem:[%s11083_s7 + $0x10] sm:$0xff] }
 0x7ba   :  { %v2390_v15 = vpop.permute.xlu1 %2389 }
 0x7bb   :  { %v2403_v5 = vsel %vm1606_vm6, %v2390_v15, 0.0 }
 0x7bc   :  { %2404 = vadd.xlane.f32.xlu1 %v2403_v5 }
 0x7be   :  { %v2392_v7 = vpop.permute.xlu1 %2391 }
 0x7bf   :  { %v2406_v8 = vsel %vm1606_vm6, %v2392_v7, 0.0 }
 0x7c0   :  { %2407 = vadd.xlane.f32.xlu0 %v2406_v8 }
 0x7cd   :  { %3073 = vperm.xlu1 %8719, %v3067_v12   ;;  %v3070_v12 = vld [vmem:[%s11084_s8 + $0x18] sm:$0xff] }
 0x7d1   :  { %3078 = vperm.xlu1 %8719, %v3068_v11   ;;  %v3069_v11 = vld [vmem:[%s11084_s8 + $0x10] sm:$0xff]  ;;  %s9116_s8 = smov 49  }
 0x841   :  { %v2402_v47 = vpop.xlane.xlu0 %2401 }
 0x842   :  { %v2413_v17 = vand.u32 4294901760, %v2402_v47 }
 0x844   :  { %v2527_v19 = vsub.f32 %v2402_v47, %v2413_v17  ;;  %v6759_v47 = vld [vmem:[#allocation18 + $0x3] ss:$0 sm:$0xff] }
 0x845   :  { %v2399_v20 = vpop.xlane.xlu1 %2398 }
 0x846   :  { %v2410_v21 = vand.u32 4294901760, %v2399_v20  ;;  %v2528_v23 = vand.u32 4294901760, %v2527_v19 }
 0x848   :  { %v9600_v24 = vpack.c.bf16 %v2413_v17, %v2410_v21  ;;  %v2520_v25 = vsub.f32 %v2399_v20, %v2410_v21  ;;  %v2529_v33 = vsub.f32 %v2527_v19, %v2528_v23  ;;  %v6757_v17 = vld [vmem:[#allocation18 + $0x1] ss:$0 sm:$0xff]  ;;  %v6761_v20 = vld [vmem:[#allocation18 + $0x5] ss:$0 sm:$0xff]  ;;  %v6756_v21 = vld [vmem:[#allocation18] ss:$0 sm:$0xff] }
 0x849   :  { %v2405_v26 = vpop.xlane.xlu1 %2404 }
 0x84a   :  { %v2521_v27 = vand.u32 4294901760, %v2520_v25  ;;  %v2416_v30 = vand.u32 4294901760, %v2405_v26  ;;  %8259 = vmatprep.subr.bf16.mxu0 %v9600_v24  ;;  %v2530_v40 = vand.u32 4294901760, %v2529_v33  ;;  %v8274_v54 = vpack.c.bf16 %v2527_v19, %v2520_v25  ;;  %v6762_v19 = vld [vmem:[#allocation18 + $0x6] ss:$0 sm:$0xff] }
 0x84b   :  { %8261 = vmatpush3.bf16.msra.mxu0 %v9600_v24 }
 0x84c   :  { %v2534_v31 = vsub.f32 %v2405_v26, %v2416_v30  ;;  %v2522_v32 = vsub.f32 %v2520_v25, %v2521_v27 }
 0x84d   :  { %v2408_v34 = vpop.xlane.xlu0 %2407  ;;  %v3074_v25 = vpop.permute.xlu1 %3073 }
 0x84e   :  { %v2535_v56 = vand.u32 4294901760, %v2534_v31  ;;  %v2419_v36 = vand.u32 4294901760, %v2408_v34  ;;  %v2523_v37 = vand.u32 4294901760, %v2522_v32 }
 0x850   :  { %v8262_v38 = vpack.c.bf16 %v2419_v36, %v2416_v30  ;;  %v2541_v39 = vsub.f32 %v2408_v34, %v2419_v36  ;;  %v8266_v42 = vpack.c.bf16 %v2530_v40, %v2523_v37  ;;  %v2536_v43 = vsub.f32 %v2534_v31, %v2535_v56 }
 0x851   :  { %v3079_v26 = vpop.permute.xlu1 %3078 }
 0x852   :  { %v2542_v41 = vand.u32 4294901760, %v2541_v39  ;;  %8263 = vmatprep.subr.bf16.mxu0 %v8262_v38  ;;  %v2537_v45 = vand.u32 4294901760, %v2536_v43  ;;  %v8278_v35 = vpack.c.bf16 %v2541_v39, %v2534_v31 }
 0x853   :  { %8265 = vmatpush3.bf16.msra.mxu0 %v8262_v38 }
 0x854   :  { %8267 = vmatprep.subr.bf16.mxu0 %v8266_v42  ;;  %v2543_v44 = vsub.f32 %v2541_v39, %v2542_v41 }
 0x856   :  { %7179 = vmatmul.mubr.f32.vlgmr.msra.gmra.mrb[12].mxu0 %v9530_v16  ;;  %v2544_v51 = vand.u32 4294901760, %v2543_v44  ;;  %v8290_v16 = vpack.c.bf16 %v2528_v23, %v2521_v27  ;;  %v6763_v23 = vld [vmem:[#allocation18 + $0x7] ss:$0 sm:$0xff] }
 0x857   :  { %8269 = vmatpush3.bf16.msra.mxu0 %v8266_v42  ;;  %7181 = vmatprep.mubr.f32.mxu0 %v9534_v18  ;;  %v8294_v18 = vpack.c.bf16 %v2542_v41, %v2535_v56 }
 0x858   :  { %v8270_v53 = vpack.c.bf16 %v2544_v51, %v2537_v45 }
 0x85a   :  { %7182 = vmatmul.mubr.f32.gmra.mrb[14].mxu0 %v9537_v22  ;;  %8271 = vmatprep.subr.bf16.mxu0 %v8270_v53 }
 0x85b   :  { %8273 = vmatpush3.bf16.msra.mxu0 %v8270_v53  ;;  %7192 = vmatprep.mubr.f32.mxu0 %v9482_v49 }
 0x85c   :  { %8275 = vmatprep.subr.bf16.mxu0 %v8274_v54 }
 0x85e   :  { %7193 = vmatmul.mubr.f32.vlgmr.msra.gmra.mrb[12].mxu0 %v9501_v55 }
 0x85f   :  { %8277 = vmatpush3.bf16.msra.mxu0 %v8274_v54  ;;  %7195 = vmatprep.mubr.f32.mxu0 %v9503_v58 }
 0x860   :  { %8279 = vmatprep.subr.bf16.mxu0 %v8278_v35 }
 0x862   :  { %7196 = vmatmul.mubr.f32.gmra.mrb[14].mxu0 %v9512_v63 }
 0x863   :  { %8281 = vmatpush3.bf16.msra.mxu0 %v8278_v35  ;;  %7206 = vmatprep.mubr.f32.mxu0 %v9486_v28 }
 0x864   :  { %8283 = vmatprep.subr.bf16.mxu0 %v9600_v24 }
 0x866   :  { %7207 = vmatmul.mubr.f32.vlgmr.msra.gmra.mrb[12].mxu0 %v9507_v60 }
 0x867   :  { %8285 = vmatpush3.bf16.msra.mxu0 %v9600_v24  ;;  %7209 = vmatprep.mubr.f32.mxu0 %v9510_v61 }
 0x868   :  { %8287 = vmatprep.subr.bf16.mxu0 %v8262_v38 }
 0x86a   :  { %7210 = vmatmul.mubr.f32.gmra.mrb[14].mxu0 %v9521_v4 }
 0x86b   :  { %8289 = vmatpush3.bf16.msra.mxu0 %v8262_v38  ;;  %7220 = vmatprep.mubr.f32.mxu0 %v9489_v29 }
 0x86c   :  { %8291 = vmatprep.subr.bf16.mxu0 %v8290_v16 }
 0x86e   :  { %7221 = vmatmul.mubr.f32.vlgmr.msra.gmra.mrb[12].mxu0 %v9515_v0 }
 0x86f   :  { %8293 = vmatpush3.bf16.msra.mxu0 %v8290_v16  ;;  %7223 = vmatprep.mubr.f32.mxu0 %v9518_v6 }
 0x870   :  { %8295 = vmatprep.subr.bf16.mxu0 %v8294_v18 }
 0x872   :  { %7224 = vmatmul.mubr.f32.gmra.mrb[14].mxu0 %v9528_v13 }
 0x873   :  { %8297 = vmatpush3.bf16.msra.mxu0 %v8294_v18  ;;  %7234 = vmatprep.mubr.f32.mxu0 %v9482_v49  ;;  %v9674_v18 = vld [vmem:[#allocation2 + $0x28] sm:$0xff] }
 0x874   :  { %8299 = vmatprep.subr.bf16.mxu0 %v9600_v24 }
 0x876   :  { %7235 = vmatmul.mubr.f32.vlgmr.msra.gmra.mrb[12].mxu0 %v9501_v55 }
 0x877   :  { %8301 = vmatpush3.bf16.msra.mxu0 %v9600_v24  ;;  %7237 = vmatprep.mubr.f32.mxu0 %v9503_v58  ;;  %v6758_v24 = vld [vmem:[#allocation18 + $0x2] ss:$0 sm:$0xff] }
 0x878   :  { %8303 = vmatprep.subr.bf16.mxu0 %v8262_v38 }
 0x87a   :  { %7238 = vmatmul.mubr.f32.gmra.mrb[14].mxu0 %v9512_v63 }
 0x87b   :  { %8305 = vmatpush3.bf16.msra.mxu0 %v8262_v38  ;;  %7248 = vmatprep.mubr.f32.mxu0 %v9482_v49 }
 0x87e   :  { %7249 = vmatmul.mubr.f32.vlgmr.msra.gmra.mrb[12].mxu0 %v9501_v55  ;;  %v3036_v55 = vld [vmem:[%s11083_s7 + $0x8] sm:$0xff] }
 0x87f   :  { %7251 = vmatprep.mubr.f32.mxu0 %v9503_v58  ;;  %v3035_v58 = vld [vmem:[%s11083_s7] sm:$0xff]  ;;  %s9112_s7 = smov 96  }
 0x882   :  { %7252 = vmatmul.mubr.f32.gmra.mrb[14].mxu0 %v9512_v63 }
 0x951   :  { %v7250_v28 = vpop.f32.mrb[12].mxu0 }
 0x952   :  { %v3024_v29 = vmul.f32 0.0078125, %v7250_v28  ;;  %v3001_v60 = vpop.f32.mrb[13].mxu0 }
 0x953   :  { %v3023_v61 = vmul.f32 0.0078125, %v3001_v60 }
 0x954   :  { %v3028_v0 = vadd.f32 1e-05, %v3024_v29 }
 0x955   :  { %v3027_v6 = vadd.f32 1e-05, %v3023_v61  ;;  %v7253_v4 = vpop.f32.mrb[14].mxu0 }
 0x956   :  { %8760 = vrsqrt.f32 %v3028_v0  ;;  %v3026_v13 = vmul.f32 0.0078125, %v7253_v4  ;;  %v3013_v22 = vpop.f32.mrb[15].mxu0 }
 0x957   :  { %8762 = vrsqrt.f32 %v3027_v6  ;;  %v3025_v10 = vmul.f32 0.0078125, %v3013_v22  ;;  %v9686_v6 = vld [vmem:[#allocation2 + $0x38] sm:$0xff] }
 0x958   :  { %v3030_v9 = vadd.f32 1e-05, %v3026_v13 }
 0x959   :  { %v3029_v49 = vadd.f32 1e-05, %v3025_v10  ;;  %v6760_v10 = vld [vmem:[#allocation18 + $0x4] ss:$0 sm:$0xff] }
 0x95a   :  { %8764 = vrsqrt.f32 %v3030_v9 }
 0x95b   :  { %8766 = vrsqrt.f32 %v3029_v49 }
 0x960   :  { %v8761_v63 = vpop.eup %8760 }
 0x961   :  { %v8763_v62 = vpop.eup %8762  ;;  %v3040_v14 = vmul.f32 %v8761_v63, %v3036_v55 }
 0x962   :  { %v3039_v1 = vmul.f32 %v8763_v62, %v3035_v58 }
 0x963   :  { %3050 = vperm.xlu0 %8718, %v3040_v14  }
 0x964   :  { %v8765_v15 = vpop.eup %8764  ;;  %3045 = vperm.xlu1 %8719, %v3039_v1  }
 0x965   :  { %v8767_v5 = vpop.eup %8766  ;;  %v3042_v7 = vmul.f32 %v8765_v15, %v3038_v2 }
 0x966   :  { %v3041_v8 = vmul.f32 %v8767_v5, %v3037_v3 }
 0x968   :  { %3060 = vperm.xlu1 %8719, %v3042_v7   ;;  %3055 = vperm.xlu0 %8718, %v3041_v8  }
 0x96c   :  { %3088 = vperm.xlu1 %8719, %v3070_v12   ;;  %3083 = vperm.xlu0 %8718, %v3069_v11  }
 0x970   :  { %3226 = vrot.lane.b32.xlu1 %v6759_v47, %s9112_s7  ;;  %3131 = vrot.lane.b32.xlu0 %v6757_v17, %s9113_s6 }
 0x974   :  { %3354 = vrot.lane.b32.xlu1 %v6762_v19, %s9114_s9  ;;  %3317 = vrot.lane.b32.xlu0 %v6761_v20, %s9115_s26 }
 0x978   :  { %3114 = vrot.lane.b32.xlu1 %v6756_v21, %s9116_s8  ;;  %3407 = vrot.lane.b32.xlu0 %v6763_v23, %s9117_s22 }
 0x97c   :  { %3209 = vrot.lane.b32.xlu0 %v6758_v24, %s9118_s14 }
 0x9e2   :  { %v3051_v27 = vpop.permute.xlu0 %3050 }
 0x9e3   :  { %v3064_v30 = vmul.f32 %v3051_v27, %v9567_v46  ;;  %v3046_v31 = vpop.permute.xlu1 %3045 }
 0x9e4   :  { %v3063_v32 = vmul.f32 %v3046_v31, %v9570_v52  ;;  %v3121_v52 = vld [vmem:[#allocation2 + $0x8] sm:$0xff] }
 0x9e5   :  { %v3092_v33 = vadd.f32 %v3079_v26, %v3064_v30 }
 0x9e6   :  { %v3091_v34 = vadd.f32 %v3074_v25, %v3063_v32 }
 0x9e7   :  { %v3096_v56 = vmax.f32 %v3092_v33, 0.0  ;;  %v3056_v36 = vpop.permute.xlu0 %3055  ;;  %v3061_v37 = vpop.permute.xlu1 %3060 }
 0x9e8   :  { %v3095_v38 = vmax.f32 %v3091_v34, 0.0  ;;  %v3065_v39 = vmul.f32 %v3056_v36, %v9576_v57  ;;  %v3066_v40 = vmul.f32 %v3061_v37, %v9582_v59  ;;  %v3122_v59 = vld [vmem:[#allocation2 + $0x18] sm:$0xff] }
 0x9e9   :  { %3101 = vst.msk [vmem:[#allocation2 + $0x10] sm:$0xff] %vm3099_vm8, %v3096_v56 }
 0x9ea   :  { %3100 = vst.msk [vmem:[#allocation2] sm:$0xff] %vm3099_vm8, %v3095_v38 }
 0x9eb   :  { %v3084_v41 = vpop.permute.xlu0 %3083  ;;  %v3089_v46 = vpop.permute.xlu1 %3088 }
 0x9ec   :  { %v3093_v42 = vadd.f32 %v3084_v41, %v3065_v39  ;;  %v3094_v43 = vadd.f32 %v3089_v46, %v3066_v40 }
 0x9ee   :  { %v3097_v44 = vmax.f32 %v3093_v42, 0.0  ;;  %v3098_v45 = vmax.f32 %v3094_v43, 0.0 }
 0x9ef   :  { %v9662_v51 = vpop.permute.xlu0 %3131  ;;  %v9664_v53 = vpop.permute.xlu1 %3226 }
 0x9f0   :  { %3102 = vst.msk [vmem:[#allocation2 + $0x20] sm:$0xff] %vm3099_vm8, %v3097_v44  ;;  %3103 = vst.msk [vmem:[#allocation2 + $0x30] sm:$0xff] %vm3099_vm8, %v3098_v45  ;;  %v3135_v54 = vmul.f32 %v9662_v51, %v3121_v52  ;;  %v3230_v57 = vmul.f32 %v9664_v53, %v3121_v52  ;;  %v3232_v35 = vmul.f32 %v9664_v53, %v3122_v59  ;;  %v9676_v28 = vld [vmem:[#allocation2 + $0x10] sm:$0xff] }
 0x9f1   :  { %v3137_v16 = vmul.f32 %v9662_v51, %v3122_v59  ;;  %v3139_v60 = vmul.f32 %v9662_v51, %v9674_v18  ;;  %v3136_v61 = vmul.f32 %v9662_v51, %v9676_v28  ;;  %v3141_v4 = vmul.f32 %v9662_v51, %v9686_v6  ;;  %v9699_v49 = vld [vmem:[#allocation2] sm:$0xff] }
 0x9f2   :  { %3152 = vrot.lane.b32.xlu1 %v3135_v54, %s9119_s23  ;;  %3247 = vrot.lane.b32.xlu0 %v3230_v57, %s9120_s3  ;;  %v3234_v55 = vmul.f32 %v9664_v53, %v9674_v18  ;;  %v3134_v58 = vmul.f32 %v9662_v51, %v9699_v49  ;;  %v3236_v63 = vmul.f32 %v9664_v53, %v9686_v6 }
 0x9f3   :  { %v9680_v29 = vpop.permute.xlu0 %3317  ;;  %v3355_v0 = vpop.permute.xlu1 %3354  ;;  %v3231_v21 = vmul.f32 %v9664_v53, %v9676_v28  ;;  %v3229_v26 = vmul.f32 %v9664_v53, %v9699_v49 }
 0x9f4   :  { %v3359_v13 = vmul.f32 %v3355_v0, %v9676_v28  ;;  %v3320_v62 = vmul.f32 %v9680_v29, %v9699_v49  ;;  %v3358_v14 = vmul.f32 %v3355_v0, %v3121_v52  ;;  %v3357_v1 = vmul.f32 %v3355_v0, %v9699_v49 }
 0x9f5   :  { %v3360_v2 = vmul.f32 %v3355_v0, %v3122_v59  ;;  %v3362_v11 = vmul.f32 %v3355_v0, %v9674_v18  ;;  %v3364_v19 = vmul.f32 %v3355_v0, %v9686_v6  ;;  %v3321_v24 = vmul.f32 %v9680_v29, %v9676_v28 }
 0x9f6   :  { %3156 = vrot.lane.b32.xlu1 %v3137_v16, %s9119_s23  ;;  %3251 = vrot.lane.b32.xlu0 %v3232_v35, %s9120_s3 }
 0x9f7   :  { %v9693_v22 = vpop.permute.xlu0 %3407  ;;  %v9720_v15 = vld [vmem:[#allocation2 + $0x30] sm:$0xff]  ;;  %v9736_v17 = vld [vmem:[#allocation2 + $0x20] sm:$0xff]  ;;  %v3115_v56 = vpop.permute.xlu1 %3114 }
 0x9f8   :  { %v3412_v9 = vmul.f32 %v9693_v22, %v9676_v28  ;;  %v3410_v3 = vmul.f32 %v9693_v22, %v9699_v49  ;;  %v3411_v5 = vmul.f32 %v9693_v22, %v3121_v52  ;;  %v3140_v7 = vmul.f32 %v9662_v51, %v9720_v15 }
 0x9f9   :  { %v3413_v8 = vmul.f32 %v9693_v22, %v3122_v59  ;;  %v3235_v12 = vmul.f32 %v9664_v53, %v9720_v15  ;;  %v3363_v47 = vmul.f32 %v3355_v0, %v9720_v15  ;;  %v3138_v20 = vmul.f32 %v9662_v51, %v9736_v17 }
 0x9fa   :  { %3160 = vrot.lane.b32.xlu1 %v3139_v60, %s9119_s23  ;;  %3154 = vrot.lane.b32.xlu0 %v3136_v61, %s9119_s23  ;;  %v3233_v23 = vmul.f32 %v9664_v53, %v9736_v17  ;;  %v3322_v25 = vmul.f32 %v9680_v29, %v9736_v17  ;;  %v3361_v27 = vmul.f32 %v3355_v0, %v9736_v17 }
 0x9fb   :  { %v3415_v30 = vmul.f32 %v9693_v22, %v9674_v18  ;;  %v3414_v31 = vmul.f32 %v9693_v22, %v9736_v17  ;;  %v3323_v32 = vmul.f32 %v9680_v29, %v9720_v15  ;;  %v3416_v33 = vmul.f32 %v9693_v22, %v9720_v15  ;;  %v9777_v36 = vpop.permute.xlu0 %3209 }
 0x9fc   :  { %v3417_v34 = vmul.f32 %v9693_v22, %v9686_v6  ;;  %v3118_v46 = vmul.f32 %v3115_v56, %v9676_v28  ;;  %v3117_v57 = vmul.f32 %v3115_v56, %v9699_v49 }
 0x9fe   :  { %3164 = vrot.lane.b32.xlu1 %v3141_v4, %s9119_s23  ;;  %3377 = vrot.lane.b32.xlu0 %v3359_v13, %s9120_s3  ;;  %v3120_v13 = vmul.f32 %v3115_v56, %v9720_v15 }
 0xa02   :  { %3304 = vrot.lane.b32.xlu1 %v6760_v10, %s9121_s29  ;;  %3430 = vrot.lane.b32.xlu0 %v3412_v9, %s9122_s16 }
 0xa06   :  { %3255 = vrot.lane.b32.xlu1 %v3234_v55, %s9120_s3  ;;  %3150 = vrot.lane.b32.xlu0 %v3134_v58, %s9119_s23 }
 0xa0a   :  { %3259 = vrot.lane.b32.xlu1 %v3236_v63, %s9120_s3  ;;  %3328 = vrot.lane.b32.xlu0 %v3320_v62, %s9119_s23 }
 0xa0e   :  { %3375 = vrot.lane.b32.xlu1 %v3358_v14, %s9120_s3  ;;  %3373 = vrot.lane.b32.xlu0 %v3357_v1, %s9120_s3  ;;  %v3119_v1 = vmul.f32 %v3115_v56, %v9736_v17 }
 0xa12   :  { %3379 = vrot.lane.b32.xlu1 %v3360_v2, %s9120_s3  ;;  %3426 = vrot.lane.b32.xlu0 %v3410_v3, %s9122_s16 }
 0xa16   :  { %3428 = vrot.lane.b32.xlu1 %v3411_v5, %s9122_s16  ;;  %3162 = vrot.lane.b32.xlu0 %v3140_v7, %s9119_s23 }
 0xa1a   :  { %3432 = vrot.lane.b32.xlu1 %v3413_v8, %s9122_s16  ;;  %3257 = vrot.lane.b32.xlu0 %v3235_v12, %s9120_s3  ;;  %v3213_v8 = vmul.f32 %v9777_v36, %v9676_v28 }
 0xa1e   :  { %3383 = vrot.lane.b32.xlu1 %v3362_v11, %s9120_s3  ;;  %3385 = vrot.lane.b32.xlu0 %v3363_v47, %s9120_s3 }
 0xa22   :  { %3387 = vrot.lane.b32.xlu1 %v3364_v19, %s9120_s3  ;;  %3158 = vrot.lane.b32.xlu0 %v3138_v20, %s9119_s23 }
 0xa26   :  { %3249 = vrot.lane.b32.xlu1 %v3231_v21, %s9120_s3  ;;  %3253 = vrot.lane.b32.xlu0 %v3233_v23, %s9120_s3  ;;  %v3215_v21 = vmul.f32 %v9777_v36, %v9720_v15 }
 0xa2a   :  { %3330 = vrot.lane.b32.xlu1 %v3321_v24, %s9119_s23  ;;  %3332 = vrot.lane.b32.xlu0 %v3322_v25, %s9119_s23 }
 0xa2e   :  { %3245 = vrot.lane.b32.xlu1 %v3229_v26, %s9120_s3  ;;  %3381 = vrot.lane.b32.xlu0 %v3361_v27, %s9120_s3 }
 0xa32   :  { %3436 = vrot.lane.b32.xlu1 %v3415_v30, %s9122_s16  ;;  %3434 = vrot.lane.b32.xlu0 %v3414_v31, %s9122_s16 }
 0xa36   :  { %3334 = vrot.lane.b32.xlu1 %v3323_v32, %s9119_s23  ;;  %3438 = vrot.lane.b32.xlu0 %v3416_v33, %s9122_s16  ;;  %v3212_v33 = vmul.f32 %v9777_v36, %v9699_v49 }
 0xa3a   :  { %3440 = vrot.lane.b32.xlu1 %v3417_v34, %s9122_s16 }
 0xa64   :  { %v9779_v37 = vpop.permute.xlu0 %3247  ;;  %v3153_v38 = vpop.permute.xlu1 %3152 }
 0xa68   :  { %v3252_v39 = vpop.permute.xlu0 %3251  ;;  %v3157_v40 = vpop.permute.xlu1 %3156 }
 0xa6c   :  { %v3155_v41 = vpop.permute.xlu0 %3154  ;;  %v3161_v42 = vpop.permute.xlu1 %3160 }
 0xa6d   :  { %v3168_v43 = vsel %vm3166_vm9, %v3155_v41, %v3157_v40 }
 0xa6e   :  { %v3176_v52 = vadd.f32 %v3168_v43, %v3118_v46  ;;  %v3214_v46 = vmul.f32 %v9777_v36, %v9736_v17 }
 0xa70   :  { %v3378_v44 = vpop.permute.xlu0 %3377  ;;  %3185 = vrot.lane.b32.xlu1 %v3176_v52, %s9123_s1  ;;  %v3165_v45 = vpop.permute.xlu1 %3164 }
 0xa74   :  { %v3431_v51 = vpop.permute.xlu0 %3430  ;;  %v9784_v53 = vpop.permute.xlu1 %3304 }
 0xa75   :  { %v3308_v20 = vmul.f32 %v9784_v53, %v9676_v28  ;;  %v3307_v41 = vmul.f32 %v9784_v53, %v9699_v49 }
 0xa78   :  { %v3151_v54 = vpop.permute.xlu0 %3150  ;;  %v3256_v59 = vpop.permute.xlu1 %3255 }
 0xa79   :  { %v3167_v35 = vsel %vm3166_vm9, %v3151_v54, %v3153_v38 }
 0xa7a   :  { %v3175_v16 = vadd.f32 %v3167_v35, %v3117_v57  ;;  %v3309_v57 = vmul.f32 %v9784_v53, %v9736_v17 }
 0xa7c   :  { %v3329_v18 = vpop.permute.xlu0 %3328  ;;  %3183 = vrot.lane.b32.xlu0 %v3175_v16, %s9123_s1  ;;  %v3260_v29 = vpop.permute.xlu1 %3259 }
 0xa7d   :  { %v3340_v52 = vadd.f32 %v3329_v18, %v3307_v41 }
 0xa80   :  { %v3374_v60 = vpop.permute.xlu0 %3373  ;;  %v3376_v61 = vpop.permute.xlu1 %3375 }
 0xa81   :  { %v3389_v43 = vsel %vm3261_vm10, %v3374_v60, %v3376_v61 }
 0xa82   :  { %v3397_v54 = vadd.f32 %v3389_v43, %v3340_v52 }
 0xa84   :  { %v3427_v0 = vpop.permute.xlu0 %3426  ;;  %v3380_v6 = vpop.permute.xlu1 %3379 }
 0xa85   :  { %v3390_v26 = vsel %vm3261_vm10, %v3378_v44, %v3380_v6 }
 0xa88   :  { %v3163_v4 = vpop.permute.xlu0 %3162  ;;  %v3429_v22 = vpop.permute.xlu1 %3428 }
 0xa89   :  { %v3170_v10 = vsel %vm3166_vm9, %v3163_v4, %v3165_v45  ;;  %v3443_v45 = vsel %vm3442_vm11, %v3427_v0, %v3429_v22 }
 0xa8a   :  { %v3178_v9 = vadd.f32 %v3170_v10, %v3120_v13  ;;  %v3451_v16 = vadd.f32 %v3443_v45, %v3397_v54  ;;  %v8720_v10 = vpack.i.bf16 %v9676_v28, %v9699_v49 }
 0xa8c   :  { %v3258_v55 = vpop.permute.xlu0 %3257  ;;  %3189 = vrot.lane.b32.xlu1 %v3178_v9, %s9123_s1  ;;  %v3433_v58 = vpop.permute.xlu1 %3432  ;;  %v8725_v9 = vpack.i.bf16 %v9720_v15, %v9736_v17 }
 0xa8d   :  { %v3265_v19 = vsel %vm3261_vm10, %v3258_v55, %v3260_v29  ;;  %v3444_v31 = vsel %vm3442_vm11, %v3431_v51, %v3433_v58  ;;  %v3310_v51 = vmul.f32 %v9784_v53, %v9720_v15 }
 0xa8e   :  { %v3273_v27 = vadd.f32 %v3265_v19, %v3215_v21 }
 0xa90   :  { %v3386_v63 = vpop.permute.xlu0 %3385  ;;  %v3384_v62 = vpop.permute.xlu1 %3383 }
 0xa94   :  { %v3159_v14 = vpop.permute.xlu0 %3158  ;;  %v3388_v2 = vpop.permute.xlu1 %3387 }
 0xa95   :  { %v3169_v3 = vsel %vm3166_vm9, %v3159_v14, %v3161_v42  ;;  %v3392_v18 = vsel %vm3261_vm10, %v3386_v63, %v3388_v2 }
 0xa96   :  { %v3177_v5 = vadd.f32 %v3169_v3, %v3119_v1 }
 0xa98   :  { %v3254_v7 = vpop.permute.xlu0 %3253  ;;  %3187 = vrot.lane.b32.xlu0 %v3177_v5, %s9123_s1  ;;  %v3250_v12 = vpop.permute.xlu1 %3249  ;;  %s9129_s1 = smov 85  }
 0xa99   :  { %v3263_v11 = vsel %vm3261_vm10, %v3250_v12, %v3252_v39  ;;  %v3264_v40 = vsel %vm3261_vm10, %v3254_v7, %v3256_v59 }
 0xa9a   :  { %v3271_v47 = vadd.f32 %v3263_v11, %v3213_v8  ;;  %v3272_v44 = vadd.f32 %v3264_v40, %v3214_v46 }
 0xa9c   :  { %v3333_v23 = vpop.permute.xlu0 %3332  ;;  %3280 = vrot.lane.b32.xlu1 %v3271_v47, %s9124_s25  ;;  %v3331_v24 = vpop.permute.xlu1 %3330 }
 0xa9d   :  { %v3341_v25 = vadd.f32 %v3331_v24, %v3308_v20  ;;  %v3342_v29 = vadd.f32 %v3333_v23, %v3309_v57 }
 0xa9f   :  { %v3398_v30 = vadd.f32 %v3390_v26, %v3341_v25 }
 0xaa0   :  { %v3382_v32 = vpop.permute.xlu0 %3381  ;;  %3284 = vrot.lane.b32.xlu1 %v3273_v27, %s9124_s25  ;;  %v3246_v34 = vpop.permute.xlu1 %3245 }
 0xaa1   :  { %v3262_v56 = vsel %vm3261_vm10, %v3246_v34, %v9779_v37  ;;  %v3452_v38 = vadd.f32 %v3444_v31, %v3398_v30  ;;  %v3391_v59 = vsel %vm3261_vm10, %v3382_v32, %v3384_v62  ;;  %v3475_v31 = vld [vmem:[#allocation15] sm:$0xff] }
 0xaa2   :  { %v3270_v39 = vadd.f32 %v3262_v56, %v3212_v33  ;;  %v3399_v0 = vadd.f32 %v3391_v59, %v3342_v29  ;;  %7286 = vmatprep.mubr.f32.mxu1 %v3475_v31 }
 0xaa4   :  { %3461 = vrot.lane.b32.xlu1 %v3452_v38, %s9125_s4  ;;  %3278 = vrot.lane.b32.xlu0 %v3270_v39, %s9124_s25  ;;  %v3437_v42 = vpop.permute.xlu1 %3436  ;;  %v3435_v37 = vpop.permute.xlu0 %3434 }
 0xaa5   :  { %v3445_v60 = vsel %vm3442_vm11, %v3435_v37, %v3437_v42 }
 0xaa6   :  { %v3453_v53 = vadd.f32 %v3445_v60, %v3399_v0 }
 0xaa8   :  { %3282 = vrot.lane.b32.xlu0 %v3272_v44, %s9124_s25  ;;  %v3335_v36 = vpop.permute.xlu1 %3334  ;;  %v3439_v6 = vpop.permute.xlu0 %3438 }
 0xaa9   :  { %v3343_v35 = vadd.f32 %v3335_v36, %v3310_v51 }
 0xaab   :  { %v3400_v61 = vadd.f32 %v3392_v18, %v3343_v35 }
 0xaac   :  { %3459 = vrot.lane.b32.xlu0 %v3451_v16, %s9125_s4  ;;  %v3441_v4 = vpop.permute.xlu1 %3440 }
 0xaad   :  { %v3446_v13 = vsel %vm3442_vm11, %v3439_v6, %v3441_v4 }
 0xaae   :  { %v3454_v22 = vadd.f32 %v3446_v13, %v3400_v61 }
 0xab0   :  { %3463 = vrot.lane.b32.xlu0 %v3453_v53, %s9125_s4  ;;  %3465 = vrot.lane.b32.xlu1 %v3454_v22, %s9125_s4  ;;  %s9130_s4 = smov 69  }
 0xab4   :  { %8721 = vrot.lane.b32.xlu0 %v8720_v10, %s9095_s27  ;;  %8726 = vrot.lane.b32.xlu1 %v8725_v9, %s9095_s27 }
 0xae2   :  { %v3186_v55 = vpop.permute.xlu1 %3185 }
 0xae3   :  { %3196 = vst.msk [vmem:[#allocation2 + $0x50] sm:$0xff] %vm3099_vm8, %v3186_v55 }
 0xaea   :  { %v3488_v62 = vld [vmem:[#allocation2 + $0x50] sm:$0xff] }
 0xaee   :  { %v3184_v58 = vpop.permute.xlu0 %3183 }
 0xaef   :  { %3195 = vst.msk [vmem:[#allocation2 + $0x40] sm:$0xff] %vm3099_vm8, %v3184_v58  ;;  %v3476_v58 = vld [vmem:[#allocation15 + $0x8] sm:$0xff] }
 0xaf6   :  { %v3487_v63 = vld [vmem:[#allocation2 + $0x40] sm:$0xff] }
 0xaf7   :  { %v8730_v14 = vpack.i.bf16 %v3488_v62, %v3487_v63  ;;  %v3477_v63 = vld [vmem:[#allocation15 + $0x10] sm:$0xff]  ;;  %v3478_v62 = vld [vmem:[#allocation15 + $0x18] sm:$0xff] }
 0xaf9   :  { %8731 = vrot.lane.b32.xlu0 %v8730_v14, %s9095_s27  ;;  %v3479_v14 = vld [vmem:[#allocation15 + $0x20] sm:$0xff] }
 0xafe   :  { %v3190_v1 = vpop.permute.xlu1 %3189 }
 0xaff   :  { %3198 = vst.msk [vmem:[#allocation2 + $0x70] sm:$0xff] %vm3099_vm8, %v3190_v1  ;;  %v3480_v1 = vld [vmem:[#allocation15 + $0x28] sm:$0xff] }
 0xb06   :  { %v3490_v2 = vld [vmem:[#allocation2 + $0x70] sm:$0xff] }
 0xb0a   :  { %v3188_v28 = vpop.permute.xlu0 %3187 }
 0xb0b   :  { %3197 = vst.msk [vmem:[#allocation2 + $0x60] sm:$0xff] %vm3099_vm8, %v3188_v28  ;;  %v3481_v28 = vld [vmem:[#allocation15 + $0x30] sm:$0xff] }
 0xb0e   :  { %v3281_v49 = vpop.permute.xlu1 %3280 }
 0xb0f   :  { %3291 = vst.msk [vmem:[#allocation2 + $0x90] sm:$0xff] %vm3099_vm8, %v3281_v49  ;;  %v3482_v49 = vld [vmem:[#allocation15 + $0x38] sm:$0xff] }
 0xb12   :  { %v3285_v15 = vpop.permute.xlu1 %3284  ;;  %v3489_v17 = vld [vmem:[#allocation2 + $0x60] sm:$0xff] }
 0xb13   :  { %3293 = vst.msk [vmem:[#allocation2 + $0xb0] sm:$0xff] %vm3099_vm8, %v3285_v15  ;;  %v8735_v3 = vpack.i.bf16 %v3490_v2, %v3489_v17 }
 0xb15   :  { %8736 = vrot.lane.b32.xlu1 %v8735_v3, %s9095_s27 }
 0xb16   :  { %v3279_v5 = vpop.permute.xlu0 %3278  ;;  %v3462_v7 = vpop.permute.xlu1 %3461  ;;  %v3492_v47 = vld [vmem:[#allocation2 + $0x90] sm:$0xff] }
 0xb17   :  { %3290 = vst.msk [vmem:[#allocation2 + $0x80] sm:$0xff] %vm3099_vm8, %v3279_v5  ;;  %3472 = vst.msk [vmem:[#allocation2 + $0xd0] sm:$0xff] %vm3099_vm8, %v3462_v7 }
 0xb1a   :  { %v3283_v8 = vpop.permute.xlu0 %3282  ;;  %v3494_v24 = vld [vmem:[#allocation2 + $0xb0] sm:$0xff] }
 0xb1b   :  { %3292 = vst.msk [vmem:[#allocation2 + $0xa0] sm:$0xff] %vm3099_vm8, %v3283_v8 }
 0xb1e   :  { %v3460_v12 = vpop.permute.xlu0 %3459  ;;  %v3491_v11 = vld [vmem:[#allocation2 + $0x80] sm:$0xff]  ;;  %v3496_v38 = vld [vmem:[#allocation2 + $0xd0] sm:$0xff] }
 0xb1f   :  { %3471 = vst.msk [vmem:[#allocation2 + $0xc0] sm:$0xff] %vm3099_vm8, %v3460_v12  ;;  %v8740_v19 = vpack.i.bf16 %v3492_v47, %v3491_v11 }
 0xb21   :  { %8741 = vrot.lane.b32.xlu0 %v8740_v19, %s9095_s27 }
 0xb22   :  { %v3464_v20 = vpop.permute.xlu0 %3463  ;;  %v3466_v21 = vpop.permute.xlu1 %3465  ;;  %v3493_v23 = vld [vmem:[#allocation2 + $0xa0] sm:$0xff] }
 0xb23   :  { %3473 = vst.msk [vmem:[#allocation2 + $0xe0] sm:$0xff] %vm3099_vm8, %v3464_v20  ;;  %3474 = vst.msk [vmem:[#allocation2 + $0xf0] sm:$0xff] %vm3099_vm8, %v3466_v21  ;;  %v8745_v25 = vpack.i.bf16 %v3494_v24, %v3493_v23 }
 0xb25   :  { %8746 = vrot.lane.b32.xlu1 %v8745_v25, %s9095_s27 }
 0xb26   :  { %v8722_v26 = vpop.permute.xlu0 %8721  ;;  %v8727_v27 = vpop.permute.xlu1 %8726  ;;  %v3495_v30 = vld [vmem:[#allocation2 + $0xc0] sm:$0xff] }
 0xb27   :  { %v8724_v32 = vunpack.i.h.bf16 %v8722_v26  ;;  %v8723_v33 = vunpack.i.l.bf16 %v8722_v26  ;;  %v8729_v34 = vunpack.i.h.bf16 %v8727_v27  ;;  %v8728_v56 = vunpack.i.l.bf16 %v8727_v27  ;;  %v3692_v26 = vld [vmem:[#allocation17] sm:$0xff] }
 0xb28   :  { %v8750_v39 = vpack.i.bf16 %v3496_v38, %v3495_v30  ;;  %v3701_v27 = vsel %vm1606_vm6, %v3692_v26, 0 }
 0xb29   :  { %v8306_v40 = vpack.c.bf16 %v8724_v32, %v8723_v33  ;;  %v8310_v43 = vpack.c.bf16 %v8729_v34, %v8728_v56  ;;  %v9885_v30 = vand.u32 4294901760, %v3701_v27  ;;  %v3693_v56 = vld [vmem:[#allocation17 + $0x8] sm:$0xff] }
 0xb2a   :  { %8751 = vrot.lane.b32.xlu0 %v8750_v39, %s9095_s27  ;;  %v3497_v41 = vld [vmem:[#allocation2 + $0xe0] sm:$0xff]  ;;  %v3498_v46 = vld [vmem:[#allocation2 + $0xf0] sm:$0xff]  ;;  %v3704_v38 = vsel %vm1606_vm6, %v3693_v56, 0 }
 0xb2b   :  { %8307 = vmatprep.subr.bf16.mxu1 %v8306_v40  ;;  %v8755_v42 = vpack.i.bf16 %v3498_v46, %v3497_v41  ;;  %v9888_v31 = vsub.f32 %v3701_v27, %v9885_v30  ;;  %v9896_v46 = vand.u32 4294901760, %v3704_v38 }
 0xb2c   :  { %8309 = vmatpush3.bf16.msra.mxu1 %v8306_v40 }
 0xb2d   :  { %8756 = vrot.lane.b32.xlu1 %v8755_v42, %s9095_s27  ;;  %8311 = vmatprep.subr.bf16.mxu1 %v8310_v43  ;;  %v9891_v32 = vand.u32 4294901760, %v9888_v31  ;;  %v3694_v42 = vld [vmem:[#allocation17 + $0x10] sm:$0xff] }
 0xb2f   :  { %v3800_v33 = vsub.f32 %v9888_v31, %v9891_v32 }
 0xb30   :  { %8313 = vmatpush3.bf16.msra.mxu1 %v8310_v43 }
 0xb31   :  { %v3801_v34 = vand.u32 4294901760, %v3800_v33 }
 0xb33   :  { %7314 = vmatprep.mubr.f32.mxu0 %v3801_v34 }
 0xb6b   :  { %v8732_v52 = vpop.permute.xlu0 %8731 }
 0xb6c   :  { %v8734_v44 = vunpack.i.h.bf16 %v8732_v52  ;;  %v8733_v37 = vunpack.i.l.bf16 %v8732_v52  ;;  %v3695_v52 = vld [vmem:[#allocation17 + $0x18] sm:$0xff] }
 0xb6e   :  { %v8314_v45 = vpack.c.bf16 %v8734_v44, %v8733_v37  ;;  %v3707_v37 = vsel %vm1606_vm6, %v3694_v42, 0 }
 0xb70   :  { %8315 = vmatprep.subr.bf16.mxu1 %v8314_v45 }
 0xb71   :  { %8317 = vmatpush3.bf16.msra.mxu1 %v8314_v45 }
 0xb87   :  { %v8737_v51 = vpop.permute.xlu1 %8736 }
 0xb88   :  { %v8739_v54 = vunpack.i.h.bf16 %v8737_v51  ;;  %v8738_v57 = vunpack.i.l.bf16 %v8737_v51 }
 0xb8a   :  { %v8318_v36 = vpack.c.bf16 %v8739_v54, %v8738_v57  ;;  %v9904_v54 = vsub.f32 %v3704_v38, %v9896_v46  ;;  %v3696_v57 = vld [vmem:[#allocation17 + $0x20] sm:$0xff] }
 0xb8c   :  { %8319 = vmatprep.subr.bf16.mxu1 %v8318_v36 }
 0xb8d   :  { %8321 = vmatpush3.bf16.msra.mxu1 %v8318_v36 }
 0xb93   :  { %v8742_v59 = vpop.permute.xlu0 %8741 }
 0xb94   :  { %v8744_v35 = vunpack.i.h.bf16 %v8742_v59  ;;  %v8743_v16 = vunpack.i.l.bf16 %v8742_v59  ;;  %v3710_v59 = vsel %vm1606_vm6, %v3695_v52, 0 }
 0xb96   :  { %v8322_v18 = vpack.c.bf16 %v8744_v35, %v8743_v16  ;;  %v9911_v16 = vand.u32 4294901760, %v3707_v37 }
 0xb97   :  { %v8747_v29 = vpop.permute.xlu1 %8746 }
 0xb98   :  { %v8749_v60 = vunpack.i.h.bf16 %v8747_v29  ;;  %v8748_v61 = vunpack.i.l.bf16 %v8747_v29  ;;  %8323 = vmatprep.subr.bf16.mxu1 %v8322_v18  ;;  %v3713_v29 = vsel %vm1606_vm6, %v3696_v57, 0 }
 0xb99   :  { %8325 = vmatpush3.bf16.msra.mxu1 %v8322_v18  ;;  %v3697_v18 = vld [vmem:[#allocation17 + $0x28] sm:$0xff] }
 0xb9a   :  { %v8326_v0 = vpack.c.bf16 %v8749_v60, %v8748_v61 }
 0xb9c   :  { %v8752_v6 = vpop.permute.xlu0 %8751  ;;  %8327 = vmatprep.subr.bf16.mxu1 %v8326_v0 }
 0xb9d   :  { %v8754_v4 = vunpack.i.h.bf16 %v8752_v6  ;;  %v8753_v13 = vunpack.i.l.bf16 %v8752_v6  ;;  %8329 = vmatpush3.bf16.msra.mxu1 %v8326_v0  ;;  %v9916_v6 = vand.u32 4294901760, %v9904_v54 }
 0xb9f   :  { %v8757_v53 = vpop.permute.xlu1 %8756  ;;  %v8330_v22 = vpack.c.bf16 %v8754_v4, %v8753_v13  ;;  %v9918_v4 = vand.u32 4294901760, %v3710_v59  ;;  %v3698_v13 = vld [vmem:[#allocation17 + $0x30] sm:$0xff] }
 0xba0   :  { %v8759_v10 = vunpack.i.h.bf16 %v8757_v53  ;;  %v8758_v9 = vunpack.i.l.bf16 %v8757_v53 }
 0xba1   :  { %8331 = vmatprep.subr.bf16.mxu1 %v8330_v22 }
 0xba2   :  { %8333 = vmatpush3.bf16.msra.mxu1 %v8330_v22  ;;  %v8334_v55 = vpack.c.bf16 %v8759_v10, %v8758_v9  ;;  %v3716_v10 = vsel %vm1606_vm6, %v3697_v18, 0 }
 0xba4   :  { %8335 = vmatprep.subr.bf16.mxu1 %v8334_v55 }
 0xba6   :  { %8337 = vmatpush3.bf16.msra.mxu1 %v8334_v55  ;;  %v9925_v55 = vsub.f32 %v3707_v37, %v9911_v16 }
 0xba8   :  { %v9953_v33 = vand.u32 4294901760, %v9925_v55 }
 0xba9   :  { %7287 = vmatmul.mubr.f32.vlgmr.msra.gmra.mrb[10].mxu1 %v3476_v58  ;;  %v9927_v58 = vand.u32 4294901760, %v3713_v29 }
 0xbaa   :  { %7289 = vmatprep.mubr.f32.mxu1 %v3477_v63  ;;  %v3699_v63 = vld [vmem:[#allocation17 + $0x38] sm:$0xff] }
 0xbab   :  { %v3722_v26 = vsel %vm1606_vm6, %v3699_v63, 0 }
 0xbad   :  { %7290 = vmatmul.mubr.f32.gmra.mrb[12].mxu1 %v3478_v62 }
 0xbae   :  { %7292 = vmatprep.mubr.f32.mxu1 %v3479_v14 }
 0xbb1   :  { %7293 = vmatmul.mubr.f32.gmra.mrb[14].mxu1 %v3480_v1 }
 0xbb2   :  { %7295 = vmatprep.mubr.f32.mxu1 %v3481_v28  ;;  %v3719_v28 = vsel %vm1606_vm6, %v3698_v13, 0 }
 0xbb3   :  { %v9958_v56 = vand.u32 4294901760, %v3719_v28 }
 0xbb5   :  { %7296 = vmatmul.mubr.f32.gmra.mrb[16].mxu1 %v3482_v49  ;;  %v9989_v13 = vsub.f32 %v3719_v28, %v9958_v56 }
 0xbb6   :  { %7482 = vmatprep.mubr.f32.mxu1 %v3801_v34  ;;  %v9956_v34 = vsub.f32 %v3713_v29, %v9927_v58 }
 0xc7c   :  { %v9852_v15 = vpop.f32.mrb[10].mxu1 }
 0xc7d   :  { %v9854_v17 = vpop.f32.mrb[11].mxu1  ;;  %v3671_v2 = vsel %vm1606_vm6, %v9852_v15, 0.0 }
 0xc7e   :  { %3672 = vadd.xlane.f32.xlu1 %v3671_v2  ;;  %v3668_v3 = vsel %vm1606_vm6, %v9854_v17, 0.0 }
 0xc7f   :  { %3669 = vadd.xlane.f32.xlu0 %v3668_v3 }
 0xc80   :  { %v9860_v5 = vpop.f32.mrb[12].mxu1 }
 0xc81   :  { %v9862_v7 = vpop.f32.mrb[13].mxu1  ;;  %v3677_v8 = vsel %vm1606_vm6, %v9860_v5, 0.0 }
 0xc82   :  { %v3674_v47 = vsel %vm1606_vm6, %v9862_v7, 0.0 }
 0xc83   :  { %3678 = vadd.xlane.f32.xlu0 %v3677_v8  ;;  %v3810_v8 = vsub.f32 %v9904_v54, %v9916_v6 }
 0xc84   :  { %v9866_v12 = vpop.f32.mrb[14].mxu1 }
 0xc85   :  { %v9868_v11 = vpop.f32.mrb[15].mxu1  ;;  %v3683_v21 = vsel %vm1606_vm6, %v9866_v12, 0.0 }
 0xc86   :  { %v3680_v19 = vsel %vm1606_vm6, %v9868_v11, 0.0 }
 0xc87   :  { %3675 = vadd.xlane.f32.xlu0 %v3674_v47  ;;  %3681 = vadd.xlane.f32.xlu1 %v3680_v19  ;;  %v9940_v47 = vsub.f32 %v3710_v59, %v9918_v4  ;;  %v9942_v19 = vand.u32 4294901760, %v3716_v10 }
 0xc88   :  { %v9874_v20 = vpop.f32.mrb[16].mxu1 }
 0xc89   :  { %v9878_v23 = vpop.f32.mrb[17].mxu1  ;;  %v3689_v25 = vsel %vm1606_vm6, %v9874_v20, 0.0  ;;  %v9967_v52 = vand.u32 4294901760, %v9940_v47  ;;  %v9970_v37 = vsub.f32 %v3716_v10, %v9942_v19 }
 0xc8a   :  { %v3686_v24 = vsel %vm1606_vm6, %v9878_v23, 0.0 }
 0xc8b   :  { %3684 = vadd.xlane.f32.xlu0 %v3683_v21  ;;  %3687 = vadd.xlane.f32.xlu1 %v3686_v24 }
 0xc8f   :  { %3690 = vadd.xlane.f32.xlu0 %v3689_v25 }
 0xd0b   :  { %v3673_v39 = vpop.xlane.xlu1 %3672 }
 0xd0c   :  { %v3728_v40 = vand.u32 4294901760, %v3673_v39  ;;  %v3670_v41 = vpop.xlane.xlu0 %3669 }
 0xd0d   :  { %v3725_v43 = vand.u32 4294901760, %v3670_v41 }
 0xd0e   :  { %v9901_v45 = vsub.f32 %v3673_v39, %v3728_v40 }
 0xd0f   :  { %v9898_v44 = vpack.c.bf16 %v3728_v40, %v3725_v43  ;;  %v9906_v36 = vsub.f32 %v3670_v41, %v3725_v43 }
 0xd10   :  { %v3679_v51 = vpop.xlane.xlu0 %3678  ;;  %v11101_v60 = vand.u32 4294901760, %v9901_v45 }
 0xd11   :  { %8339 = vmatprep.subr.bf16.mxu0 %v9898_v44  ;;  %v3734_v35 = vand.u32 4294901760, %v3679_v51  ;;  %v11102_v53 = vand.u32 4294901760, %v9906_v36 }
 0xd12   :  { %8341 = vmatpush3.bf16.msra.mxu0 %v9898_v44  ;;  %v3888_v3 = vsub.f32 %v9901_v45, %v11101_v60 }
 0xd13   :  { %v9922_v9 = vsub.f32 %v3679_v51, %v3734_v35  ;;  %v3881_v25 = vsub.f32 %v9906_v36, %v11102_v53  ;;  %v9972_v51 = vand.u32 4294901760, %v3722_v26 }
 0xd14   :  { %v3676_v61 = vpop.xlane.xlu0 %3675  ;;  %v3682_v0 = vpop.xlane.xlu1 %3681  ;;  %v3889_v43 = vand.u32 4294901760, %v3888_v3  ;;  %v3830_v3 = vsub.f32 %v9940_v47, %v9967_v52 }
 0xd15   :  { %v3731_v22 = vand.u32 4294901760, %v3676_v61  ;;  %v3737_v1 = vand.u32 4294901760, %v3682_v0  ;;  %v11098_v27 = vand.u32 4294901760, %v9922_v9 }
 0xd17   :  { %v9929_v62 = vpack.c.bf16 %v3734_v35, %v3731_v22  ;;  %v9931_v14 = vsub.f32 %v3676_v61, %v3731_v22  ;;  %v9960_v38 = vsub.f32 %v3682_v0, %v3737_v1  ;;  %v3882_v35 = vand.u32 4294901760, %v3881_v25 }
 0xd18   :  { %v3685_v49 = vpop.xlane.xlu0 %3684  ;;  %v3688_v2 = vpop.xlane.xlu1 %3687  ;;  %v3902_v29 = vsub.f32 %v9922_v9, %v11098_v27  ;;  %v3820_v61 = vsub.f32 %v9925_v55, %v9953_v33  ;;  %v9986_v0 = vand.u32 4294901760, %v9956_v34  ;;  %v10006_v25 = vsub.f32 %v3722_v26, %v9972_v51 }
 0xd19   :  { %v11099_v21 = vand.u32 4294901760, %v9931_v14  ;;  %v3740_v24 = vand.u32 4294901760, %v3685_v49  ;;  %8343 = vmatprep.subr.bf16.mxu0 %v9929_v62  ;;  %v3743_v41 = vand.u32 4294901760, %v3688_v2  ;;  %v11103_v22 = vand.u32 4294901760, %v9960_v38 }
 0xd1a   :  { %8345 = vmatpush3.bf16.msra.mxu0 %v9929_v62  ;;  %v10019_v26 = vand.u32 4294901760, %v9989_v13  ;;  %v10034_v53 = vand.u32 4294901760, %v10006_v25 }
 0xd1b   :  { %v9962_v39 = vpack.c.bf16 %v3740_v24, %v3737_v1  ;;  %v9964_v40 = vsub.f32 %v3685_v49, %v3740_v24  ;;  %v3895_v18 = vsub.f32 %v9931_v14, %v11099_v21  ;;  %v9992_v10 = vsub.f32 %v3688_v2, %v3743_v41 }
 0xd1c   :  { %v3691_v42 = vpop.xlane.xlu0 %3690  ;;  %v9998_v49 = vand.u32 4294901760, %v3810_v8  ;;  %v10003_v24 = vand.u32 4294901760, %v9970_v37  ;;  %v8354_v2 = vpack.c.bf16 %v3889_v43, %v3882_v35  ;;  %v3903_v21 = vand.u32 4294901760, %v3902_v29 }
 0xd1d   :  { %v11100_v57 = vand.u32 4294901760, %v9964_v40  ;;  %v3746_v59 = vand.u32 4294901760, %v3691_v42  ;;  %8347 = vmatprep.subr.bf16.mxu0 %v9962_v39  ;;  %v11106_v27 = vand.u32 4294901760, %v9992_v10  ;;  %v3909_v43 = vsub.f32 %v9960_v38, %v11103_v22 }
 0xd1e   :  { %8349 = vmatpush3.bf16.msra.mxu0 %v9962_v39  ;;  %v10025_v35 = vand.u32 4294901760, %v3830_v3  ;;  %v3860_v3 = vsub.f32 %v9989_v13, %v10019_v26 }
 0xd1f   :  { %v9994_v63 = vpack.c.bf16 %v3746_v59, %v3743_v41  ;;  %v9996_v1 = vsub.f32 %v3691_v42, %v3746_v59  ;;  %v3896_v41 = vand.u32 4294901760, %v3895_v18  ;;  %v3916_v8 = vsub.f32 %v9964_v40, %v11100_v57 }
 0xd20   :  { %v10014_v42 = vand.u32 4294901760, %v3820_v61  ;;  %v3840_v59 = vsub.f32 %v9956_v34, %v9986_v0  ;;  %v3850_v18 = vsub.f32 %v9970_v37, %v10003_v24  ;;  %v3910_v22 = vand.u32 4294901760, %v3909_v43 }
 0xd21   :  { %v11104_v28 = vand.u32 4294901760, %v9996_v1  ;;  %8351 = vmatprep.subr.bf16.mxu0 %v9994_v63  ;;  %v8358_v61 = vpack.c.bf16 %v3903_v21, %v3896_v41  ;;  %v3917_v57 = vand.u32 4294901760, %v3916_v8  ;;  %v3923_v21 = vsub.f32 %v9992_v10, %v11106_v27 }
 0xd22   :  { %8353 = vmatpush3.bf16.msra.mxu0 %v9994_v63  ;;  %11120 = vst [vmem:[#allocation30_spill] sm:$0xff] %v10014_v42  ;;  %v10037_v29 = vand.u32 4294901760, %v3840_v59  ;;  %v10045_v8 = vand.u32 4294901760, %v3850_v18  ;;  %v10050_v59 = vand.u32 4294901760, %v3860_v3  ;;  %v11122_v18 = vand.u32 4294901760, %v9901_v45 }
 0xd23   :  { %8355 = vmatprep.subr.bf16.mxu0 %v8354_v2  ;;  %v3930_v60 = vsub.f32 %v9996_v1, %v11104_v28  ;;  %v8362_v41 = vpack.c.bf16 %v3917_v57, %v3910_v22  ;;  %v3924_v43 = vand.u32 4294901760, %v3923_v21  ;;  %v8374_v57 = vpack.c.bf16 %v9922_v9, %v9931_v14 }
 0xd24   :  { %v8378_v22 = vpack.c.bf16 %v9964_v40, %v9960_v38  ;;  %v11123_v3 = vand.u32 4294901760, %v9931_v14  ;;  %v11124_v21 = vand.u32 4294901760, %v9922_v9  ;;  %v11127_v9 = vand.u32 4294901760, %v9992_v10 }
 0xd25   :  { %7315 = vmatmul.mubr.f32.vlgmr.msra.gmra.mrb[16].mxu0 %v9998_v49  ;;  %v3931_v28 = vand.u32 4294901760, %v3930_v60  ;;  %v8370_v60 = vpack.c.bf16 %v9901_v45, %v9906_v36  ;;  %v11125_v45 = vand.u32 4294901760, %v9960_v38  ;;  %v11128_v14 = vand.u32 4294901760, %v9996_v1 }
 0xd26   :  { %8357 = vmatpush3.bf16.msra.mxu0 %v8354_v2  ;;  %7317 = vmatprep.mubr.f32.mxu0 %v10014_v42  ;;  %v3870_v2 = vsub.f32 %v10006_v25, %v10034_v53 }
 0xd27   :  { %8359 = vmatprep.subr.bf16.mxu0 %v8358_v61  ;;  %v8366_v42 = vpack.c.bf16 %v3931_v28, %v3924_v43  ;;  %v8382_v28 = vpack.c.bf16 %v9996_v1, %v9992_v10  ;;  %v8414_v43 = vpack.c.bf16 %v11128_v14, %v11127_v9 }
 0xd28   :  { %v10053_v27 = vand.u32 4294901760, %v3870_v2 }
 0xd29   :  { %7318 = vmatmul.mubr.f32.gmra.mrb[18].mxu0 %v10025_v35 }
 0xd2a   :  { %8361 = vmatpush3.bf16.msra.mxu0 %v8358_v61  ;;  %7320 = vmatprep.mubr.f32.mxu0 %v10037_v29 }
 0xd2b   :  { %8363 = vmatprep.subr.bf16.mxu0 %v8362_v41 }
 0xd2d   :  { %7321 = vmatmul.mubr.f32.gmra.mrb[20].mxu0 %v10045_v8 }
 0xd2e   :  { %8365 = vmatpush3.bf16.msra.mxu0 %v8362_v41  ;;  %7323 = vmatprep.mubr.f32.mxu0 %v10050_v59  ;;  %v8406_v41 = vpack.c.bf16 %v11124_v21, %v11123_v3 }
 0xd2f   :  { %8367 = vmatprep.subr.bf16.mxu0 %v8366_v42 }
 0xd31   :  { %7324 = vmatmul.mubr.f32.gmra.mrb[22].mxu0 %v10053_v27 }
 0xd32   :  { %8369 = vmatpush3.bf16.msra.mxu0 %v8366_v42  ;;  %7342 = vmatprep.mubr.f32.mxu0 %v9885_v30  ;;  %v11121_v42 = vand.u32 4294901760, %v9906_v36  ;;  %v11126_v36 = vand.u32 4294901760, %v9964_v40 }
 0xd33   :  { %8371 = vmatprep.subr.bf16.mxu0 %v8370_v60 }
 0xd34   :  { %v8402_v61 = vpack.c.bf16 %v11122_v18, %v11121_v42  ;;  %v8410_v2 = vpack.c.bf16 %v11126_v36, %v11125_v45 }
 0xd35   :  { %7343 = vmatmul.mubr.f32.vlgmr.msra.gmra.mrb[16].mxu0 %v9896_v46 }
 0xd36   :  { %8373 = vmatpush3.bf16.msra.mxu0 %v8370_v60  ;;  %7345 = vmatprep.mubr.f32.mxu0 %v9911_v16 }
 0xd37   :  { %8375 = vmatprep.subr.bf16.mxu0 %v8374_v57 }
 0xd39   :  { %7346 = vmatmul.mubr.f32.gmra.mrb[18].mxu0 %v9918_v4 }
 0xd3a   :  { %8377 = vmatpush3.bf16.msra.mxu0 %v8374_v57  ;;  %7348 = vmatprep.mubr.f32.mxu0 %v9927_v58 }
 0xd3b   :  { %8379 = vmatprep.subr.bf16.mxu0 %v8378_v22 }
 0xd3d   :  { %7349 = vmatmul.mubr.f32.gmra.mrb[20].mxu0 %v9942_v19 }
 0xd3e   :  { %8381 = vmatpush3.bf16.msra.mxu0 %v8378_v22  ;;  %7351 = vmatprep.mubr.f32.mxu0 %v9958_v56 }
 0xd3f   :  { %8383 = vmatprep.subr.bf16.mxu0 %v8382_v28 }
 0xd41   :  { %7352 = vmatmul.mubr.f32.gmra.mrb[22].mxu0 %v9972_v51 }
 0xd42   :  { %8385 = vmatpush3.bf16.msra.mxu0 %v8382_v28  ;;  %7370 = vmatprep.mubr.f32.mxu0 %v9888_v31 }
 0xd43   :  { %8387 = vmatprep.subr.bf16.mxu0 %v9898_v44 }
 0xd45   :  { %7371 = vmatmul.mubr.f32.vlgmr.msra.gmra.mrb[16].mxu0 %v9904_v54 }
 0xd46   :  { %8389 = vmatpush3.bf16.msra.mxu0 %v9898_v44  ;;  %7373 = vmatprep.mubr.f32.mxu0 %v9925_v55 }
 0xd47   :  { %8391 = vmatprep.subr.bf16.mxu0 %v9929_v62 }
 0xd49   :  { %7374 = vmatmul.mubr.f32.gmra.mrb[18].mxu0 %v9940_v47 }
 0xd4a   :  { %8393 = vmatpush3.bf16.msra.mxu0 %v9929_v62  ;;  %7376 = vmatprep.mubr.f32.mxu0 %v9956_v34 }
 0xd4b   :  { %8395 = vmatprep.subr.bf16.mxu0 %v9962_v39 }
 0xd4d   :  { %7377 = vmatmul.mubr.f32.gmra.mrb[20].mxu0 %v9970_v37 }
 0xd4e   :  { %8397 = vmatpush3.bf16.msra.mxu0 %v9962_v39  ;;  %7379 = vmatprep.mubr.f32.mxu0 %v9989_v13 }
 0xd4f   :  { %8399 = vmatprep.subr.bf16.mxu0 %v9994_v63 }
 0xd51   :  { %7380 = vmatmul.mubr.f32.gmra.mrb[22].mxu0 %v10006_v25 }
 0xd52   :  { %8401 = vmatpush3.bf16.msra.mxu0 %v9994_v63  ;;  %7398 = vmatprep.mubr.f32.mxu0 %v9891_v32 }
 0xd53   :  { %8403 = vmatprep.subr.bf16.mxu0 %v8402_v61 }
 0xd55   :  { %7399 = vmatmul.mubr.f32.vlgmr.msra.gmra.mrb[16].mxu0 %v9916_v6 }
 0xd56   :  { %8405 = vmatpush3.bf16.msra.mxu0 %v8402_v61  ;;  %7401 = vmatprep.mubr.f32.mxu0 %v9953_v33 }
 0xd57   :  { %8407 = vmatprep.subr.bf16.mxu0 %v8406_v41 }
 0xd59   :  { %7402 = vmatmul.mubr.f32.gmra.mrb[18].mxu0 %v9967_v52 }
 0xd5a   :  { %8409 = vmatpush3.bf16.msra.mxu0 %v8406_v41  ;;  %7404 = vmatprep.mubr.f32.mxu0 %v9986_v0 }
 0xd5b   :  { %8411 = vmatprep.subr.bf16.mxu0 %v8410_v2 }
 0xd5d   :  { %7405 = vmatmul.mubr.f32.gmra.mrb[20].mxu0 %v10003_v24 }
 0xd5e   :  { %8413 = vmatpush3.bf16.msra.mxu0 %v8410_v2  ;;  %7407 = vmatprep.mubr.f32.mxu0 %v10019_v26 }
 0xd5f   :  { %8415 = vmatprep.subr.bf16.mxu0 %v8414_v43 }
 0xd61   :  { %7408 = vmatmul.mubr.f32.gmra.mrb[22].mxu0 %v10034_v53 }
 0xd62   :  { %8417 = vmatpush3.bf16.msra.mxu0 %v8414_v43  ;;  %7426 = vmatprep.mubr.f32.mxu0 %v9885_v30 }
 0xd63   :  { %8419 = vmatprep.subr.bf16.mxu0 %v9898_v44 }
 0xd65   :  { %7427 = vmatmul.mubr.f32.vlgmr.msra.gmra.mrb[16].mxu0 %v9896_v46 }
 0xd66   :  { %8421 = vmatpush3.bf16.msra.mxu0 %v9898_v44  ;;  %7429 = vmatprep.mubr.f32.mxu0 %v9911_v16  ;;  %v10137_v44 = vld [vmem:[#allocation3] sm:$0xff] }
 0xd67   :  { %8423 = vmatprep.subr.bf16.mxu0 %v9929_v62 }
 0xd69   :  { %7430 = vmatmul.mubr.f32.gmra.mrb[18].mxu0 %v9918_v4 }
 0xd6a   :  { %8425 = vmatpush3.bf16.msra.mxu0 %v9929_v62  ;;  %7432 = vmatprep.mubr.f32.mxu0 %v9927_v58 }
 0xd6b   :  { %8427 = vmatprep.subr.bf16.mxu0 %v9962_v39 }
 0xd6d   :  { %7433 = vmatmul.mubr.f32.gmra.mrb[20].mxu0 %v9942_v19 }
 0xd6e   :  { %8429 = vmatpush3.bf16.msra.mxu0 %v9962_v39  ;;  %7435 = vmatprep.mubr.f32.mxu0 %v9958_v56 }
 0xd6f   :  { %8431 = vmatprep.subr.bf16.mxu0 %v9994_v63 }
 0xd71   :  { %7436 = vmatmul.mubr.f32.gmra.mrb[22].mxu0 %v9972_v51 }
 0xd72   :  { %8433 = vmatpush3.bf16.msra.mxu0 %v9994_v63  ;;  %7454 = vmatprep.mubr.f32.mxu0 %v9885_v30 }
 0xd75   :  { %7455 = vmatmul.mubr.f32.vlgmr.msra.gmra.mrb[16].mxu0 %v9896_v46 }
 0xd76   :  { %7457 = vmatprep.mubr.f32.mxu0 %v9911_v16 }
 0xd79   :  { %7458 = vmatmul.mubr.f32.gmra.mrb[18].mxu0 %v9918_v4 }
 0xd7a   :  { %7460 = vmatprep.mubr.f32.mxu0 %v9927_v58 }
 0xd7d   :  { %7461 = vmatmul.mubr.f32.gmra.mrb[20].mxu0 %v9942_v19 }
 0xd7e   :  { %7463 = vmatprep.mubr.f32.mxu0 %v9958_v56 }
 0xd81   :  { %7464 = vmatmul.mubr.f32.gmra.mrb[22].mxu0 %v9972_v51 }
 0xd82   :  { %6688 = vmatprep.mubr.f32.mxu0 %v10137_v44 }
 0xe48   :  { %v7456_v62 = vpop.f32.mrb[16].mxu0 }
 0xe49   :  { %v4563_v38 = vmul.f32 0.001953125, %v7456_v62  ;;  %v4516_v39 = vpop.f32.mrb[17].mxu0 }
 0xe4a   :  { %v4562_v40 = vmul.f32 0.001953125, %v4516_v39 }
 0xe4b   :  { %4577 = vperm.xlu0 %8718, %v4563_v38  }
 0xe4c   :  { %4572 = vperm.xlu1 %8719, %v4562_v40   ;;  %v7459_v10 = vpop.f32.mrb[18].mxu0 }
 0xe4d   :  { %v4565_v63 = vmul.f32 0.001953125, %v7459_v10  ;;  %v4528_v1 = vpop.f32.mrb[19].mxu0 }
 0xe4e   :  { %v4564_v22 = vmul.f32 0.001953125, %v4528_v1 }
 0xe50   :  { %4587 = vperm.xlu1 %8719, %v4565_v63   ;;  %v7462_v60 = vpop.f32.mrb[20].mxu0 }
 0xe51   :  { %v4540_v57 = vpop.f32.mrb[21].mxu0  ;;  %v4567_v61 = vmul.f32 0.001953125, %v7462_v60 }
 0xe52   :  { %v4566_v28 = vmul.f32 0.001953125, %v4540_v57 }
 0xe54   :  { %4582 = vperm.xlu1 %8719, %v4564_v22   ;;  %4592 = vperm.xlu0 %8718, %v4566_v28   ;;  %v7465_v42 = vpop.f32.mrb[22].mxu0 }
 0xe55   :  { %v4552_v18 = vpop.f32.mrb[23].mxu0  ;;  %v4569_v21 = vmul.f32 0.001953125, %v7465_v42 }
 0xe56   :  { %v4568_v3 = vmul.f32 0.001953125, %v4552_v18 }
 0xe58   :  { %4597 = vperm.xlu1 %8719, %v4567_v61   ;;  %4602 = vperm.xlu0 %8718, %v4568_v3  }
 0xe5c   :  { %4607 = vperm.xlu1 %8719, %v4569_v21  }
 0xeca   :  { %v4578_v41 = vpop.permute.xlu0 %4577 }
 0xecb   :  { %v10141_v45 = vsub.f32 %v9852_v15, %v4578_v41  ;;  %v4573_v36 = vpop.permute.xlu1 %4572 }
 0xecc   :  { %v10144_v2 = vsub.f32 %v9854_v17, %v4573_v36 }
 0xecd   :  { %v4619_v9 = vmul.f32 %v10141_v45, %v10141_v45 }
 0xece   :  { %v4618_v14 = vmul.f32 %v10144_v2, %v10144_v2 }
 0xecf   :  { %v4588_v43 = vpop.permute.xlu1 %4587  ;;  %v4629_v62 = vsel %vm1606_vm6, %v4619_v9, 0.0  ;;  %v5578_v9 = vld [vmem:[%s11088_s12 + $0x10] sm:$0xff] }
 0xed0   :  { %v10152_v38 = vsub.f32 %v9860_v5, %v4588_v43  ;;  %4630 = vadd.xlane.f32.xlu1 %v4629_v62  ;;  %v4626_v15 = vsel %vm1606_vm6, %v4618_v14, 0.0  ;;  %v5583_v14 = vld [vmem:[%s11088_s12 + $0x38] sm:$0xff]  ;;  %v5582_v43 = vld [vmem:[%s11088_s12 + $0x30] sm:$0xff]  ;;  %v5577_v62 = vld [vmem:[%s11088_s12 + $0x8] sm:$0xff] }
 0xed1   :  { %4627 = vadd.xlane.f32.xlu0 %v4626_v15  ;;  %v5576_v15 = vld [vmem:[%s11088_s12] sm:$0xff] }
 0xed2   :  { %11129 = vst [vmem:[#allocation31_spill] sm:$0xff] %v10152_v38  ;;  %v4621_v17 = vmul.f32 %v10152_v38, %v10152_v38 }
 0xed3   :  { %v4583_v39 = vpop.permute.xlu1 %4582  ;;  %v4593_v40 = vpop.permute.xlu0 %4592 }
 0xed4   :  { %v10158_v10 = vsub.f32 %v9862_v7, %v4583_v39  ;;  %v10161_v63 = vsub.f32 %v9868_v11, %v4593_v40  ;;  %v4635_v1 = vsel %vm1606_vm6, %v4621_v17, 0.0  ;;  %v5581_v17 = vld [vmem:[%s11088_s12 + $0x28] sm:$0xff]  ;;  %v5580_v39 = vld [vmem:[%s11088_s12 + $0x20] sm:$0xff]  ;;  %v6062_v40 = vld [vmem:[#allocation21 + $0x7] ss:$8 sm:$0x3] }
 0xed5   :  { %4636 = vadd.xlane.f32.xlu0 %v4635_v1  ;;  %v6122_v1 = vld [vmem:[#allocation21 + $0x10] ss:$8 sm:$0x3] }
 0xed6   :  { %11130 = vst [vmem:[#allocation32_spill] sm:$0xff] %v10161_v63  ;;  %v4622_v5 = vmul.f32 %v10161_v63, %v10161_v63  ;;  %v4620_v60 = vmul.f32 %v10158_v10, %v10158_v10 }
 0xed7   :  { %v4598_v57 = vpop.permute.xlu1 %4597  ;;  %v4603_v22 = vpop.permute.xlu0 %4602 }
 0xed8   :  { %v10169_v28 = vsub.f32 %v9866_v12, %v4598_v57  ;;  %v10172_v7 = vsub.f32 %v9878_v23, %v4603_v22  ;;  %v4638_v11 = vsel %vm1606_vm6, %v4622_v5, 0.0  ;;  %v4632_v42 = vsel %vm1606_vm6, %v4620_v60, 0.0 }
 0xed9   :  { %4639 = vadd.xlane.f32.xlu1 %v4638_v11  ;;  %4633 = vadd.xlane.f32.xlu0 %v4632_v42  ;;  %v6067_v5 = vrot.slane %v6062_v40, %v9391_v48  ;;  %v6071_v60 = vrot.slane %v6062_v40, %v9396_v50  ;;  %v6127_v57 = vrot.slane %v6122_v1, %v9391_v48  ;;  %v5708_v11 = vld [vmem:[#allocation21 + $0x1] ss:$8 sm:$0x3]  ;;  %v6244_v40 = vld [vmem:[#allocation21 + $0x12] ss:$8 sm:$0x3] }
 0xeda   :  { %11131 = vst [vmem:[#allocation33_spill] sm:$0xff] %v10169_v28  ;;  %11132 = vst [vmem:[#allocation34_spill] sm:$0xff] %v10172_v7  ;;  %v4623_v18 = vmul.f32 %v10169_v28, %v10169_v28  ;;  %v4624_v61 = vmul.f32 %v10172_v7, %v10172_v7  ;;  %v6131_v22 = vrot.slane %v6122_v1, %v9396_v50 }
 0xedb   :  { %v4608_v3 = vpop.permute.xlu1 %4607  ;;  %v5713_v42 = vrot.slane %v5708_v11, %v9391_v48 }
 0xedc   :  { %v10181_v21 = vsub.f32 %v9874_v20, %v4608_v3  ;;  %v4641_v12 = vsel %vm1606_vm6, %v4623_v18, 0.0  ;;  %v4644_v23 = vsel %vm1606_vm6, %v4624_v61, 0.0  ;;  %v5579_v20 = vld [vmem:[%s11088_s12 + $0x18] sm:$0xff]  ;;  %v5717_v18 = vrot.slane %v5708_v11, %v9396_v50  ;;  %v6182_v61 = vld [vmem:[#allocation21 + $0x11] ss:$8 sm:$0x3] }
 0xedd   :  { %4642 = vadd.xlane.f32.xlu0 %v4641_v12  ;;  %4645 = vadd.xlane.f32.xlu1 %v4644_v23  ;;  %v6253_v11 = vrot.slane %v6244_v40, %v9396_v50  ;;  %s11134_s12 = smov 32  }
 0xede   :  { %11133 = vst [vmem:[#allocation35_spill] sm:$0xff] %v10181_v21  ;;  %v4625_v41 = vmul.f32 %v10181_v21, %v10181_v21 }
 0xee0   :  { %v4647_v36 = vsel %vm1606_vm6, %v4625_v41, 0.0  ;;  %v6187_v41 = vrot.slane %v6182_v61, %v9391_v48 }
 0xee1   :  { %4648 = vadd.xlane.f32.xlu0 %v4647_v36  ;;  %v6191_v36 = vrot.slane %v6182_v61, %v9396_v50  ;;  %v5895_v61 = vld [vmem:[#allocation21 + $0x4] ss:$8 sm:$0x3] }
 0xeee   :  { %5596 = vperm.xlu1 %8719, %v5578_v9  }
 0xef2   :  { %5601 = vperm.xlu1 %8719, %v5579_v20   ;;  %v5770_v20 = vld [vmem:[#allocation21 + $0x2] ss:$8 sm:$0x3] }
 0xef6   :  { %5621 = vperm.xlu1 %8719, %v5583_v14  }
 0xef7   :  { %5616 = vperm.xlu0 %8718, %v5582_v43  }
 0xefa   :  { %5591 = vperm.xlu1 %8719, %v5577_v62  }
 0xefb   :  { %5586 = vperm.xlu0 %8718, %v5576_v15   ;;  %v5779_v15 = vrot.slane %v5770_v20, %v9396_v50 }
 0xefe   :  { %5611 = vperm.xlu1 %8719, %v5581_v17   ;;  %v5775_v17 = vrot.slane %v5770_v20, %v9391_v48 }
 0xeff   :  { %5606 = vperm.xlu0 %8718, %v5580_v39  }
 0xf02   :  { %6074 = vrot.lane.b32.xlu1 %v6071_v60, %s9115_s26 }
 0xf03   :  { %6072 = vrot.lane.b32.xlu0 %v6067_v5, %s9115_s26 }
 0xf06   :  { %6134 = vrot.lane.b32.xlu1 %v6131_v22, %s9114_s9  ;;  %v6249_v22 = vrot.slane %v6244_v40, %v9391_v48 }
 0xf07   :  { %6132 = vrot.lane.b32.xlu0 %v6127_v57, %s9114_s9 }
 0xf0a   :  { %5720 = vrot.lane.b32.xlu1 %v5717_v18, %s9113_s6 }
 0xf0b   :  { %5718 = vrot.lane.b32.xlu0 %v5713_v42, %s9113_s6 }
 0xf0e   :  { %6194 = vrot.lane.b32.xlu1 %v6191_v36, %s9117_s22 }
 0xf0f   :  { %6192 = vrot.lane.b32.xlu0 %v6187_v41, %s9117_s22 }
 0xf12   :  { %5782 = vrot.lane.b32.xlu1 %v5779_v15, %s9095_s27  ;;  %v5900_v15 = vrot.slane %v5895_v61, %v9391_v48 }
 0xf13   :  { %5780 = vrot.lane.b32.xlu0 %v5775_v17, %s9095_s27 }
 0xf16   :  { %6256 = vrot.lane.b32.xlu1 %v6253_v11, %s9118_s14 }
 0xf17   :  { %6254 = vrot.lane.b32.xlu0 %v6249_v22, %s9118_s14 }
 0xf1b   :  { %5905 = vrot.lane.b32.xlu0 %v5900_v15, %s11134_s12 }
 0xf5d   :  { %v4631_v3 = vpop.xlane.xlu1 %4630 }
 0xf5e   :  { %v4654_v12 = vand.u32 4294901760, %v4631_v3  ;;  %v4628_v23 = vpop.xlane.xlu0 %4627 }
 0xf5f   :  { %v4651_v9 = vand.u32 4294901760, %v4628_v23 }
 0xf60   :  { %v10228_v43 = vsub.f32 %v4631_v3, %v4654_v12 }
 0xf61   :  { %v10226_v14 = vpack.c.bf16 %v4654_v12, %v4651_v9  ;;  %v10234_v39 = vsub.f32 %v4628_v23, %v4651_v9 }
 0xf62   :  { %v4637_v62 = vpop.xlane.xlu0 %4636  ;;  %v11107_v5 = vand.u32 4294901760, %v10228_v43 }
 0xf63   :  { %8435 = vmatprep.subr.bf16.mxu1 %v10226_v14  ;;  %v4660_v1 = vand.u32 4294901760, %v4637_v62  ;;  %v11109_v42 = vand.u32 4294901760, %v10234_v39 }
 0xf64   :  { %8437 = vmatpush3.bf16.msra.mxu1 %v10226_v14  ;;  %v4814_v20 = vsub.f32 %v10228_v43, %v11107_v5 }
 0xf65   :  { %v10244_v3 = vsub.f32 %v4637_v62, %v4660_v1  ;;  %v5904_v62 = vrot.slane %v5895_v61, %v9396_v50 }
 0xf66   :  { %v4640_v60 = vpop.xlane.xlu1 %4639  ;;  %v4634_v57 = vpop.xlane.xlu0 %4633  ;;  %v4815_v7 = vand.u32 4294901760, %v4814_v20 }
 0xf67   :  { %v4657_v18 = vand.u32 4294901760, %v4634_v57  ;;  %v4663_v12 = vand.u32 4294901760, %v4640_v60  ;;  %5907 = vrot.lane.b32.xlu1 %v5904_v62, %s11134_s12  ;;  %v11136_v20 = vand.u32 4294901760, %v10244_v3 }
 0xf69   :  { %v10246_v23 = vpack.c.bf16 %v4660_v1, %v4657_v18  ;;  %v10248_v41 = vsub.f32 %v4634_v57, %v4657_v18  ;;  %v4807_v1 = vsub.f32 %v10234_v39, %v11109_v42  ;;  %v6304_v57 = vld [vmem:[#allocation21 + $0x13] ss:$8 sm:$0x3]  ;;  %v10264_v22 = vsub.f32 %v4640_v60, %v4663_v12 }
 0xf6a   :  { %v4646_v36 = vpop.xlane.xlu1 %4645  ;;  %v4643_v9 = vpop.xlane.xlu0 %4642  ;;  %v6309_v42 = vrot.slane %v6304_v57, %v9391_v48  ;;  %v6313_v21 = vrot.slane %v6304_v57, %v9396_v50  ;;  %v4828_v15 = vsub.f32 %v10244_v3, %v11136_v20 }
 0xf6b   :  { %v4666_v40 = vand.u32 4294901760, %v4643_v9  ;;  %8439 = vmatprep.subr.bf16.mxu1 %v10246_v23  ;;  %v4669_v11 = vand.u32 4294901760, %v4646_v36  ;;  %v4808_v60 = vand.u32 4294901760, %v4807_v1 }
 0xf6c   :  { %8441 = vmatpush3.bf16.msra.mxu1 %v10246_v23  ;;  %6314 = vrot.lane.b32.xlu0 %v6309_v42, %s9112_s7  ;;  %v11138_v42 = vand.u32 4294901760, %v10264_v22 }
 0xf6d   :  { %v10266_v5 = vpack.c.bf16 %v4666_v40, %v4663_v12  ;;  %v10268_v61 = vsub.f32 %v4643_v9, %v4666_v40  ;;  %v11135_v12 = vand.u32 4294901760, %v10248_v41  ;;  %v6367_v40 = vld [vmem:[#allocation21 + $0x14] ss:$8 sm:$0x3]  ;;  %v10284_v57 = vsub.f32 %v4646_v36, %v4669_v11  ;;  %6316 = vrot.lane.b32.xlu1 %v6313_v21, %s9112_s7 }
 0xf6e   :  { %v4649_v17 = vpop.xlane.xlu0 %4648  ;;  %v6372_v1 = vrot.slane %v6367_v40, %v9391_v48  ;;  %v8450_v20 = vpack.c.bf16 %v4815_v7, %v4808_v60  ;;  %v4829_v21 = vand.u32 4294901760, %v4828_v15 }
 0xf6f   :  { %v4672_v63 = vand.u32 4294901760, %v4649_v17  ;;  %8443 = vmatprep.subr.bf16.mxu1 %v10266_v5  ;;  %v4821_v9 = vsub.f32 %v10248_v41, %v11135_v12  ;;  %v6376_v12 = vrot.slane %v6367_v40, %v9396_v50  ;;  %v11137_v36 = vand.u32 4294901760, %v10268_v61  ;;  %v11139_v40 = vld [vmem:[#allocation30_spill] sm:$0xff] }
 0xf70   :  { %8445 = vmatpush3.bf16.msra.mxu1 %v10266_v5  ;;  %6377 = vrot.lane.b32.xlu0 %v6372_v1, %s9116_s8 }
 0xf71   :  { %v10286_v18 = vpack.c.bf16 %v4672_v63, %v4669_v11  ;;  %v10288_v28 = vsub.f32 %v4649_v17, %v4672_v63  ;;  %v4822_v62 = vand.u32 4294901760, %v4821_v9  ;;  %v4842_v11 = vsub.f32 %v10268_v61, %v11137_v36  ;;  %6379 = vrot.lane.b32.xlu1 %v6376_v12, %s9116_s8 }
 0xf72   :  { %v4848_v63 = vand.u32 4294901760, %v10284_v57  ;;  %v4835_v17 = vsub.f32 %v10264_v22, %v11138_v42 }
 0xf73   :  { %v4855_v38 = vand.u32 4294901760, %v10288_v28  ;;  %8447 = vmatprep.subr.bf16.mxu1 %v10286_v18  ;;  %v8454_v7 = vpack.c.bf16 %v4829_v21, %v4822_v62  ;;  %v4843_v60 = vand.u32 4294901760, %v4842_v11 }
 0xf74   :  { %8449 = vmatpush3.bf16.msra.mxu1 %v10286_v18  ;;  %v4836_v15 = vand.u32 4294901760, %v4835_v17  ;;  %v4849_v36 = vsub.f32 %v10284_v57, %v4848_v63 }
 0xf75   :  { %8451 = vmatprep.subr.bf16.mxu1 %v8450_v20  ;;  %v4856_v9 = vsub.f32 %v10288_v28, %v4855_v38 }
 0xf76   :  { %v8458_v1 = vpack.c.bf16 %v4843_v60, %v4836_v15 }
 0xf77   :  { %7483 = vmatmul.mubr.f32.vlgmr.msra.gmra.mrb[18].mxu1 %v9998_v49  ;;  %v4857_v12 = vand.u32 4294901760, %v4856_v9  ;;  %v4850_v49 = vand.u32 4294901760, %v4849_v36 }
 0xf78   :  { %8453 = vmatpush3.bf16.msra.mxu1 %v8450_v20  ;;  %7485 = vmatprep.mubr.f32.mxu1 %v11139_v40  ;;  %v8466_v20 = vpack.c.bf16 %v10228_v43, %v10234_v39 }
 0xf79   :  { %8455 = vmatprep.subr.bf16.mxu1 %v8454_v7  ;;  %v8462_v62 = vpack.c.bf16 %v4857_v12, %v4850_v49  ;;  %v5513_v49 = vld [vmem:[%s11087_s11 + $0x8] sm:$0xff] }
 0xf7b   :  { %7486 = vmatmul.mubr.f32.gmra.mrb[20].mxu1 %v10025_v35  ;;  %v8470_v35 = vpack.c.bf16 %v10244_v3, %v10248_v41 }
 0xf7c   :  { %8457 = vmatpush3.bf16.msra.mxu1 %v8454_v7  ;;  %7488 = vmatprep.mubr.f32.mxu1 %v10037_v29  ;;  %v8478_v29 = vpack.c.bf16 %v10288_v28, %v10284_v57 }
 0xf7d   :  { %8459 = vmatprep.subr.bf16.mxu1 %v8458_v1 }
 0xf7f   :  { %7489 = vmatmul.mubr.f32.gmra.mrb[22].mxu1 %v10045_v8 }
 0xf80   :  { %8461 = vmatpush3.bf16.msra.mxu1 %v8458_v1  ;;  %7491 = vmatprep.mubr.f32.mxu1 %v10050_v59 }
 0xf81   :  { %8463 = vmatprep.subr.bf16.mxu1 %v8462_v62 }
 0xf83   :  { %7492 = vmatmul.mubr.f32.gmra.mrb[24].mxu1 %v10053_v27  ;;  %v8474_v27 = vpack.c.bf16 %v10268_v61, %v10264_v22 }
 0xf84   :  { %8465 = vmatpush3.bf16.msra.mxu1 %v8462_v62  ;;  %7510 = vmatprep.mubr.f32.mxu1 %v9885_v30 }
 0xf85   :  { %8467 = vmatprep.subr.bf16.mxu1 %v8466_v20 }
 0xf87   :  { %7511 = vmatmul.mubr.f32.vlgmr.msra.gmra.mrb[18].mxu1 %v9896_v46 }
 0xf88   :  { %8469 = vmatpush3.bf16.msra.mxu1 %v8466_v20  ;;  %7513 = vmatprep.mubr.f32.mxu1 %v9911_v16  ;;  %v5512_v20 = vld [vmem:[%s11087_s11] sm:$0xff] }
 0xf89   :  { %8471 = vmatprep.subr.bf16.mxu1 %v8470_v35 }
 0xf8b   :  { %7514 = vmatmul.mubr.f32.gmra.mrb[20].mxu1 %v9918_v4 }
 0xf8c   :  { %8473 = vmatpush3.bf16.msra.mxu1 %v8470_v35  ;;  %7516 = vmatprep.mubr.f32.mxu1 %v9927_v58 }
 0xf8d   :  { %8475 = vmatprep.subr.bf16.mxu1 %v8474_v27 }
 0xf8f   :  { %7517 = vmatmul.mubr.f32.gmra.mrb[22].mxu1 %v9942_v19 }
 0xf90   :  { %8477 = vmatpush3.bf16.msra.mxu1 %v8474_v27  ;;  %7519 = vmatprep.mubr.f32.mxu1 %v9958_v56 }
 0xf91   :  { %8479 = vmatprep.subr.bf16.mxu1 %v8478_v29 }
 0xf93   :  { %7520 = vmatmul.mubr.f32.gmra.mrb[24].mxu1 %v9972_v51 }
 0xf94   :  { %8481 = vmatpush3.bf16.msra.mxu1 %v8478_v29  ;;  %7538 = vmatprep.mubr.f32.mxu1 %v9888_v31  ;;  %v11140_v31 = vand.u32 4294901760, %v10234_v39 }
 0xf95   :  { %8483 = vmatprep.subr.bf16.mxu1 %v10226_v14 }
 0xf97   :  { %7539 = vmatmul.mubr.f32.vlgmr.msra.gmra.mrb[18].mxu1 %v9904_v54  ;;  %v11141_v54 = vand.u32 4294901760, %v10228_v43 }
 0xf98   :  { %8485 = vmatpush3.bf16.msra.mxu1 %v10226_v14  ;;  %7541 = vmatprep.mubr.f32.mxu1 %v9925_v55 }
 0xf99   :  { %8487 = vmatprep.subr.bf16.mxu1 %v10246_v23  ;;  %v8498_v55 = vpack.c.bf16 %v11141_v54, %v11140_v31 }
 0xf9b   :  { %7542 = vmatmul.mubr.f32.gmra.mrb[20].mxu1 %v9940_v47  ;;  %v11142_v47 = vand.u32 4294901760, %v10248_v41 }
 0xf9c   :  { %8489 = vmatpush3.bf16.msra.mxu1 %v10246_v23  ;;  %7544 = vmatprep.mubr.f32.mxu1 %v9956_v34  ;;  %v11143_v34 = vand.u32 4294901760, %v10244_v3 }
 0xf9d   :  { %8491 = vmatprep.subr.bf16.mxu1 %v10266_v5 }
 0xf9f   :  { %7545 = vmatmul.mubr.f32.gmra.mrb[22].mxu1 %v9970_v37  ;;  %v8502_v37 = vpack.c.bf16 %v11143_v34, %v11142_v47  ;;  %v5515_v47 = vld [vmem:[%s11087_s11 + $0x18] sm:$0xff]  ;;  %v5514_v34 = vld [vmem:[%s11087_s11 + $0x10] sm:$0xff] }
 0xfa0   :  { %8493 = vmatpush3.bf16.msra.mxu1 %v10266_v5  ;;  %7547 = vmatprep.mubr.f32.mxu1 %v9989_v13  ;;  %v11144_v13 = vmov %v11138_v42 }
 0xfa1   :  { %8495 = vmatprep.subr.bf16.mxu1 %v10286_v18 }
 0xfa3   :  { %7548 = vmatmul.mubr.f32.gmra.mrb[24].mxu1 %v10006_v25  ;;  %v11145_v25 = vand.u32 4294901760, %v10268_v61 }
 0xfa4   :  { %8497 = vmatpush3.bf16.msra.mxu1 %v10286_v18  ;;  %7566 = vmatprep.mubr.f32.mxu1 %v9891_v32  ;;  %v8510_v32 = vpack.c.bf16 %v4855_v38, %v4848_v63 }
 0xfa5   :  { %8499 = vmatprep.subr.bf16.mxu1 %v8498_v55  ;;  %v8506_v8 = vpack.c.bf16 %v11145_v25, %v11144_v13 }
 0xfa7   :  { %7567 = vmatmul.mubr.f32.vlgmr.msra.gmra.mrb[18].mxu1 %v9916_v6  ;;  %v10399_v6 = vpop.permute.xlu1 %5596 }
 0xfa8   :  { %8501 = vmatpush3.bf16.msra.mxu1 %v8498_v55  ;;  %7569 = vmatprep.mubr.f32.mxu1 %v9953_v33 }
 0xfa9   :  { %8503 = vmatprep.subr.bf16.mxu1 %v8502_v37 }
 0xfab   :  { %7570 = vmatmul.mubr.f32.gmra.mrb[20].mxu1 %v9967_v52 }
 0xfac   :  { %8505 = vmatpush3.bf16.msra.mxu1 %v8502_v37  ;;  %7572 = vmatprep.mubr.f32.mxu1 %v9986_v0 }
 0xfad   :  { %8507 = vmatprep.subr.bf16.mxu1 %v8506_v8 }
 0xfaf   :  { %7573 = vmatmul.mubr.f32.gmra.mrb[22].mxu1 %v10003_v24 }
 0xfb0   :  { %8509 = vmatpush3.bf16.msra.mxu1 %v8506_v8  ;;  %7575 = vmatprep.mubr.f32.mxu1 %v10019_v26  ;;  %v6036_v26 = vld [vmem:[#allocation21 + $0x6] ss:$8 sm:$0x3] }
 0xfb1   :  { %8511 = vmatprep.subr.bf16.mxu1 %v8510_v32  ;;  %v6041_v59 = vrot.slane %v6036_v26, %v9391_v48  ;;  %v6045_v38 = vrot.slane %v6036_v26, %v9396_v50  ;;  %v5518_v26 = vld [vmem:[%s11087_s11 + $0x30] sm:$0xff] }
 0xfb3   :  { %7576 = vmatmul.mubr.f32.gmra.mrb[24].mxu1 %v10034_v53  ;;  %v10401_v53 = vpop.permute.xlu1 %5601 }
 0xfb4   :  { %8513 = vmatpush3.bf16.msra.mxu1 %v8510_v32  ;;  %7594 = vmatprep.mubr.f32.mxu1 %v9885_v30  ;;  %v5517_v32 = vld [vmem:[%s11087_s11 + $0x28] sm:$0xff] }
 0xfb5   :  { %8515 = vmatprep.subr.bf16.mxu1 %v10226_v14 }
 0xfb7   :  { %7595 = vmatmul.mubr.f32.vlgmr.msra.gmra.mrb[18].mxu1 %v9896_v46  ;;  %v10403_v33 = vpop.permute.xlu1 %5621 }
 0xfb8   :  { %8517 = vmatpush3.bf16.msra.mxu1 %v10226_v14  ;;  %7597 = vmatprep.mubr.f32.mxu1 %v9911_v16 }
 0xfb9   :  { %8519 = vmatprep.subr.bf16.mxu1 %v10246_v23 }
 0xfbb   :  { %7598 = vmatmul.mubr.f32.gmra.mrb[20].mxu1 %v9918_v4 }
 0xfbc   :  { %8521 = vmatpush3.bf16.msra.mxu1 %v10246_v23  ;;  %7600 = vmatprep.mubr.f32.mxu1 %v9927_v58 }
 0xfbd   :  { %8523 = vmatprep.subr.bf16.mxu1 %v10266_v5 }
 0xfbf   :  { %7601 = vmatmul.mubr.f32.gmra.mrb[22].mxu1 %v9942_v19 }
 0xfc0   :  { %8525 = vmatpush3.bf16.msra.mxu1 %v10266_v5  ;;  %7603 = vmatprep.mubr.f32.mxu1 %v9958_v56 }
 0xfc1   :  { %8527 = vmatprep.subr.bf16.mxu1 %v10286_v18 }
 0xfc3   :  { %7604 = vmatmul.mubr.f32.gmra.mrb[24].mxu1 %v9972_v51 }
 0xfc4   :  { %8529 = vmatpush3.bf16.msra.mxu1 %v10286_v18  ;;  %7622 = vmatprep.mubr.f32.mxu1 %v9885_v30  ;;  %v10405_v30 = vpop.permute.xlu0 %5616 }
 0xfc7   :  { %7623 = vmatmul.mubr.f32.vlgmr.msra.gmra.mrb[18].mxu1 %v9896_v46  ;;  %v10407_v46 = vpop.permute.xlu1 %5591 }
 0xfc8   :  { %7625 = vmatprep.mubr.f32.mxu1 %v9911_v16  ;;  %v10409_v16 = vpop.permute.xlu0 %5586 }
 0xfcb   :  { %7626 = vmatmul.mubr.f32.gmra.mrb[20].mxu1 %v9918_v4  ;;  %v6426_v4 = vld [vmem:[#allocation21 + $0x15] ss:$8 sm:$0x3]  ;;  %v10415_v52 = vpop.permute.xlu1 %5611 }
 0xfcc   :  { %7628 = vmatprep.mubr.f32.mxu1 %v9927_v58  ;;  %v6431_v58 = vrot.slane %v6426_v4, %v9391_v48 }
 0xfce   :  { %6436 = vrot.lane.b32.xlu0 %v6431_v58, %s9113_s6 }
 0xfcf   :  { %7629 = vmatmul.mubr.f32.gmra.mrb[22].mxu1 %v9942_v19  ;;  %v6435_v19 = vrot.slane %v6426_v4, %v9396_v50  ;;  %v10425_v28 = vpop.permute.xlu1 %6074  ;;  %v5516_v4 = vld [vmem:[%s11087_s11 + $0x20] sm:$0xff] }
 0xfd0   :  { %7631 = vmatprep.mubr.f32.mxu1 %v9958_v56  ;;  %v6488_v56 = vld [vmem:[#allocation21 + $0x16] ss:$8 sm:$0x3] }
 0xfd1   :  { %6438 = vrot.lane.b32.xlu1 %v6435_v19, %s9113_s6  ;;  %v6493_v0 = vrot.slane %v6488_v56, %v9391_v48  ;;  %v6497_v24 = vrot.slane %v6488_v56, %v9396_v50 }
 0xfd3   :  { %7632 = vmatmul.mubr.f32.gmra.mrb[24].mxu1 %v9972_v51  ;;  %v10417_v51 = vpop.permute.xlu0 %5606  ;;  %6498 = vrot.lane.b32.xlu0 %v6493_v0, %s9095_s27 }
 0xfd5   :  { %6500 = vrot.lane.b32.xlu1 %v6497_v24, %s9095_s27  ;;  %v5519_v24 = vld [vmem:[%s11087_s11 + $0x38] sm:$0xff]  ;;  %s9126_s11 = smov 113  }
 0xfd7   :  { %v10427_v14 = vpop.permute.xlu0 %6072  ;;  %6046 = vrot.lane.b32.xlu0 %v6041_v59, %s9121_s29 }
 0xfd8   :  { %v6077_v43 = vsel %vm6076_vm12, %v10427_v14, %v10425_v28  ;;  %vm6565_vm12 = vcmask 875520  }
 0xfd9   :  { %6048 = vrot.lane.b32.xlu1 %v6045_v38, %s9121_s29  ;;  %v10434_v39 = vmul.f32 %v10137_v44, %v6077_v43 }
 0xfdb   :  { %6095 = vrot.lane.b32.xlu0 %v10434_v39, %s9119_s23 }
0x109a   :  { %v7624_v5 = vpop.f32.mrb[18].mxu1 }
0x109b   :  { %v5489_v3 = vmul.f32 0.001953125, %v7624_v5  ;;  %v5442_v23 = vpop.f32.mrb[19].mxu1 }
0x109c   :  { %v5488_v41 = vmul.f32 0.001953125, %v5442_v23  ;;  %v6081_v23 = vmul.f32 %v10137_v44, %v10427_v14 }
0x109d   :  { %v5497_v18 = vadd.f32 1e-05, %v5489_v3  ;;  %v6133_v3 = vpop.permute.xlu0 %6132 }
0x109e   :  { %v5496_v22 = vadd.f32 1e-05, %v5488_v41  ;;  %v7627_v61 = vpop.f32.mrb[20].mxu1  ;;  %v10464_v41 = vpop.permute.xlu1 %6134  ;;  %v6141_v14 = vmul.f32 %v10137_v44, %v6133_v3 }
0x109f   :  { %8768 = vrsqrt.f32 %v5497_v18  ;;  %v5491_v57 = vmul.f32 0.001953125, %v7627_v61  ;;  %v5454_v11 = vpop.f32.mrb[21].mxu1  ;;  %v5682_v18 = vld [vmem:[#allocation21] ss:$8 sm:$0x3] }
0x10a0   :  { %8770 = vrsqrt.f32 %v5496_v22  ;;  %v5490_v63 = vmul.f32 0.001953125, %v5454_v11  ;;  %v5691_v22 = vrot.slane %v5682_v18, %v9396_v50  ;;  %v5687_v11 = vrot.slane %v5682_v18, %v9391_v48 }
0x10a1   :  { %v5499_v21 = vadd.f32 1e-05, %v5491_v57  ;;  %v10470_v61 = vpop.permute.xlu0 %5718 }
0x10a2   :  { %v5498_v42 = vadd.f32 1e-05, %v5490_v63  ;;  %v7630_v17 = vpop.f32.mrb[22].mxu1  ;;  %v10472_v57 = vpop.permute.xlu1 %5720  ;;  %v6137_v63 = vsel %vm6136_vm13, %v6133_v3, %v10464_v41 }
0x10a3   :  { %8772 = vrsqrt.f32 %v5499_v21  ;;  %v5493_v7 = vmul.f32 0.001953125, %v7630_v17  ;;  %v5466_v60 = vpop.f32.mrb[23].mxu1 }
0x10a4   :  { %8774 = vrsqrt.f32 %v5498_v42  ;;  %v5492_v9 = vmul.f32 0.001953125, %v5466_v60  ;;  %v5727_v42 = vmul.f32 %v10137_v44, %v10470_v61 }
0x10a5   :  { %v5501_v40 = vadd.f32 1e-05, %v5493_v7  ;;  %v6193_v21 = vpop.permute.xlu0 %6192 }
0x10a6   :  { %v5500_v15 = vadd.f32 1e-05, %v5492_v9  ;;  %v7633_v36 = vpop.f32.mrb[24].mxu1  ;;  %v10484_v17 = vpop.permute.xlu1 %6194  ;;  %v6201_v60 = vmul.f32 %v10137_v44, %v6193_v21 }
0x10a7   :  { %8776 = vrsqrt.f32 %v5501_v40  ;;  %v5495_v1 = vmul.f32 0.001953125, %v7633_v36  ;;  %v5478_v12 = vpop.f32.mrb[25].mxu1 }
0x10a8   :  { %8778 = vrsqrt.f32 %v5500_v15  ;;  %v5494_v62 = vmul.f32 0.001953125, %v5478_v12 }
0x10a9   :  { %v8769_v35 = vpop.eup %8768  ;;  %v5503_v27 = vadd.f32 1e-05, %v5495_v1  ;;  %v10486_v7 = vpop.permute.xlu0 %5780  ;;  %v6197_v1 = vsel %vm6196_vm14, %v6193_v21, %v10484_v17 }
0x10aa   :  { %v8771_v29 = vpop.eup %8770  ;;  %v5502_v31 = vadd.f32 1e-05, %v5494_v62  ;;  %v5521_v54 = vmul.f32 %v8769_v35, %v5513_v49  ;;  %v10491_v9 = vpop.permute.xlu1 %5782  ;;  %v6202_v12 = vmul.f32 %v10137_v44, %v6197_v1  ;;  %v5867_v49 = vld [vmem:[#allocation21 + $0x3] ss:$8 sm:$0x3]  ;;  %v11147_v1 = vld [vmem:[#allocation33_spill] sm:$0xff] }
0x10ab   :  { %8780 = vrsqrt.f32 %v5503_v27  ;;  %v5520_v55 = vmul.f32 %v8771_v29, %v5512_v20  ;;  %v5790_v40 = vmul.f32 %v10137_v44, %v10491_v9  ;;  %v5876_v35 = vrot.slane %v5867_v49, %v9396_v50 }
0x10ac   :  { %8782 = vrsqrt.f32 %v5502_v31  ;;  %5535 = vperm.xlu1 %8719, %v5521_v54  }
0x10ad   :  { %v8773_v37 = vpop.eup %8772  ;;  %5530 = vperm.xlu0 %8718, %v5520_v55   ;;  %v10499_v36 = vpop.permute.xlu0 %6254  ;;  %v10524_v55 = vld [vmem:[#allocation21 + $0x5] ss:$8 sm:$0x3] }
0x10ae   :  { %v8775_v13 = vpop.eup %8774  ;;  %v5523_v25 = vmul.f32 %v8773_v37, %v5515_v47  ;;  %v10497_v15 = vpop.permute.xlu1 %6256  ;;  %v6263_v27 = vmul.f32 %v10137_v44, %v10499_v36  ;;  %v5872_v37 = vrot.slane %v5867_v49, %v9391_v48 }
0x10af   :  { %v5522_v8 = vmul.f32 %v8775_v13, %v5514_v34 }
0x10b1   :  { %v8777_v58 = vpop.eup %8776  ;;  %5540 = vperm.xlu1 %8719, %v5522_v8   ;;  %5545 = vperm.xlu0 %8718, %v5523_v25   ;;  %v10507_v20 = vpop.permute.xlu0 %5905  ;;  %v5965_v25 = vrot.slane %v10524_v55, %v9396_v50 }
0x10b2   :  { %v8779_v19 = vpop.eup %8778  ;;  %v5525_v56 = vmul.f32 %v8777_v58, %v5517_v32  ;;  %v10505_v62 = vpop.permute.xlu1 %5907  ;;  %v5913_v54 = vmul.f32 %v10137_v44, %v10507_v20 }
0x10b3   :  { %v5524_v0 = vmul.f32 %v8779_v19, %v5516_v4  ;;  %v5969_v4 = vmul.f32 %v10137_v44, %v5965_v25  ;;  %v11149_v25 = vld [vmem:[#allocation35_spill] sm:$0xff] }
0x10b5   :  { %v8781_v59 = vpop.eup %8780  ;;  %5555 = vperm.xlu1 %8719, %v5525_v56   ;;  %5550 = vperm.xlu0 %8718, %v5524_v0   ;;  %v10518_v31 = vpop.permute.xlu0 %6314 }
0x10b6   :  { %v8783_v38 = vpop.eup %8782  ;;  %v5527_v43 = vmul.f32 %v8781_v59, %v5519_v24  ;;  %v10516_v29 = vpop.permute.xlu1 %6316  ;;  %v6323_v13 = vmul.f32 %v10137_v44, %v10518_v31 }
0x10b7   :  { %v5526_v5 = vmul.f32 %v8783_v38, %v5518_v26 }
0x10b9   :  { %5565 = vperm.xlu1 %8719, %v5527_v43   ;;  %5560 = vperm.xlu0 %8718, %v5526_v5   ;;  %v10528_v34 = vpop.permute.xlu0 %6377 }
0x10ba   :  { %v10526_v47 = vpop.permute.xlu1 %6379 }
0x10bb   :  { %v6387_v50 = vmul.f32 %v10137_v44, %v10526_v47 }
0x10bd   :  { %6099 = vrot.lane.b32.xlu1 %v6081_v23, %s9119_s23  ;;  %6101 = vrot.lane.b32.xlu0 %v10434_v39, %s9119_s23  ;;  %v6142_v39 = vmul.f32 %v10137_v44, %v6137_v63  ;;  %v10541_v32 = vpop.permute.xlu0 %6436 }
0x10be   :  { %v10539_v8 = vpop.permute.xlu1 %6438 }
0x10bf   :  { %v6446_v24 = vmul.f32 %v10137_v44, %v10539_v8 }
0x10c1   :  { %6093 = vrot.lane.b32.xlu0 %v6081_v23, %s9119_s23  ;;  %5694 = vrot.lane.b32.xlu1 %v5691_v22, %s9116_s8  ;;  %v10548_v19 = vpop.permute.xlu0 %6498 }
0x10c2   :  { %v10546_v58 = vpop.permute.xlu1 %6500 }
0x10c3   :  { %v6502_v56 = vsel %vm1606_vm6, %v10548_v19, %v10546_v58 }
0x10c4   :  { %v6507_v0 = vmul.f32 %v10137_v44, %v6502_v56 }
0x10c5   :  { %5692 = vrot.lane.b32.xlu0 %v5687_v11, %s9116_s8  ;;  %6159 = vrot.lane.b32.xlu1 %v6141_v14, %s9120_s3  ;;  %s9127_s8 = smov 100   ;;  %v10566_v26 = vpop.permute.xlu0 %6046 }
0x10c6   :  { %v10568_v59 = vpop.permute.xlu1 %6048 }
0x10c9   :  { %6155 = vrot.lane.b32.xlu0 %v6142_v39, %s9120_s3  ;;  %5745 = vrot.lane.b32.xlu1 %v5727_v42, %s9119_s23  ;;  %v10570_v38 = vpop.permute.xlu0 %6095 }
0x10cd   :  { %6161 = vrot.lane.b32.xlu0 %v6142_v39, %s9120_s3  ;;  %6219 = vrot.lane.b32.xlu1 %v6201_v60, %s9122_s16 }
0x10d1   :  { %6153 = vrot.lane.b32.xlu0 %v6141_v14, %s9120_s3  ;;  %5804 = vrot.lane.b32.xlu1 %v5790_v40, %s9126_s11 }
0x10d5   :  { %6215 = vrot.lane.b32.xlu0 %v6202_v12, %s9122_s16  ;;  %5810 = vrot.lane.b32.xlu1 %v5790_v40, %s9126_s11 }
0x10d9   :  { %6221 = vrot.lane.b32.xlu0 %v6202_v12, %s9122_s16  ;;  %5879 = vrot.lane.b32.xlu1 %v5876_v35, %s9127_s8  ;;  %v11148_v12 = vld [vmem:[#allocation32_spill] sm:$0xff] }
0x10dd   :  { %5739 = vrot.lane.b32.xlu0 %v5727_v42, %s9119_s23  ;;  %6281 = vrot.lane.b32.xlu1 %v6263_v27, %s9126_s11  ;;  %v11146_v42 = vld [vmem:[#allocation31_spill] sm:$0xff] }
0x10e1   :  { %6213 = vrot.lane.b32.xlu0 %v6201_v60, %s9122_s16  ;;  %5931 = vrot.lane.b32.xlu1 %v5913_v54, %s9120_s3 }
0x10e5   :  { %5877 = vrot.lane.b32.xlu0 %v5872_v37, %s9127_s8  ;;  %6341 = vrot.lane.b32.xlu1 %v6323_v13, %s9128_s19 }
0x10e9   :  { %6275 = vrot.lane.b32.xlu0 %v6263_v27, %s9126_s11  ;;  %5978 = vrot.lane.b32.xlu1 %v5969_v4, %s9127_s8 }
0x10ed   :  { %5925 = vrot.lane.b32.xlu0 %v5913_v54, %s9120_s3  ;;  %5982 = vrot.lane.b32.xlu1 %v5969_v4, %s9127_s8 }
0x10f1   :  { %6335 = vrot.lane.b32.xlu0 %v6323_v13, %s9128_s19  ;;  %6401 = vrot.lane.b32.xlu1 %v6387_v50, %s9127_s8 }
0x10f5   :  { %6520 = vrot.lane.b32.xlu0 %v6507_v0, %s9129_s1  ;;  %6407 = vrot.lane.b32.xlu1 %v6387_v50, %s9127_s8  ;;  %v11150_v50 = vld [vmem:[#allocation34_spill] sm:$0xff] }
0x10f9   :  { %6460 = vrot.lane.b32.xlu1 %v6446_v24, %s9130_s4 }
0x10fd   :  { %6466 = vrot.lane.b32.xlu1 %v6446_v24, %s9130_s4 }
0x112b   :  { %v5536_v43 = vpop.permute.xlu1 %5535 }
0x112c   :  { %v5569_v5 = vmul.f32 %v5536_v43, %v10141_v45  ;;  %v5531_v3 = vpop.permute.xlu0 %5530 }
0x112d   :  { %v5568_v23 = vmul.f32 %v5531_v3, %v10144_v2 }
0x112e   :  { %v5625_v18 = vadd.f32 %v10407_v46, %v5569_v5 }
0x112f   :  { %v5624_v22 = vadd.f32 %v10409_v16, %v5568_v23 }
0x1130   :  { %v5633_v11 = vmax.f32 %v5625_v18, 0.0  ;;  %v5541_v14 = vpop.permute.xlu1 %5540  ;;  %v5546_v63 = vpop.permute.xlu0 %5545  ;;  %v10601_v18 = vmul.f32 %v10137_v44, %v10546_v58 }
0x1131   :  { %v5632_v21 = vmax.f32 %v5624_v22, 0.0  ;;  %v5570_v39 = vmul.f32 %v5541_v14, %v10158_v10  ;;  %v5571_v60 = vmul.f32 %v5546_v63, %v11146_v42 }
0x1132   :  { %5653 = vst.msk [vmem:[#allocation3 + $0x40] sm:$0xff] %vm1606_vm6, %v5633_v11  ;;  %v10613_v11 = vld [vmem:[#allocation3] sm:$0xff] }
0x1133   :  { %5652 = vst.msk [vmem:[#allocation3 + $0x10] sm:$0xff] %vm1606_vm6, %v5632_v21  ;;  %v5626_v45 = vadd.f32 %v10399_v6, %v5570_v39  ;;  %v5627_v2 = vadd.f32 %v10401_v53, %v5571_v60  ;;  %v6058_v14 = vmul.f32 %v10613_v11, %v10566_v26 }
0x1134   :  { %v5556_v40 = vpop.permute.xlu1 %5555  ;;  %v5551_v46 = vpop.permute.xlu0 %5550 }
0x1135   :  { %v5573_v16 = vmul.f32 %v5556_v40, %v11147_v1  ;;  %v5572_v49 = vmul.f32 %v5551_v46, %v11148_v12  ;;  %v5634_v35 = vmax.f32 %v5626_v45, 0.0  ;;  %v5635_v27 = vmax.f32 %v5627_v2, 0.0 }
0x1137   :  { %v5629_v10 = vadd.f32 %v10415_v52, %v5573_v16  ;;  %v5628_v54 = vadd.f32 %v10417_v51, %v5572_v49  ;;  %5656 = vrot.lane.b32.xlu0 %v5634_v35, %s9095_s27  ;;  %5658 = vrot.lane.b32.xlu1 %v5635_v27, %s9095_s27 }
0x1138   :  { %v5566_v37 = vpop.permute.xlu1 %5565  ;;  %v5561_v6 = vpop.permute.xlu0 %5560 }
0x1139   :  { %v5637_v13 = vmax.f32 %v5629_v10, 0.0  ;;  %v5636_v53 = vmax.f32 %v5628_v54, 0.0  ;;  %v5575_v4 = vmul.f32 %v5566_v37, %v11149_v25  ;;  %v5574_v56 = vmul.f32 %v5561_v6, %v11150_v50 }
0x113b   :  { %5665 = vst.msk [vmem:[#allocation3 + $0x48] sm:$0xff] %vm1606_vm6, %v5637_v13  ;;  %5664 = vst.msk [vmem:[#allocation3 + $0x18] sm:$0xff] %vm1606_vm6, %v5636_v53  ;;  %v5631_v52 = vadd.f32 %v10403_v33, %v5575_v4  ;;  %v5630_v51 = vadd.f32 %v10405_v30, %v5574_v56  ;;  %6526 = vrot.lane.b32.xlu0 %v6507_v0, %s9129_s1 }
0x113c   :  { %v10595_v24 = vpop.permute.xlu0 %6101  ;;  %v6100_v3 = vpop.permute.xlu1 %6099 }
0x113d   :  { %v5639_v43 = vmax.f32 %v5631_v52, 0.0  ;;  %v5638_v5 = vmax.f32 %v5630_v51, 0.0  ;;  %v6107_v22 = vsel %vm3166_vm9, %v6100_v3, %v10595_v24 }
0x113e   :  { %v6118_v44 = vadd.f32 %v6107_v22, %v6058_v14 }
0x113f   :  { %5670 = vrot.lane.b32.xlu1 %v5639_v43, %s9095_s27  ;;  %5668 = vrot.lane.b32.xlu0 %v5638_v5, %s9095_s27  ;;  %s9131_s27 = smov 79  }
0x1140   :  { %v6094_v23 = vpop.permute.xlu0 %6093  ;;  %v10607_v30 = vpop.permute.xlu1 %5694 }
0x1141   :  { %v6105_v21 = vsel %vm3166_vm9, %v6094_v23, %v10570_v38 }
0x1142   :  { %v6115_v60 = vadd.f32 %v6105_v21, %v6058_v14 }
0x1143   :  { %6522 = vrot.lane.b32.xlu1 %v10601_v18, %s9129_s1 }
0x1144   :  { %v10605_v33 = vpop.permute.xlu0 %5692  ;;  %v6160_v63 = vpop.permute.xlu1 %6159 }
0x1148   :  { %v10609_v0 = vpop.permute.xlu0 %6155  ;;  %v10623_v2 = vpop.permute.xlu1 %5745 }
0x114c   :  { %v10617_v58 = vpop.permute.xlu0 %6161  ;;  %v6220_v16 = vpop.permute.xlu1 %6219 }
0x114d   :  { %v6167_v39 = vsel %vm3261_vm10, %v6160_v63, %v10617_v58 }
0x114e   :  { %v6178_v42 = vadd.f32 %v6167_v39, %v6118_v44 }
0x1150   :  { %v6154_v45 = vpop.permute.xlu0 %6153  ;;  %v10641_v6 = vpop.permute.xlu1 %5804 }
0x1151   :  { %v6165_v40 = vsel %vm3261_vm10, %v6154_v45, %v10609_v0 }
0x1152   :  { %v6175_v46 = vadd.f32 %v6165_v40, %v6115_v60  ;;  %v5723_v60 = vsel %vm5722_vm15, %v10470_v61, %v10472_v57  ;;  %v6259_v61 = vsel %vm6258_vm0, %v10499_v36, %v10497_v15  ;;  %v5909_v36 = vsel %vm1722_vm7, %v10507_v20, %v10505_v62 }
0x1153   :  { %vm6347_vm7 = vcmask 433152  }
0x1154   :  { %v10627_v1 = vpop.permute.xlu0 %6215  ;;  %v10643_v13 = vpop.permute.xlu1 %5810 }
0x1158   :  { %v10629_v12 = vpop.permute.xlu0 %6221  ;;  %v10645_v53 = vpop.permute.xlu1 %5879 }
0x1159   :  { %v6227_v49 = vsel %vm3442_vm11, %v6220_v16, %v10629_v12 }
0x115a   :  { %v10633_v35 = vadd.f32 %v6227_v49, %v6178_v42 }
0x115c   :  { %v10635_v27 = vpop.permute.xlu0 %5739  ;;  %v10647_v25 = vpop.permute.xlu1 %6281 }
0x1160   :  { %v6214_v10 = vpop.permute.xlu0 %6213  ;;  %v10649_v4 = vpop.permute.xlu1 %5931 }
0x1161   :  { %v6225_v54 = vsel %vm3442_vm11, %v6214_v10, %v10627_v1 }
0x1162   :  { %v10639_v37 = vadd.f32 %v6225_v54, %v6175_v46 }
0x1164   :  { %11151 = vst [vmem:[#allocation30_spill] sm:$0xff] %v10639_v37  ;;  %v10651_v50 = vpop.permute.xlu1 %6341  ;;  %v10657_v51 = vpop.permute.xlu0 %5877 }
0x1168   :  { %v10653_v56 = vpop.permute.xlu1 %5978  ;;  %v10661_v5 = vpop.permute.xlu0 %6275 }
0x1169   :  { %11152 = vst [vmem:[#allocation31_spill] sm:$0xff] %v10661_v5  ;;  %v5701_v5 = vmul.f32 %v10613_v11, %v10605_v33 }
0x116c   :  { %v10655_v52 = vpop.permute.xlu1 %5982  ;;  %v10665_v23 = vpop.permute.xlu0 %5925 }
0x1170   :  { %v10659_v43 = vpop.permute.xlu1 %6401  ;;  %v10669_v14 = vpop.permute.xlu0 %6335 }
0x1171   :  { %11153 = vst [vmem:[#allocation33_spill] sm:$0xff] %v10669_v14 }
0x1174   :  { %v10663_v3 = vpop.permute.xlu1 %6407  ;;  %v10671_v63 = vpop.permute.xlu0 %6520 }
0x1175   :  { %11154 = vst [vmem:[#allocation32_spill] sm:$0xff] %v10671_v63 }
0x1178   :  { %v10667_v22 = vpop.permute.xlu1 %6460 }
0x117c   :  { %v10673_v44 = vpop.permute.xlu1 %6466 }
0x11a9   :  { %v5659_v21 = vpop.permute.xlu1 %5658  ;;  %v5657_v39 = vpop.permute.xlu0 %5656 }
0x11aa   :  { %5663 = vst.msk [vmem:[#allocation3 + $0x40] sm:$0xff] %vm3099_vm8, %v5659_v21  ;;  %5662 = vst.msk [vmem:[#allocation3 + $0x10] sm:$0xff] %vm3099_vm8, %v5657_v39  ;;  %v5697_v39 = vsel %vm5696_vm1, %v10605_v33, %v10607_v30 }
0x11ad   :  { %v10677_v42 = vpop.permute.xlu0 %6526 }
0x11b1   :  { %v5671_v45 = vpop.permute.xlu1 %5670  ;;  %v5669_v40 = vpop.permute.xlu0 %5668  ;;  %v10682_v46 = vld [vmem:[#allocation3 + $0x40] sm:$0xff]  ;;  %v10696_v21 = vld [vmem:[#allocation3 + $0x10] sm:$0xff] }
0x11b2   :  { %5675 = vst.msk [vmem:[#allocation3 + $0x48] sm:$0xff] %vm3099_vm8, %v5671_v45  ;;  %5674 = vst.msk [vmem:[#allocation3 + $0x18] sm:$0xff] %vm3099_vm8, %v5669_v40  ;;  %v6086_v16 = vmul.f32 %v10425_v28, %v10682_v46  ;;  %v5731_v49 = vmul.f32 %v10682_v46, %v5723_v60  ;;  %v6146_v10 = vmul.f32 %v10464_v41, %v10682_v46  ;;  %vm6468_vm8 = vcmask 564224  }
0x11b3   :  { %v6267_v54 = vmul.f32 %v6259_v61, %v10682_v46  ;;  %v10704_v45 = vmul.f32 %v10682_v46, %v5697_v39  ;;  %v8532_v20 = vpack.c.bf16 %v10682_v46, %v10696_v21  ;;  %v5791_v37 = vmul.f32 %v10682_v46, %v10486_v7 }
0x11b4   :  { %6103 = vrot.lane.b32.xlu1 %v6086_v16, %s9119_s23  ;;  %5747 = vrot.lane.b32.xlu0 %v5731_v49, %s9119_s23  ;;  %v10714_v49 = vmul.f32 %v10696_v21, %v5697_v39  ;;  %v6319_v39 = vsel %vm6318_vm2, %v10518_v31, %v10516_v29  ;;  %v6447_v31 = vmul.f32 %v10541_v32, %v10682_v46 }
0x11b5   :  { %v6327_v14 = vmul.f32 %v6319_v39, %v10682_v46 }
0x11b6   :  { %11155 = vst [vmem:[#allocation35_spill] sm:$0xff] %v10714_v49 }
0x11b8   :  { %6163 = vrot.lane.b32.xlu1 %v6146_v10, %s9120_s3  ;;  %6283 = vrot.lane.b32.xlu0 %v6267_v54, %s9126_s11  ;;  %v6206_v10 = vmul.f32 %v10484_v17, %v10682_v46  ;;  %v5917_v54 = vmul.f32 %v10682_v46, %v5909_v36 }
0x11b9   :  { %v10709_v40 = vld [vmem:[#allocation3 + $0x18] sm:$0xff]  ;;  %v10711_v16 = vld [vmem:[#allocation3 + $0x48] sm:$0xff] }
0x11ba   :  { %v8530_v63 = vpack.c.bf16 %v10711_v16, %v10709_v40 }
0x11bc   :  { %6223 = vrot.lane.b32.xlu1 %v6206_v10, %s9122_s16  ;;  %5933 = vrot.lane.b32.xlu0 %v5917_v54, %s9120_s3  ;;  %v6388_v10 = vmul.f32 %v10528_v34, %v10682_v46  ;;  %v5728_v54 = vmul.f32 %v10696_v21, %v5723_v60  ;;  %v6143_v60 = vmul.f32 %v10696_v21, %v10464_v41 }
0x11bd   :  { %8531 = vmatprep.subr.bf16.mxu0 %v8530_v63  ;;  %v6264_v63 = vmul.f32 %v10696_v21, %v6259_v61  ;;  %v6203_v61 = vmul.f32 %v10696_v21, %v10484_v17  ;;  %v6444_v41 = vmul.f32 %v10696_v21, %v10541_v32  ;;  %v5784_v17 = vsel %vm1606_vm6, %v10486_v7, %v10491_v9 }
0x11be   :  { %8533 = vmatpush1.bf16.msra.mxu0 %v8532_v20  ;;  %v6324_v20 = vmul.f32 %v10696_v21, %v6319_v39  ;;  %v5732_v39 = vmul.f32 %v10711_v16, %v10472_v57 }
0x11c0   :  { %5806 = vrot.lane.b32.xlu1 %v5791_v37, %s9126_s11  ;;  %6343 = vrot.lane.b32.xlu0 %v6327_v14, %s9128_s19  ;;  %v6083_v37 = vmul.f32 %v10696_v21, %v10425_v28  ;;  %v5788_v14 = vmul.f32 %v10696_v21, %v10486_v7  ;;  %v6385_v28 = vmul.f32 %v10696_v21, %v10528_v34 }
0x11c1   :  { %v6381_v7 = vsel %vm5696_vm1, %v10528_v34, %v10526_v47  ;;  %v5789_v47 = vmul.f32 %v10709_v40, %v5784_v17  ;;  %v5729_v34 = vmul.f32 %v10709_v40, %v10472_v57 }
0x11c2   :  { %v6389_v9 = vmul.f32 %v10711_v16, %v6381_v7  ;;  %v6386_v57 = vmul.f32 %v10709_v40, %v6381_v7 }
0x11c4   :  { %6403 = vrot.lane.b32.xlu1 %v6388_v10, %s9127_s8  ;;  %5741 = vrot.lane.b32.xlu0 %v5728_v54, %s9119_s23  ;;  %v5914_v10 = vmul.f32 %v10696_v21, %v5909_v36  ;;  %v5792_v54 = vmul.f32 %v10711_v16, %v5784_v17  ;;  %v6268_v36 = vmul.f32 %v10711_v16, %v10497_v15 }
0x11c8   :  { %6462 = vrot.lane.b32.xlu1 %v6447_v31, %s9130_s4  ;;  %6277 = vrot.lane.b32.xlu0 %v6264_v63, %s9126_s11  ;;  %v5961_v31 = vrot.slane %v10524_v55, %v9391_v48  ;;  %v5918_v48 = vmul.f32 %v10711_v16, %v10505_v62  ;;  %v6440_v55 = vsel %vm5722_vm15, %v10541_v32, %v10539_v8 }
0x11c9   :  { %v5915_v8 = vmul.f32 %v10709_v40, %v10505_v62  ;;  %v6265_v32 = vmul.f32 %v10709_v40, %v10497_v15  ;;  %v6445_v15 = vmul.f32 %v10709_v40, %v6440_v55  ;;  %v6509_v62 = vmul.f32 %v10711_v16, %v10548_v19 }
0x11ca   :  { %v5970_v63 = vmul.f32 %v10711_v16, %v5961_v31 }
0x11cc   :  { %6097 = vrot.lane.b32.xlu1 %v6083_v37, %s9119_s23  ;;  %5800 = vrot.lane.b32.xlu0 %v5788_v14, %s9126_s11  ;;  %v6328_v37 = vmul.f32 %v10711_v16, %v10516_v29  ;;  %v6448_v14 = vmul.f32 %v10711_v16, %v6440_v55 }
0x11d0   :  { %6157 = vrot.lane.b32.xlu1 %v6143_v60, %s9120_s3  ;;  %6337 = vrot.lane.b32.xlu0 %v6324_v20, %s9128_s19  ;;  %v5968_v60 = vmul.f32 %v10709_v40, %v5961_v31  ;;  %v6325_v20 = vmul.f32 %v10709_v40, %v10516_v29  ;;  %v6506_v29 = vmul.f32 %v10709_v40, %v10548_v19 }
0x11d4   :  { %6217 = vrot.lane.b32.xlu1 %v6203_v61, %s9122_s16  ;;  %6397 = vrot.lane.b32.xlu0 %v6385_v28, %s9127_s8  ;;  %v10823_v61 = vpop.permute.xlu1 %6522 }
0x11d8   :  { %5927 = vrot.lane.b32.xlu1 %v5914_v10, %s9120_s3  ;;  %6456 = vrot.lane.b32.xlu0 %v6444_v41, %s9130_s4 }
0x11dc   :  { %5749 = vrot.lane.b32.xlu1 %v5732_v39, %s9119_s23  ;;  %5808 = vrot.lane.b32.xlu0 %v5792_v54, %s9126_s11 }
0x11e0   :  { %6285 = vrot.lane.b32.xlu1 %v6268_v36, %s9126_s11  ;;  %5980 = vrot.lane.b32.xlu0 %v5970_v63, %s9127_s8 }
0x11e4   :  { %5935 = vrot.lane.b32.xlu1 %v5918_v48, %s9120_s3  ;;  %6405 = vrot.lane.b32.xlu0 %v6389_v9, %s9127_s8 }
0x11e8   :  { %6345 = vrot.lane.b32.xlu1 %v6328_v37, %s9128_s19  ;;  %6464 = vrot.lane.b32.xlu0 %v6448_v14, %s9130_s4 }
0x11ec   :  { %5802 = vrot.lane.b32.xlu0 %v5789_v47, %s9126_s11  ;;  %5743 = vrot.lane.b32.xlu1 %v5729_v34, %s9119_s23  ;;  %s9132_s23 = smov 107  }
0x11f0   :  { %5929 = vrot.lane.b32.xlu0 %v5915_v8, %s9120_s3  ;;  %6279 = vrot.lane.b32.xlu1 %v6265_v32, %s9126_s11 }
0x11f4   :  { %5976 = vrot.lane.b32.xlu0 %v5968_v60, %s9127_s8  ;;  %6339 = vrot.lane.b32.xlu1 %v6325_v20, %s9128_s19 }
0x11f8   :  { %6399 = vrot.lane.b32.xlu0 %v6386_v57, %s9127_s8  ;;  %6528 = vrot.lane.b32.xlu1 %v10601_v18, %s9129_s1  ;;  %v6051_v18 = vsel %vm6050_vm3, %v10566_v26, %v10568_v59 }
0x11f9   :  { %v10833_v17 = vmul.f32 %v10613_v11, %v6051_v18 }
0x11fc   :  { %6458 = vrot.lane.b32.xlu0 %v6445_v15, %s9130_s4  ;;  %6524 = vrot.lane.b32.xlu1 %v6509_v62, %s9129_s1  ;;  %v5882_v15 = vsel %vm5881_vm5, %v10657_v51, %v10645_v53  ;;  %v5886_v62 = vmul.f32 %v10613_v11, %v10657_v51 }
0x1200   :  { %6518 = vrot.lane.b32.xlu0 %v6506_v29, %s9129_s1 }
0x1226   :  { %v10827_v28 = vpop.permute.xlu1 %6103  ;;  %v5748_v10 = vpop.permute.xlu0 %5747 }
0x1227   :  { %v6108_v41 = vsel %vm3166_vm9, %v10595_v24, %v10827_v28 }
0x1228   :  { %v6119_v19 = vadd.f32 %v6108_v41, %v10833_v17 }
0x122a   :  { %v10836_v39 = vpop.permute.xlu1 %6163  ;;  %v6284_v54 = vpop.permute.xlu0 %6283 }
0x122b   :  { %v6168_v26 = vsel %vm3261_vm10, %v10617_v58, %v10836_v39  ;;  %v6289_v31 = vsel %vm5812_vm4, %v10647_v25, %v6284_v54 }
0x122c   :  { %v6179_v36 = vadd.f32 %v6168_v26, %v6119_v19  ;;  %v10844_v63 = vadd.f32 %v6289_v31, %v10633_v35  ;;  %v10888_v26 = vmul.f32 %v10613_v11, %v5882_v15 }
0x122e   :  { %v10846_v24 = vpop.permute.xlu1 %6223  ;;  %v5934_v7 = vpop.permute.xlu0 %5933 }
0x122f   :  { %v6228_v48 = vsel %vm3442_vm11, %v10629_v12, %v10846_v24  ;;  %v5939_v41 = vsel %vm3261_vm10, %v10649_v4, %v5934_v7 }
0x1230   :  { %v6239_v9 = vadd.f32 %v6228_v48, %v6179_v36  ;;  %v5950_v36 = vadd.f32 %v10649_v4, %v5886_v62  ;;  %v5753_v48 = vsel %vm3166_vm9, %v10623_v2, %v5748_v10  ;;  %v5951_v51 = vadd.f32 %v5939_v41, %v10888_v26 }
0x1231   :  { %v5706_v2 = vmul.f32 %v10711_v16, %v10607_v30 }
0x1232   :  { %v5807_v55 = vpop.permute.xlu1 %5806  ;;  %v10851_v37 = vpop.permute.xlu0 %6343 }
0x1236   :  { %v10853_v14 = vpop.permute.xlu1 %6403  ;;  %v10855_v58 = vpop.permute.xlu0 %5741 }
0x123a   :  { %v10857_v25 = vpop.permute.xlu1 %6462  ;;  %v10859_v47 = vpop.permute.xlu0 %6277 }
0x123e   :  { %v10861_v35 = vpop.permute.xlu1 %6097  ;;  %v10863_v34 = vpop.permute.xlu0 %5800 }
0x1242   :  { %v10865_v8 = vpop.permute.xlu1 %6157  ;;  %v10867_v32 = vpop.permute.xlu0 %6337 }
0x1243   :  { %11156 = vst [vmem:[#allocation34_spill] sm:$0xff] %v10867_v32 }
0x1246   :  { %v10869_v12 = vpop.permute.xlu1 %6217  ;;  %v10871_v60 = vpop.permute.xlu0 %6397 }
0x1247   :  { %11157 = vst [vmem:[#allocation36_spill] sm:$0xff] %v10871_v60 }
0x124a   :  { %v10873_v20 = vpop.permute.xlu1 %5927  ;;  %v10875_v57 = vpop.permute.xlu0 %6456 }
0x124b   :  { %11158 = vst [vmem:[#allocation37_spill] sm:$0xff] %v10875_v57 }
0x124e   :  { %v5750_v29 = vpop.permute.xlu1 %5749  ;;  %v10882_v18 = vpop.permute.xlu0 %5808 }
0x124f   :  { %v5754_v19 = vsel %vm3166_vm9, %v5748_v10, %v5750_v29 }
0x1250   :  { %v10891_v31 = vadd.f32 %v5754_v19, %v10704_v45  ;;  %v5815_v45 = vsel %vm5812_vm4, %v5807_v55, %v10882_v18 }
0x1252   :  { %11159 = vst [vmem:[#allocation38_spill] sm:$0xff] %v10891_v31  ;;  %v6286_v57 = vpop.permute.xlu1 %6285  ;;  %v5981_v60 = vpop.permute.xlu0 %5980  ;;  %v5764_v31 = vadd.f32 %v5753_v48, %v5701_v5  ;;  %v5703_v48 = vmul.f32 %v10709_v40, %v10607_v30 }
0x1253   :  { %v6290_v32 = vsel %vm5812_vm4, %v6284_v54, %v6286_v57  ;;  %v5985_v15 = vsel %vm5881_vm5, %v5981_v60, %v10655_v52  ;;  %v5995_v49 = vadd.f32 %v5981_v60, %v5950_v36  ;;  %v5766_v54 = vadd.f32 %v5750_v29, %v5706_v2 }
0x1254   :  { %v6301_v4 = vadd.f32 %v6290_v32, %v6239_v9  ;;  %v5996_v19 = vadd.f32 %v5985_v15, %v5951_v51  ;;  %v5826_v41 = vadd.f32 %v5815_v45, %v5764_v31  ;;  %v6060_v60 = vmul.f32 %v10568_v59, %v10682_v46 }
0x1255   :  { %6010 = vrot.lane.b32.xlu1 %v5995_v49, %s9124_s25  ;;  %v5828_v49 = vadd.f32 %v10643_v13, %v5766_v54  ;;  %v6057_v31 = vmul.f32 %v10696_v21, %v10568_v59 }
0x1256   :  { %v5936_v10 = vpop.permute.xlu1 %5935  ;;  %6012 = vrot.lane.b32.xlu0 %v5996_v19, %s9124_s25  ;;  %v10908_v33 = vpop.permute.xlu0 %6405  ;;  %v6120_v16 = vadd.f32 %v10827_v28, %v6060_v60 }
0x1257   :  { %v5940_v51 = vsel %vm3261_vm10, %v5934_v7, %v5936_v10 }
0x1258   :  { %v6180_v29 = vadd.f32 %v10836_v39, %v6120_v16  ;;  %v5891_v39 = vmul.f32 %v10682_v46, %v10645_v53  ;;  %v5947_v46 = vadd.f32 %v10665_v23, %v5886_v62 }
0x1259   :  { %5841 = vrot.lane.b32.xlu1 %v5826_v41, %s9131_s27 }
0x125a   :  { %v6346_v9 = vpop.permute.xlu1 %6345  ;;  %v10913_v55 = vpop.permute.xlu0 %6464  ;;  %v6240_v45 = vadd.f32 %v10846_v24, %v6180_v29  ;;  %v5952_v54 = vadd.f32 %v5940_v51, %v5891_v39  ;;  %v5888_v24 = vmul.f32 %v10696_v21, %v10645_v53 }
0x125b   :  { %v6351_v32 = vsel %vm6347_vm7, %v10851_v37, %v6346_v9 }
0x125c   :  { %v10919_v36 = vadd.f32 %v6351_v32, %v6301_v4  ;;  %v6117_v4 = vadd.f32 %v10861_v35, %v6057_v31  ;;  %v6302_v2 = vadd.f32 %v6286_v57, %v6240_v45  ;;  %v5997_v57 = vadd.f32 %v10655_v52, %v5952_v54 }
0x125d   :  { %5845 = vrot.lane.b32.xlu1 %v5828_v49, %s9131_s27  ;;  %v5751_v32 = vsel %vm3166_vm9, %v10635_v27, %v10855_v58  ;;  %v5937_v27 = vsel %vm3261_vm10, %v10665_v23, %v10873_v20  ;;  %v6226_v54 = vsel %vm3442_vm11, %v10627_v1, %v10869_v12  ;;  %vm5847_vm11 = vcmask 646144  }
0x125e   :  { %v5744_v28 = vpop.permute.xlu1 %5743  ;;  %v10928_v15 = vpop.permute.xlu0 %5802  ;;  %v6177_v59 = vadd.f32 %v10865_v8, %v6117_v4  ;;  %v6363_v10 = vadd.f32 %v6346_v9, %v6302_v2  ;;  %v6166_v2 = vsel %vm3261_vm10, %v10609_v0, %v10865_v8  ;;  %v6471_v0 = vsel %vm6468_vm8, %v10857_v25, %v10913_v55 }
0x125f   :  { %v5763_v19 = vadd.f32 %v5744_v28, %v5703_v48  ;;  %v5813_v62 = vsel %vm5812_vm4, %v10863_v34, %v10928_v15  ;;  %v5761_v48 = vadd.f32 %v5751_v32, %v5701_v5  ;;  %v6350_v5 = vsel %vm6347_vm7, %v10651_v50, %v10851_v37 }
0x1260   :  { %v6237_v7 = vadd.f32 %v10869_v12, %v6177_v59  ;;  %v6424_v31 = vadd.f32 %v10663_v3, %v6363_v10  ;;  %v6106_v34 = vsel %vm3166_vm9, %v10570_v38, %v10861_v35  ;;  %v5948_v59 = vadd.f32 %v5937_v27, %v10888_v26 }
0x1261   :  { %v5825_v41 = vadd.f32 %v10641_v6, %v5763_v19  ;;  %v5823_v4 = vadd.f32 %v5813_v62, %v5761_v48  ;;  %v6411_v50 = vsel %vm5881_vm5, %v10853_v14, %v10908_v33  ;;  %v6361_v38 = vadd.f32 %v6350_v5, %v10844_v63 }
0x1262   :  { %v6280_v30 = vpop.permute.xlu1 %6279  ;;  %v5930_v40 = vpop.permute.xlu0 %5929  ;;  %v6484_v39 = vadd.f32 %v10673_v44, %v6424_v31  ;;  %v5752_v14 = vsel %vm3166_vm9, %v10855_v58, %v5744_v28  ;;  %vm6016_vm9 = vcmask 228352  }
0x1263   :  { %v5938_v60 = vsel %vm3261_vm10, %v10873_v20, %v5930_v40  ;;  %5839 = vrot.lane.b32.xlu1 %v5825_v41, %s9131_s27  ;;  %v6299_v16 = vadd.f32 %v6280_v30, %v6237_v7  ;;  %vm6530_vm10 = vcmask 695296   ;;  %v5816_v41 = vsel %vm5812_vm4, %v10882_v18, %v10643_v13  ;;  %v11160_v40 = vld [vmem:[#allocation38_spill] sm:$0xff]  ;;  %v11161_v7 = vld [vmem:[#allocation35_spill] sm:$0xff] }
0x1264   :  { %v5949_v49 = vadd.f32 %v5938_v60, %v5888_v24  ;;  %v6288_v1 = vsel %vm5812_vm4, %v10859_v47, %v6280_v30  ;;  %v5827_v58 = vadd.f32 %v5816_v41, %v11160_v40  ;;  %v5762_v10 = vadd.f32 %v5752_v14, %v11161_v7  ;;  %v11162_v60 = vld [vmem:[#allocation34_spill] sm:$0xff] }
0x1265   :  { %v6412_v24 = vsel %vm5881_vm5, %v10908_v33, %v10663_v3  ;;  %v11163_v3 = vld [vmem:[#allocation31_spill] sm:$0xff] }
0x1266   :  { %v6340_v29 = vpop.permute.xlu1 %6339  ;;  %v5977_v9 = vpop.permute.xlu0 %5976  ;;  %v5994_v52 = vadd.f32 %v10653_v56, %v5949_v49  ;;  %v6423_v18 = vadd.f32 %v6412_v24, %v10919_v36  ;;  %v6287_v33 = vsel %vm5812_vm4, %v11163_v3, %v10859_v47  ;;  %v6472_v36 = vsel %vm6468_vm8, %v10913_v55, %v10673_v44  ;;  %v11164_v47 = vld [vmem:[#allocation33_spill] sm:$0xff] }
0x1267   :  { %v6360_v53 = vadd.f32 %v6340_v29, %v6299_v16  ;;  %v5992_v21 = vadd.f32 %v5977_v9, %v5947_v46  ;;  %6014 = vrot.lane.b32.xlu1 %v5997_v57, %s9124_s25  ;;  %v5984_v19 = vsel %vm5881_vm5, %v5977_v9, %v10653_v56  ;;  %v6116_v56 = vadd.f32 %v6106_v34, %v10833_v17 }
0x1268   :  { %v5993_v37 = vadd.f32 %v5984_v19, %v5948_v59  ;;  %v6422_v17 = vadd.f32 %v6411_v50, %v6361_v38  ;;  %v6349_v13 = vsel %vm6347_vm7, %v11162_v60, %v6340_v29  ;;  %v5814_v16 = vsel %vm5812_vm4, %v10928_v15, %v10641_v6 }
0x1269   :  { %v6421_v51 = vadd.f32 %v10659_v43, %v6360_v53  ;;  %6004 = vrot.lane.b32.xlu0 %v5992_v21, %s9124_s25  ;;  %v6176_v63 = vadd.f32 %v6166_v2, %v6116_v56  ;;  %v5824_v32 = vadd.f32 %v5814_v16, %v5762_v10  ;;  %v6483_v15 = vadd.f32 %v6472_v36, %v6423_v18  ;;  %v11165_v21 = vld [vmem:[#allocation30_spill] sm:$0xff]  ;;  %v6578_v36 = vld [vmem:[#allocation20] sm:$0xff] }
0x126a   :  { %v6529_v45 = vpop.permute.xlu1 %6528  ;;  %v6400_v35 = vpop.permute.xlu0 %6399  ;;  %v6482_v28 = vadd.f32 %v6471_v0, %v6422_v17  ;;  %v6348_v53 = vsel %vm6347_vm7, %v11164_v47, %v11162_v60  ;;  %v6297_v44 = vadd.f32 %v6287_v33, %v11165_v21 }
0x126b   :  { %6008 = vrot.lane.b32.xlu1 %v5994_v52, %s9124_s25  ;;  %v6481_v23 = vadd.f32 %v10667_v22, %v6421_v51  ;;  %v6546_v20 = vadd.f32 %v6529_v45, %v6484_v39  ;;  %v6236_v12 = vadd.f32 %v6226_v54, %v6176_v63  ;;  %v6410_v49 = vsel %vm5881_vm5, %v6400_v35, %v10659_v43  ;;  %v6598_v43 = vld [vmem:[%s11091_s15 + $0x8] sm:$0xff]  ;;  %v11167_v51 = vld [vmem:[#allocation32_spill] sm:$0xff] }
0x126c   :  { %v6534_v29 = vsel %vm6530_vm10, %v10677_v42, %v6529_v45  ;;  %v6358_v48 = vadd.f32 %v6348_v53, %v6297_v44  ;;  %v6532_v27 = vsel %vm6530_vm10, %v11167_v51, %v10823_v61  ;;  %v11168_v45 = vld [vmem:[#allocation37_spill] sm:$0xff] }
0x126d   :  { %5835 = vrot.lane.b32.xlu0 %v5823_v4, %s9131_s27  ;;  %v6543_v8 = vadd.f32 %v10823_v61, %v6481_v23  ;;  %v6298_v30 = vadd.f32 %v6288_v1, %v6236_v12  ;;  %v6545_v55 = vadd.f32 %v6534_v29, %v6483_v15  ;;  %v6597_v23 = vld [vmem:[%s11091_s15] sm:$0xff]  ;;  %v6599_v61 = vld [vmem:[%s11091_s15 + $0x10] sm:$0xff] }
0x126e   :  { %v6525_v26 = vpop.permute.xlu1 %6524  ;;  %v6459_v57 = vpop.permute.xlu0 %6458  ;;  %v6579_v29 = vld [vmem:[#allocation20 + $0x8] sm:$0xff] }
0x126f   :  { %6563 = vrot.lane.b32.xlu1 %v6546_v20, %s9132_s23  ;;  %v6533_v25 = vsel %vm6530_vm10, %v6525_v26, %v10677_v42  ;;  %v6359_v9 = vadd.f32 %v6349_v13, %v6298_v30  ;;  %v6470_v6 = vsel %vm6468_vm8, %v6459_v57, %v10667_v22  ;;  %v11166_v42 = vld [vmem:[#allocation36_spill] sm:$0xff]  ;;  %v6469_v4 = vsel %vm6468_vm8, %v11168_v45, %v6459_v57 }
0x1270   :  { %v6544_v46 = vadd.f32 %v6533_v25, %v6482_v28  ;;  %v6409_v22 = vsel %vm5881_vm5, %v11166_v42, %v6400_v35 }
0x1271   :  { %6006 = vrot.lane.b32.xlu0 %v5993_v37, %s9124_s25  ;;  %v6420_v31 = vadd.f32 %v6410_v49, %v6359_v9  ;;  %v6419_v39 = vadd.f32 %v6409_v22, %v6358_v48 }
0x1272   :  { %v6519_v52 = vpop.permute.xlu0 %6518 }
0x1273   :  { %6557 = vrot.lane.b32.xlu1 %v6543_v8, %s9132_s23  ;;  %v6480_v62 = vadd.f32 %v6470_v6, %v6420_v31  ;;  %v6531_v34 = vsel %vm6530_vm10, %v6519_v52, %v11167_v51  ;;  %v6479_v19 = vadd.f32 %v6469_v4, %v6419_v39  ;;  %v6580_v6 = vld [vmem:[#allocation20 + $0x10] sm:$0xff] }
0x1275   :  { %5843 = vrot.lane.b32.xlu0 %v5827_v58, %s9131_s27  ;;  %v6542_v5 = vadd.f32 %v6532_v27, %v6480_v62  ;;  %v6541_v59 = vadd.f32 %v6531_v34, %v6479_v19 }
0x1277   :  { %6559 = vrot.lane.b32.xlu1 %v6544_v46, %s9132_s23 }
0x1279   :  { %5837 = vrot.lane.b32.xlu0 %v5824_v32, %s9131_s27 }
0x127b   :  { %6607 = vperm.xlu1 %8719, %v6598_v43  }
0x127d   :  { %6561 = vrot.lane.b32.xlu0 %v6545_v55, %s9132_s23 }
0x1281   :  { %6555 = vrot.lane.b32.xlu0 %v6542_v5, %s9132_s23 }
0x1285   :  { %6553 = vrot.lane.b32.xlu0 %v6541_v59, %s9132_s23 }
0x1289   :  { %6602 = vperm.xlu0 %8718, %v6597_v23  }
0x128d   :  { %6612 = vperm.xlu0 %8718, %v6599_v61  }
0x12c7   :  { %v6011_v20 = vpop.permute.xlu1 %6010 }
0x12c8   :  { %v6013_v2 = vpop.permute.xlu0 %6012 }
0x12c9   :  { %v6019_v50 = vsel %vm6016_vm9, %v6011_v20, %v6013_v2 }
0x12cb   :  { %v5842_v38 = vpop.permute.xlu1 %5841 }
0x12cf   :  { %v5846_v56 = vpop.permute.xlu1 %5845 }
0x12d5   :  { %v5840_v37 = vpop.permute.xlu1 %5839 }
0x12d9   :  { %v6015_v35 = vpop.permute.xlu1 %6014 }
0x12da   :  { %v6020_v26 = vsel %vm6016_vm9, %v6013_v2, %v6015_v35 }
0x12db   :  { %v6005_v54 = vpop.permute.xlu0 %6004 }
0x12dd   :  { %v6009_v0 = vpop.permute.xlu1 %6008 }
0x12df   :  { %v5836_v14 = vpop.permute.xlu0 %5835 }
0x12e1   :  { %v6564_v63 = vpop.permute.xlu1 %6563 }
0x12e3   :  { %v6007_v17 = vpop.permute.xlu0 %6006 }
0x12e4   :  { %v6017_v8 = vsel %vm6016_vm9, %v6005_v54, %v6007_v17  ;;  %v6018_v41 = vsel %vm6016_vm9, %v6007_v17, %v6009_v0 }
0x12e5   :  { %v6558_v40 = vpop.permute.xlu1 %6557  ;;  %v8538_v18 = vpack.c.bf16 %v6020_v26, %v6018_v41  ;;  %v8540_v57 = vpack.c.bf16 %v6019_v50, %v6017_v8 }
0x12e7   :  { %v5844_v1 = vpop.permute.xlu0 %5843 }
0x12e8   :  { %v5850_v25 = vsel %vm5847_vm11, %v5842_v38, %v5844_v1  ;;  %v5851_v12 = vsel %vm5847_vm11, %v5844_v1, %v5846_v56 }
0x12e9   :  { %v6560_v60 = vpop.permute.xlu1 %6559 }
0x12eb   :  { %v5838_v58 = vpop.permute.xlu0 %5837 }
0x12ec   :  { %v5848_v28 = vsel %vm5847_vm11, %v5836_v14, %v5838_v58  ;;  %v5849_v7 = vsel %vm5847_vm11, %v5838_v58, %v5840_v37 }
0x12ed   :  { %v8534_v10 = vpack.c.bf16 %v5851_v12, %v5849_v7  ;;  %v8536_v24 = vpack.c.bf16 %v5850_v25, %v5848_v28 }
0x12ef   :  { %v6562_v13 = vpop.permute.xlu0 %6561  ;;  %8535 = vmatprep.subr.bf16.mxu0 %v8534_v10 }
0x12f0   :  { %v6568_v30 = vsel %vm6565_vm12, %v6560_v60, %v6562_v13  ;;  %v6569_v46 = vsel %vm6565_vm12, %v6562_v13, %v6564_v63  ;;  %8537 = vmatpush1.bf16.msra.mxu0 %v8536_v24 }
0x12f1   :  { %8539 = vmatprep.subr.bf16.mxu0 %v8538_v18 }
0x12f3   :  { %v6556_v16 = vpop.permute.xlu0 %6555 }
0x12f4   :  { %v6567_v49 = vsel %vm6565_vm12, %v6556_v16, %v6558_v40  ;;  %8541 = vmatpush1.bf16.msra.mxu0 %v8540_v57 }
0x12f5   :  { %v8542_v32 = vpack.c.bf16 %v6569_v46, %v6567_v49 }
0x12f7   :  { %v6554_v9 = vpop.permute.xlu0 %6553  ;;  %8543 = vmatprep.subr.bf16.mxu0 %v8542_v32 }
0x12f8   :  { %v6566_v3 = vsel %vm6565_vm12, %v6554_v9, %v6556_v16 }
0x12f9   :  { %v8544_v33 = vpack.c.bf16 %v6568_v30, %v6566_v3 }
0x12fa   :  { %v6608_v44 = vpop.permute.xlu1 %6607 }
0x12fb   :  { %8545 = vmatpush1.bf16.msra.mxu0 %v8544_v33 }
0x12fe   :  { %6764 = vmatmul.mubr.msk.f32.vlgmr.msra.gmra.mrb[24].mxu0 %vm1606_vm6, %v6578_v36 }
0x12ff   :  { %6694 = vmatprep.mubr.f32.mxu0 %v10613_v11 }
0x1302   :  { %6765 = vmatmul.mubr.msk.f32.gmra.mrb[26].mxu0 %vm1606_vm6, %v6579_v29 }
0x1303   :  { %6700 = vmatprep.mubr.f32.mxu0 %v10613_v11 }
0x1306   :  { %6766 = vmatmul.mubr.msk.f32.gmra.mrb[28].mxu0 %vm1606_vm6, %v6580_v6 }
0x1308   :  { %v6603_v43 = vpop.permute.xlu0 %6602 }
0x130c   :  { %v6613_v11 = vpop.permute.xlu0 %6612 }
0x13d1   :  { %v6690_v15 = vpop.f32.mrb[24].mxu0 }
0x13d2   :  { %v6691_v31 = vadd.f32 %v6690_v15, %v6603_v43  ;;  %v6692_v47 = vpop.f32.mrb[25].mxu0 }
0x13d3   :  { %v6693_v53 = vadd.f32 %v6692_v47, %v6603_v43 }
0x13d4   :  { %v6707_v21 = vsub.f32 0.0, %v6691_v31 }
0x13d5   :  { %v6708_v55 = vsub.f32 0.0, %v6693_v53  ;;  %v6696_v62 = vpop.f32.mrb[26].mxu0 }
0x13d6   :  { %v6713_v42 = vmul.f32 1.442695, %v6707_v21  ;;  %v6697_v22 = vadd.f32 %v6696_v62, %v6608_v44  ;;  %v6698_v48 = vpop.f32.mrb[27].mxu0 }
0x13d7   :  { %v6715_v52 = vmul.f32 1.442695, %v6708_v55  ;;  %v6699_v51 = vadd.f32 %v6698_v48, %v6608_v44 }
0x13d8   :  { %8784 = vpow2.f32 %v6713_v42  ;;  %v6709_v27 = vsub.f32 0.0, %v6697_v22 }
0x13d9   :  { %8786 = vpow2.f32 %v6715_v52  ;;  %v6710_v45 = vsub.f32 0.0, %v6699_v51  ;;  %v6702_v4 = vpop.f32.mrb[28].mxu0 }
0x13da   :  { %v6717_v39 = vmul.f32 1.442695, %v6709_v27  ;;  %v6703_v5 = vadd.f32 %v6702_v4, %v6613_v11  ;;  %v6704_v34 = vpop.f32.mrb[29].mxu0 }
0x13db   :  { %v6719_v19 = vmul.f32 1.442695, %v6710_v45  ;;  %v6705_v59 = vadd.f32 %v6704_v34, %v6613_v11 }
0x13dc   :  { %8788 = vpow2.f32 %v6717_v39  ;;  %v6711_v23 = vsub.f32 0.0, %v6703_v5 }
0x13dd   :  { %8790 = vpow2.f32 %v6719_v19  ;;  %v6712_v61 = vsub.f32 0.0, %v6705_v59 }
0x13de   :  { %v6721_v20 = vmul.f32 1.442695, %v6711_v23 }
0x13df   :  { %v6723_v2 = vmul.f32 1.442695, %v6712_v61 }
0x13e0   :  { %8792 = vpow2.f32 %v6721_v20 }
0x13e1   :  { %8794 = vpow2.f32 %v6723_v2 }
0x13e2   :  { %v8785_v50 = vpop.eup %8784 }
0x13e3   :  { %v8787_v38 = vpop.eup %8786  ;;  %v6725_v56 = vadd.f32 1.0, %v8785_v50 }
0x13e4   :  { %v6726_v37 = vadd.f32 1.0, %v8787_v38 }
0x13e5   :  { %8796 = vrcp.f32 %v6725_v56 }
0x13e6   :  { %v8789_v35 = vpop.eup %8788  ;;  %8798 = vrcp.f32 %v6726_v37 }
0x13e7   :  { %v8791_v26 = vpop.eup %8790  ;;  %v6727_v54 = vadd.f32 1.0, %v8789_v35 }
0x13e8   :  { %v6728_v0 = vadd.f32 1.0, %v8791_v26 }
0x13e9   :  { %8800 = vrcp.f32 %v6727_v54 }
0x13ea   :  { %v8793_v14 = vpop.eup %8792  ;;  %8802 = vrcp.f32 %v6728_v0 }
0x13eb   :  { %v8795_v63 = vpop.eup %8794  ;;  %v6729_v17 = vadd.f32 1.0, %v8793_v14 }
0x13ec   :  { %v6730_v8 = vadd.f32 1.0, %v8795_v63 }
0x13ed   :  { %8804 = vrcp.f32 %v6729_v17 }
0x13ee   :  { %8806 = vrcp.f32 %v6730_v8 }
0x13ef   :  { %v8797_v41 = vpop.eup %8796 }
0x13f0   :  { %v8799_v1 = vpop.eup %8798  ;;  %6737 = vst [vmem:[%s11093_s17] sm:$0xff] %v8797_v41 }
0x13f1   :  { %6738 = vst [vmem:[%s11093_s17 + $0x8] sm:$0xff] %v8799_v1 }
0x13f3   :  { %v8801_v25 = vpop.eup %8800 }
0x13f4   :  { %v8803_v12 = vpop.eup %8802  ;;  %6739 = vst [vmem:[%s11093_s17 + $0x10] sm:$0xff] %v8801_v25 }
0x13f5   :  { %6740 = vst [vmem:[%s11093_s17 + $0x18] sm:$0xff] %v8803_v12 }
0x13f7   :  { %v8805_v40 = vpop.eup %8804 }
0x13f8   :  { %v8807_v58 = vpop.eup %8806  ;;  %6741 = vst [vmem:[%s11093_s17 + $0x20] sm:$0xff] %v8805_v40 }
0x13f9   :  { %6742 = vst [vmem:[%s11093_s17 + $0x28] sm:$0xff] %v8807_v58 }
0x13fa   :  { %6747 = vsyncpa [#allocation5], 1 }
0x13fb   :  { %6748 = vsyncpa [#allocation7], 1 }
0x13fc   :  { %6749 = vsyncpa [#allocation10], 1 }
0x13fd   :  { %6750 = vsyncpa [#allocation13], 1 }
0x13fe   :  { %6751 = vsyncpa [#allocation16], 1 }
0x13ff   :  { %6752 = vsyncpa [#allocation19], 1 }
0x1400   :  { %6753 = vsyncpa [#allocation22], 1 }

</bundles_post_ra>
